<compile_context>
chip_gen: v5e
topology: v5e:2x2
jax: 0.10.0
libtpu: 0.0.40
codegen_flags: <defaults>
</compile_context>

<pallas_src>
import functools

import jax
import jax.numpy as jnp
from jax import lax
from jax.experimental import pallas as pl
from jax.experimental.pallas import tpu as pltpu


def _round_up(a, b):
    return -(-a // b) * b


def _sepconv3d_kernel(x_ref, w_ref, o_ref, slab_ref, *,
                      K, Cp, Wp, dil, G, Pp, OC):
    """One grid step = one batch item x G output D-planes.

    x_ref    : (Dx*Cp, P_lane)  padded input volume of this batch item (bf16);
                                rows = (d_plane, channel), lanes = flattened plane
    w_ref    : (OCp, K^3*Cp)    fused depthwise*pointwise weights (bf16)
    o_ref    : (G, OC, Pp)      G output planes, lane-dense padded plane
    slab_ref : (K^3*Cp, G*Pp)   VMEM scratch: fully materialized activation slab
    """
    d0 = pl.program_id(1) * G                     # first output plane of this step
    n_src = G + (K - 1) * dil                     # distinct source planes needed

    # ---- build the activation slab ------------------------------------------
    # Each source plane is loaded once; each of the K*K in-plane lane shifts is
    # computed once and copied to every (kd, g) destination.  Destinations are
    # sublane/lane aligned (row starts multiples of Cp, column starts multiples
    # of Pp which is a multiple of 128).
    for t in range(n_src):
        row = pl.multiple_of((d0 + t) * Cp, Cp)
        plane = x_ref[pl.ds(row, Cp), :]                       # (Cp, P_lane)
        for kh in range(K):
            for kw in range(K):
                off = (kh * Wp + kw) * dil                     # static lane offset
                shifted = plane[:, off:off + Pp]               # (Cp, Pp)
                for kd in range(K):
                    g = t - kd * dil
                    if 0 <= g < G:
                        r0 = ((kd * K + kh) * K + kw) * Cp
                        slab_ref[pl.ds(r0, Cp), pl.ds(g * Pp, Pp)] = shifted

    # ---- one MXU matmul covering all K^3 taps, all channels, all G planes ----
    acc = jnp.dot(w_ref[...], slab_ref[...],
                  preferred_element_type=jnp.float32)          # (OCp, G*Pp) f32

    for g in range(G):                                         # lane-aligned slices
        o_ref[g, :, :] = acc[:OC, g * Pp:(g + 1) * Pp].astype(o_ref.dtype)


def _pick_vmem_limit_bytes():
    """Per-generation VMEM budget (v5e/v6e: 128 MiB physical, v7x: 64 MiB)."""
    phys = None
    try:
        info = pltpu.get_tpu_info()
        phys = int(getattr(info, "vmem_capacity_bytes", 0)) or None
    except Exception:
        phys = None
    if phys is None:
        phys = 64 * 1024 * 1024        # conservative fallback (v7x per-core size)
    return min((phys * 3) // 4, 100 * 1024 * 1024)


def separable_conv3d(x, dw_w, pw_w, *, kernel_size=3, stride=1, padding=0,
                     dilation=1, planes_per_step=4,
                     compute_dtype=jnp.bfloat16):
    """x: (N, C, D, H, W); dw_w: (C, 1, K, K, K); pw_w: (OC, C, 1, 1, 1)."""
    assert stride == 1  # TODO(synk): stride > 1 not implemented (module default is 1)
    N, C, D, H, W = x.shape
    K = kernel_size
    OC = pw_w.shape[0]
    dil = dilation
    p = padding

    Do = D + 2 * p - dil * (K - 1)
    Ho = H + 2 * p - dil * (K - 1)
    Wo = W + 2 * p - dil * (K - 1)
    Hp, Wp = H + 2 * p, W + 2 * p

    itemsize = jnp.dtype(compute_dtype).itemsize
    sub = 8 * (4 // itemsize)                 # sublane packing: 8 (f32) / 16 (bf16)
    Cp = _round_up(C, sub)                    # channel pad -> aligned plane slices
    OCp = _round_up(OC, sub)
    Kc = K * K * K * Cp                       # fused contraction depth

    G = max(1, min(planes_per_step, Do))      # output D-planes per grid step
    DB = -(-Do // G)
    Do_pad = DB * G

    Pp = _round_up(Ho * Wp, 128)              # lane-dense padded output plane
    max_off = (K - 1) * dil * (Wp + 1)        # largest static in-plane tap offset
    P_lane = max_off + Pp                     # padded input plane covers all taps
    Dx = Do_pad + (K - 1) * dil               # input D-planes incl. grid-pad planes

    # ---- input prep (layout plumbing): (N,C,D,H,W) -> (N, Dx*Cp, P_lane), bf16
    x_t = jnp.transpose(x, (0, 2, 1, 3, 4))                        # (N, D, C, H, W)
    x_pad = jnp.pad(x_t, ((0, 0), (p, Dx - D - p), (0, Cp - C), (p, p), (p, p)))
    x_prep = x_pad.reshape(N, Dx * Cp, Hp * Wp)
    x_prep = jnp.pad(x_prep, ((0, 0), (0, 0), (0, P_lane - Hp * Wp)))
    x_prep = x_prep.astype(compute_dtype)

    # ---- fused depthwise (x) pointwise effective weight: (OCp, K^3*Cp), bf16
    # weff[oc, kd, kh, kw, c] = pw[oc, c] * dw[c, kd, kh, kw]
    dw_t = jnp.transpose(dw_w[:, 0], (1, 2, 3, 0))                 # (kd, kh, kw, c)
    weff = pw_w[:, :, 0, 0, 0][:, None, None, None, :] * dw_t[None]
    weff = jnp.pad(weff, ((0, OCp - OC), (0, 0), (0, 0), (0, 0), (0, Cp - C)))
    w_prep = weff.reshape(OCp, Kc).astype(compute_dtype)

    kernel = functools.partial(_sepconv3d_kernel, K=K, Cp=Cp, Wp=Wp, dil=dil,
                               G=G, Pp=Pp, OC=OC)

    out_dtype = x.dtype
    cost = pl.CostEstimate(
        flops=2 * N * DB * OCp * Kc * G * Pp,
        transcendentals=0,
        bytes_accessed=(x_prep.size * itemsize + w_prep.size * itemsize
                        + N * Do_pad * OC * Pp * jnp.dtype(out_dtype).itemsize))

    out = pl.pallas_call(
        kernel,
        out_shape=jax.ShapeDtypeStruct((N, DB, G, OC, Pp), out_dtype),
        grid=(N, DB),
        in_specs=[
            # whole padded volume of one batch item; resident across the db axis
            # TODO(synk): pl.Buffered(1) / D-halo tiling for realistic v7x sizes.
            pl.BlockSpec((None, Dx * Cp, P_lane), lambda n, db: (n, 0, 0)),
            pl.BlockSpec((OCp, Kc), lambda n, db: (0, 0)),
        ],
        out_specs=pl.BlockSpec((None, None, G, OC, Pp),
                               lambda n, db: (n, db, 0, 0, 0)),
        scratch_shapes=[pltpu.VMEM((Kc, G * Pp), compute_dtype)],
        compiler_params=pltpu.CompilerParams(
            dimension_semantics=("parallel", "arbitrary"),
            vmem_limit_bytes=_pick_vmem_limit_bytes()),
        cost_estimate=cost,
    )(x_prep, w_prep)

    # ---- output un-flattening (layout plumbing): crop pads, back to NCDHW
    out = out.reshape(N, Do_pad, OC, Pp)[:, :Do, :, :Ho * Wp]
    out = out.reshape(N, Do, OC, Ho, Wp)[..., :Wo]                 # (N, Do, OC, Ho, Wo)
    return jnp.transpose(out, (0, 2, 1, 3, 4))                     # (N, OC, Do, Ho, Wo)


def _reference(x, dw_w, pw_w, padding, dilation):
    """Pure-JAX reference mirroring the PyTorch forward exactly (f32, HIGHEST)."""
    C = x.shape[1]
    y = lax.conv_general_dilated(
        x, dw_w, window_strides=(1, 1, 1),
        padding=[(padding, padding)] * 3,
        rhs_dilation=(dilation,) * 3,
        dimension_numbers=('NCDHW', 'OIDHW', 'NCDHW'),
        feature_group_count=C,
        precision=lax.Precision.HIGHEST)
    return lax.conv_general_dilated(
        y, pw_w, window_strides=(1, 1, 1), padding=[(0, 0)] * 3,
        dimension_numbers=('NCDHW', 'OIDHW', 'NCDHW'),
        precision=lax.Precision.HIGHEST)


if __name__ == "__main__":
    # small shapes consistent with the module (NCDHW input)
    N, C, OC = 2, 4, 8
    D = H = W = 16
    K, padding, dilation = 3, 1, 1   # typical instantiation (kernel_size=3, padding=1)

    key = jax.random.PRNGKey(0)
    kx, kdw, kpw = jax.random.split(key, 3)
    x = jax.random.normal(kx, (N, C, D, H, W), jnp.float32)
    # nn.Conv3d weights: depthwise (groups=C): (C, 1, K, K, K); pointwise: (OC, C, 1, 1, 1)
    dw_w = 0.1 * jax.random.normal(kdw, (C, 1, K, K, K), jnp.float32)
    pw_w = 0.1 * jax.random.normal(kpw, (OC, C, 1, 1, 1), jnp.float32)

    fn = jax.jit(functools.partial(separable_conv3d, kernel_size=K, padding=padding,
                                   dilation=dilation))
    out = fn(x, dw_w, pw_w)
    out = jax.block_until_ready(out)

    ref = _reference(x, dw_w, pw_w, padding, dilation)
    assert out.shape == ref.shape == (N, OC, D, H, W), (out.shape, ref.shape)
    # bf16-MXU numerics are intentional (per perf review): relaxed tolerance vs the
    # f32 HIGHEST-precision reference.
    max_err = float(jnp.max(jnp.abs(out - ref)))
    assert jnp.allclose(out, ref, atol=2e-2, rtol=2e-2), max_err
    print("KERNEL_OK")
</pallas_src>

<mosaic_0001>
module attributes {stable_mosaic.version = 11 : i64} {
  func.func @_sepconv3d_kernel(%arg0: i32, %arg1: i32, %arg2: memref<1x288x422xbf16, #tpu.memory_space<vmem>>, %arg3: memref<16x432xbf16, #tpu.memory_space<vmem>>, %arg4: memref<1x1x4x8x384xf32, #tpu.memory_space<vmem>>, %arg5: memref<432x1536xbf16, #tpu.memory_space<vmem>>) attributes {dimension_semantics = [#tpu.dimension_semantics<parallel>, #tpu.dimension_semantics<arbitrary>], iteration_bounds = array<i64: 2, 4>, scalar_prefetch = 0 : i64, scratch_operands = 1 : i64, tpu.core_type = #tpu.core_type<tc>, window_params = [{transform_indices = @transform_0, window_bounds = array<i64: 1, 288, 422>}, {pipeline_mode = #tpu.pipeline_mode<synchronous>, transform_indices = @transform_1, window_bounds = array<i64: 16, 432>}, {transform_indices = @transform_2, window_bounds = array<i64: 1, 1, 4, 8, 384>}]} {
    %c4_i32 = arith.constant 4 : i32
    %0 = arith.muli %arg1, %c4_i32 : i32
    %c0_i32 = arith.constant 0 : i32
    %1 = arith.addi %0, %c0_i32 : i32
    %c16_i32 = arith.constant 16 : i32
    %2 = arith.muli %1, %c16_i32 : i32
    %3 = tpu.assume_multiple %2, 16 : i32
    %c0 = arith.constant 0 : index
    %4 = arith.index_cast %3 : i32 to index
    %c0_0 = arith.constant 0 : index
    %5 = vector.load %arg2[%c0, %4, %c0_0] : memref<1x288x422xbf16, #tpu.memory_space<vmem>>, vector<1x16x422xbf16>
    %6 = vector.shape_cast %5 : vector<1x16x422xbf16> to vector<16x422xbf16>
    %7 = vector.extract_strided_slice %6 {offsets = [0, 0], sizes = [16, 384], strides = [1, 1]} : vector<16x422xbf16> to vector<16x384xbf16>
    %c0_1 = arith.constant 0 : index
    %c0_2 = arith.constant 0 : index
    %8 = vector.load %arg5[%c0_1, %c0_2] : memref<432x1536xbf16, #tpu.memory_space<vmem>>, vector<16x384xbf16>
    tpu.vector_store %arg5[%c0_1, %c0_2], %7 {strides = array<i32>} : memref<432x1536xbf16, #tpu.memory_space<vmem>>, vector<16x384xbf16>,
    %9 = vector.extract_strided_slice %6 {offsets = [0, 1], sizes = [16, 384], strides = [1, 1]} : vector<16x422xbf16> to vector<16x384xbf16>
    %c16 = arith.constant 16 : index
    %c0_3 = arith.constant 0 : index
    %10 = vector.load %arg5[%c16, %c0_3] : memref<432x1536xbf16, #tpu.memory_space<vmem>>, vector<16x384xbf16>
    tpu.vector_store %arg5[%c16, %c0_3], %9 {strides = array<i32>} : memref<432x1536xbf16, #tpu.memory_space<vmem>>, vector<16x384xbf16>,
    %11 = vector.extract_strided_slice %6 {offsets = [0, 2], sizes = [16, 384], strides = [1, 1]} : vector<16x422xbf16> to vector<16x384xbf16>
    %c32 = arith.constant 32 : index
    %c0_4 = arith.constant 0 : index
    %12 = vector.load %arg5[%c32, %c0_4] : memref<432x1536xbf16, #tpu.memory_space<vmem>>, vector<16x384xbf16>
    tpu.vector_store %arg5[%c32, %c0_4], %11 {strides = array<i32>} : memref<432x1536xbf16, #tpu.memory_space<vmem>>, vector<16x384xbf16>,
    %13 = vector.extract_strided_slice %6 {offsets = [0, 18], sizes = [16, 384], strides = [1, 1]} : vector<16x422xbf16> to vector<16x384xbf16>
    %c48 = arith.constant 48 : index
    %c0_5 = arith.constant 0 : index
    %14 = vector.load %arg5[%c48, %c0_5] : memref<432x1536xbf16, #tpu.memory_space<vmem>>, vector<16x384xbf16>
    tpu.vector_store %arg5[%c48, %c0_5], %13 {strides = array<i32>} : memref<432x1536xbf16, #tpu.memory_space<vmem>>, vector<16x384xbf16>,
    %15 = vector.extract_strided_slice %6 {offsets = [0, 19], sizes = [16, 384], strides = [1, 1]} : vector<16x422xbf16> to vector<16x384xbf16>
    %c64 = arith.constant 64 : index
    %c0_6 = arith.constant 0 : index
    %16 = vector.load %arg5[%c64, %c0_6] : memref<432x1536xbf16, #tpu.memory_space<vmem>>, vector<16x384xbf16>
    tpu.vector_store %arg5[%c64, %c0_6], %15 {strides = array<i32>} : memref<432x1536xbf16, #tpu.memory_space<vmem>>, vector<16x384xbf16>,
    %17 = vector.extract_strided_slice %6 {offsets = [0, 20], sizes = [16, 384], strides = [1, 1]} : vector<16x422xbf16> to vector<16x384xbf16>
    %c80 = arith.constant 80 : index
    %c0_7 = arith.constant 0 : index
    %18 = vector.load %arg5[%c80, %c0_7] : memref<432x1536xbf16, #tpu.memory_space<vmem>>, vector<16x384xbf16>
    tpu.vector_store %arg5[%c80, %c0_7], %17 {strides = array<i32>} : memref<432x1536xbf16, #tpu.memory_space<vmem>>, vector<16x384xbf16>,
    %19 = vector.extract_strided_slice %6 {offsets = [0, 36], sizes = [16, 384], strides = [1, 1]} : vector<16x422xbf16> to vector<16x384xbf16>
    %c96 = arith.constant 96 : index
    %c0_8 = arith.constant 0 : index
    %20 = vector.load %arg5[%c96, %c0_8] : memref<432x1536xbf16, #tpu.memory_space<vmem>>, vector<16x384xbf16>
    tpu.vector_store %arg5[%c96, %c0_8], %19 {strides = array<i32>} : memref<432x1536xbf16, #tpu.memory_space<vmem>>, vector<16x384xbf16>,
    %21 = vector.extract_strided_slice %6 {offsets = [0, 37], sizes = [16, 384], strides = [1, 1]} : vector<16x422xbf16> to vector<16x384xbf16>
    %c112 = arith.constant 112 : index
    %c0_9 = arith.constant 0 : index
    %22 = vector.load %arg5[%c112, %c0_9] : memref<432x1536xbf16, #tpu.memory_space<vmem>>, vector<16x384xbf16>
    tpu.vector_store %arg5[%c112, %c0_9], %21 {strides = array<i32>} : memref<432x1536xbf16, #tpu.memory_space<vmem>>, vector<16x384xbf16>,
    %23 = vector.extract_strided_slice %6 {offsets = [0, 38], sizes = [16, 384], strides = [1, 1]} : vector<16x422xbf16> to vector<16x384xbf16>
    %c128 = arith.constant 128 : index
    %c0_10 = arith.constant 0 : index
    %24 = vector.load %arg5[%c128, %c0_10] : memref<432x1536xbf16, #tpu.memory_space<vmem>>, vector<16x384xbf16>
    tpu.vector_store %arg5[%c128, %c0_10], %23 {strides = array<i32>} : memref<432x1536xbf16, #tpu.memory_space<vmem>>, vector<16x384xbf16>,
    %c1_i32 = arith.constant 1 : i32
    %25 = arith.addi %0, %c1_i32 : i32
    %c16_i32_11 = arith.constant 16 : i32
    %26 = arith.muli %25, %c16_i32_11 : i32
    %27 = tpu.assume_multiple %26, 16 : i32
    %c0_12 = arith.constant 0 : index
    %28 = arith.index_cast %27 : i32 to index
    %c0_13 = arith.constant 0 : index
    %29 = vector.load %arg2[%c0_12, %28, %c0_13] : memref<1x288x422xbf16, #tpu.memory_space<vmem>>, vector<1x16x422xbf16>
    %30 = vector.shape_cast %29 : vector<1x16x422xbf16> to vector<16x422xbf16>
    %31 = vector.extract_strided_slice %30 {offsets = [0, 0], sizes = [16, 384], strides = [1, 1]} : vector<16x422xbf16> to vector<16x384xbf16>
    %c0_14 = arith.constant 0 : index
    %c384 = arith.constant 384 : index
    %32 = vector.load %arg5[%c0_14, %c384] : memref<432x1536xbf16, #tpu.memory_space<vmem>>, vector<16x384xbf16>
    tpu.vector_store %arg5[%c0_14, %c384], %31 {strides = array<i32>} : memref<432x1536xbf16, #tpu.memory_space<vmem>>, vector<16x384xbf16>,
    %c144 = arith.constant 144 : index
    %c0_15 = arith.constant 0 : index
    %33 = vector.load %arg5[%c144, %c0_15] : memref<432x1536xbf16, #tpu.memory_space<vmem>>, vector<16x384xbf16>
    tpu.vector_store %arg5[%c144, %c0_15], %31 {strides = array<i32>} : memref<432x1536xbf16, #tpu.memory_space<vmem>>, vector<16x384xbf16>,
    %34 = vector.extract_strided_slice %30 {offsets = [0, 1], sizes = [16, 384], strides = [1, 1]} : vector<16x422xbf16> to vector<16x384xbf16>
    %c16_16 = arith.constant 16 : index
    %c384_17 = arith.constant 384 : index
    %35 = vector.load %arg5[%c16_16, %c384_17] : memref<432x1536xbf16, #tpu.memory_space<vmem>>, vector<16x384xbf16>
    tpu.vector_store %arg5[%c16_16, %c384_17], %34 {strides = array<i32>} : memref<432x1536xbf16, #tpu.memory_space<vmem>>, vector<16x384xbf16>,
    %c160 = arith.constant 160 : index
    %c0_18 = arith.constant 0 : index
    %36 = vector.load %arg5[%c160, %c0_18] : memref<432x1536xbf16, #tpu.memory_space<vmem>>, vector<16x384xbf16>
    tpu.vector_store %arg5[%c160, %c0_18], %34 {strides = array<i32>} : memref<432x1536xbf16, #tpu.memory_space<vmem>>, vector<16x384xbf16>,
    %37 = vector.extract_strided_slice %30 {offsets = [0, 2], sizes = [16, 384], strides = [1, 1]} : vector<16x422xbf16> to vector<16x384xbf16>
    %c32_19 = arith.constant 32 : index
    %c384_20 = arith.constant 384 : index
    %38 = vector.load %arg5[%c32_19, %c384_20] : memref<432x1536xbf16, #tpu.memory_space<vmem>>, vector<16x384xbf16>
    tpu.vector_store %arg5[%c32_19, %c384_20], %37 {strides = array<i32>} : memref<432x1536xbf16, #tpu.memory_space<vmem>>, vector<16x384xbf16>,
    %c176 = arith.constant 176 : index
    %c0_21 = arith.constant 0 : index
    %39 = vector.load %arg5[%c176, %c0_21] : memref<432x1536xbf16, #tpu.memory_space<vmem>>, vector<16x384xbf16>
    tpu.vector_store %arg5[%c176, %c0_21], %37 {strides = array<i32>} : memref<432x1536xbf16, #tpu.memory_space<vmem>>, vector<16x384xbf16>,
    %40 = vector.extract_strided_slice %30 {offsets = [0, 18], sizes = [16, 384], strides = [1, 1]} : vector<16x422xbf16> to vector<16x384xbf16>
    %c48_22 = arith.constant 48 : index
    %c384_23 = arith.constant 384 : index
    %41 = vector.load %arg5[%c48_22, %c384_23] : memref<432x1536xbf16, #tpu.memory_space<vmem>>, vector<16x384xbf16>
    tpu.vector_store %arg5[%c48_22, %c384_23], %40 {strides = array<i32>} : memref<432x1536xbf16, #tpu.memory_space<vmem>>, vector<16x384xbf16>,
    %c192 = arith.constant 192 : index
    %c0_24 = arith.constant 0 : index
    %42 = vector.load %arg5[%c192, %c0_24] : memref<432x1536xbf16, #tpu.memory_space<vmem>>, vector<16x384xbf16>
    tpu.vector_store %arg5[%c192, %c0_24], %40 {strides = array<i32>} : memref<432x1536xbf16, #tpu.memory_space<vmem>>, vector<16x384xbf16>,
    %43 = vector.extract_strided_slice %30 {offsets = [0, 19], sizes = [16, 384], strides = [1, 1]} : vector<16x422xbf16> to vector<16x384xbf16>
    %c64_25 = arith.constant 64 : index
    %c384_26 = arith.constant 384 : index
    %44 = vector.load %arg5[%c64_25, %c384_26] : memref<432x1536xbf16, #tpu.memory_space<vmem>>, vector<16x384xbf16>
    tpu.vector_store %arg5[%c64_25, %c384_26], %43 {strides = array<i32>} : memref<432x1536xbf16, #tpu.memory_space<vmem>>, vector<16x384xbf16>,
    %c208 = arith.constant 208 : index
    %c0_27 = arith.constant 0 : index
    %45 = vector.load %arg5[%c208, %c0_27] : memref<432x1536xbf16, #tpu.memory_space<vmem>>, vector<16x384xbf16>
    tpu.vector_store %arg5[%c208, %c0_27], %43 {strides = array<i32>} : memref<432x1536xbf16, #tpu.memory_space<vmem>>, vector<16x384xbf16>,
    %46 = vector.extract_strided_slice %30 {offsets = [0, 20], sizes = [16, 384], strides = [1, 1]} : vector<16x422xbf16> to vector<16x384xbf16>
    %c80_28 = arith.constant 80 : index
    %c384_29 = arith.constant 384 : index
    %47 = vector.load %arg5[%c80_28, %c384_29] : memref<432x1536xbf16, #tpu.memory_space<vmem>>, vector<16x384xbf16>
    tpu.vector_store %arg5[%c80_28, %c384_29], %46 {strides = array<i32>} : memref<432x1536xbf16, #tpu.memory_space<vmem>>, vector<16x384xbf16>,
    %c224 = arith.constant 224 : index
    %c0_30 = arith.constant 0 : index
    %48 = vector.load %arg5[%c224, %c0_30] : memref<432x1536xbf16, #tpu.memory_space<vmem>>, vector<16x384xbf16>
    tpu.vector_store %arg5[%c224, %c0_30], %46 {strides = array<i32>} : memref<432x1536xbf16, #tpu.memory_space<vmem>>, vector<16x384xbf16>,
    %49 = vector.extract_strided_slice %30 {offsets = [0, 36], sizes = [16, 384], strides = [1, 1]} : vector<16x422xbf16> to vector<16x384xbf16>
    %c96_31 = arith.constant 96 : index
    %c384_32 = arith.constant 384 : index
    %50 = vector.load %arg5[%c96_31, %c384_32] : memref<432x1536xbf16, #tpu.memory_space<vmem>>, vector<16x384xbf16>
    tpu.vector_store %arg5[%c96_31, %c384_32], %49 {strides = array<i32>} : memref<432x1536xbf16, #tpu.memory_space<vmem>>, vector<16x384xbf16>,
    %c240 = arith.constant 240 : index
    %c0_33 = arith.constant 0 : index
    %51 = vector.load %arg5[%c240, %c0_33] : memref<432x1536xbf16, #tpu.memory_space<vmem>>, vector<16x384xbf16>
    tpu.vector_store %arg5[%c240, %c0_33], %49 {strides = array<i32>} : memref<432x1536xbf16, #tpu.memory_space<vmem>>, vector<16x384xbf16>,
    %52 = vector.extract_strided_slice %30 {offsets = [0, 37], sizes = [16, 384], strides = [1, 1]} : vector<16x422xbf16> to vector<16x384xbf16>
    %c112_34 = arith.constant 112 : index
    %c384_35 = arith.constant 384 : index
    %53 = vector.load %arg5[%c112_34, %c384_35] : memref<432x1536xbf16, #tpu.memory_space<vmem>>, vector<16x384xbf16>
    tpu.vector_store %arg5[%c112_34, %c384_35], %52 {strides = array<i32>} : memref<432x1536xbf16, #tpu.memory_space<vmem>>, vector<16x384xbf16>,
    %c256 = arith.constant 256 : index
    %c0_36 = arith.constant 0 : index
    %54 = vector.load %arg5[%c256, %c0_36] : memref<432x1536xbf16, #tpu.memory_space<vmem>>, vector<16x384xbf16>
    tpu.vector_store %arg5[%c256, %c0_36], %52 {strides = array<i32>} : memref<432x1536xbf16, #tpu.memory_space<vmem>>, vector<16x384xbf16>,
    %55 = vector.extract_strided_slice %30 {offsets = [0, 38], sizes = [16, 384], strides = [1, 1]} : vector<16x422xbf16> to vector<16x384xbf16>
    %c128_37 = arith.constant 128 : index
    %c384_38 = arith.constant 384 : index
    %56 = vector.load %arg5[%c128_37, %c384_38] : memref<432x1536xbf16, #tpu.memory_space<vmem>>, vector<16x384xbf16>
    tpu.vector_store %arg5[%c128_37, %c384_38], %55 {strides = array<i32>} : memref<432x1536xbf16, #tpu.memory_space<vmem>>, vector<16x384xbf16>,
    %c272 = arith.constant 272 : index
    %c0_39 = arith.constant 0 : index
    %57 = vector.load %arg5[%c272, %c0_39] : memref<432x1536xbf16, #tpu.memory_space<vmem>>, vector<16x384xbf16>
    tpu.vector_store %arg5[%c272, %c0_39], %55 {strides = array<i32>} : memref<432x1536xbf16, #tpu.memory_space<vmem>>, vector<16x384xbf16>,
    %c2_i32 = arith.constant 2 : i32
    %58 = arith.addi %0, %c2_i32 : i32
    %c16_i32_40 = arith.constant 16 : i32
    %59 = arith.muli %58, %c16_i32_40 : i32
    %60 = tpu.assume_multiple %59, 16 : i32
    %c0_41 = arith.constant 0 : index
    %61 = arith.index_cast %60 : i32 to index
    %c0_42 = arith.constant 0 : index
    %62 = vector.load %arg2[%c0_41, %61, %c0_42] : memref<1x288x422xbf16, #tpu.memory_space<vmem>>, vector<1x16x422xbf16>
    %63 = vector.shape_cast %62 : vector<1x16x422xbf16> to vector<16x422xbf16>
    %64 = vector.extract_strided_slice %63 {offsets = [0, 0], sizes = [16, 384], strides = [1, 1]} : vector<16x422xbf16> to vector<16x384xbf16>
    %c0_43 = arith.constant 0 : index
    %c768 = arith.constant 768 : index
    %65 = vector.load %arg5[%c0_43, %c768] : memref<432x1536xbf16, #tpu.memory_space<vmem>>, vector<16x384xbf16>
    tpu.vector_store %arg5[%c0_43, %c768], %64 {strides = array<i32>} : memref<432x1536xbf16, #tpu.memory_space<vmem>>, vector<16x384xbf16>,
    %c144_44 = arith.constant 144 : index
    %c384_45 = arith.constant 384 : index
    %66 = vector.load %arg5[%c144_44, %c384_45] : memref<432x1536xbf16, #tpu.memory_space<vmem>>, vector<16x384xbf16>
    tpu.vector_store %arg5[%c144_44, %c384_45], %64 {strides = array<i32>} : memref<432x1536xbf16, #tpu.memory_space<vmem>>, vector<16x384xbf16>,
    %c288 = arith.constant 288 : index
    %c0_46 = arith.constant 0 : index
    %67 = vector.load %arg5[%c288, %c0_46] : memref<432x1536xbf16, #tpu.memory_space<vmem>>, vector<16x384xbf16>
    tpu.vector_store %arg5[%c288, %c0_46], %64 {strides = array<i32>} : memref<432x1536xbf16, #tpu.memory_space<vmem>>, vector<16x384xbf16>,
    %68 = vector.extract_strided_slice %63 {offsets = [0, 1], sizes = [16, 384], strides = [1, 1]} : vector<16x422xbf16> to vector<16x384xbf16>
    %c16_47 = arith.constant 16 : index
    %c768_48 = arith.constant 768 : index
    %69 = vector.load %arg5[%c16_47, %c768_48] : memref<432x1536xbf16, #tpu.memory_space<vmem>>, vector<16x384xbf16>
    tpu.vector_store %arg5[%c16_47, %c768_48], %68 {strides = array<i32>} : memref<432x1536xbf16, #tpu.memory_space<vmem>>, vector<16x384xbf16>,
    %c160_49 = arith.constant 160 : index
    %c384_50 = arith.constant 384 : index
    %70 = vector.load %arg5[%c160_49, %c384_50] : memref<432x1536xbf16, #tpu.memory_space<vmem>>, vector<16x384xbf16>
    tpu.vector_store %arg5[%c160_49, %c384_50], %68 {strides = array<i32>} : memref<432x1536xbf16, #tpu.memory_space<vmem>>, vector<16x384xbf16>,
    %c304 = arith.constant 304 : index
    %c0_51 = arith.constant 0 : index
    %71 = vector.load %arg5[%c304, %c0_51] : memref<432x1536xbf16, #tpu.memory_space<vmem>>, vector<16x384xbf16>
    tpu.vector_store %arg5[%c304, %c0_51], %68 {strides = array<i32>} : memref<432x1536xbf16, #tpu.memory_space<vmem>>, vector<16x384xbf16>,
    %72 = vector.extract_strided_slice %63 {offsets = [0, 2], sizes = [16, 384], strides = [1, 1]} : vector<16x422xbf16> to vector<16x384xbf16>
    %c32_52 = arith.constant 32 : index
    %c768_53 = arith.constant 768 : index
    %73 = vector.load %arg5[%c32_52, %c768_53] : memref<432x1536xbf16, #tpu.memory_space<vmem>>, vector<16x384xbf16>
    tpu.vector_store %arg5[%c32_52, %c768_53], %72 {strides = array<i32>} : memref<432x1536xbf16, #tpu.memory_space<vmem>>, vector<16x384xbf16>,
    %c176_54 = arith.constant 176 : index
    %c384_55 = arith.constant 384 : index
    %74 = vector.load %arg5[%c176_54, %c384_55] : memref<432x1536xbf16, #tpu.memory_space<vmem>>, vector<16x384xbf16>
    tpu.vector_store %arg5[%c176_54, %c384_55], %72 {strides = array<i32>} : memref<432x1536xbf16, #tpu.memory_space<vmem>>, vector<16x384xbf16>,
    %c320 = arith.constant 320 : index
    %c0_56 = arith.constant 0 : index
    %75 = vector.load %arg5[%c320, %c0_56] : memref<432x1536xbf16, #tpu.memory_space<vmem>>, vector<16x384xbf16>
    tpu.vector_store %arg5[%c320, %c0_56], %72 {strides = array<i32>} : memref<432x1536xbf16, #tpu.memory_space<vmem>>, vector<16x384xbf16>,
    %76 = vector.extract_strided_slice %63 {offsets = [0, 18], sizes = [16, 384], strides = [1, 1]} : vector<16x422xbf16> to vector<16x384xbf16>
    %c48_57 = arith.constant 48 : index
    %c768_58 = arith.constant 768 : index
    %77 = vector.load %arg5[%c48_57, %c768_58] : memref<432x1536xbf16, #tpu.memory_space<vmem>>, vector<16x384xbf16>
    tpu.vector_store %arg5[%c48_57, %c768_58], %76 {strides = array<i32>} : memref<432x1536xbf16, #tpu.memory_space<vmem>>, vector<16x384xbf16>,
    %c192_59 = arith.constant 192 : index
    %c384_60 = arith.constant 384 : index
    %78 = vector.load %arg5[%c192_59, %c384_60] : memref<432x1536xbf16, #tpu.memory_space<vmem>>, vector<16x384xbf16>
    tpu.vector_store %arg5[%c192_59, %c384_60], %76 {strides = array<i32>} : memref<432x1536xbf16, #tpu.memory_space<vmem>>, vector<16x384xbf16>,
    %c336 = arith.constant 336 : index
    %c0_61 = arith.constant 0 : index
    %79 = vector.load %arg5[%c336, %c0_61] : memref<432x1536xbf16, #tpu.memory_space<vmem>>, vector<16x384xbf16>
    tpu.vector_store %arg5[%c336, %c0_61], %76 {strides = array<i32>} : memref<432x1536xbf16, #tpu.memory_space<vmem>>, vector<16x384xbf16>,
    %80 = vector.extract_strided_slice %63 {offsets = [0, 19], sizes = [16, 384], strides = [1, 1]} : vector<16x422xbf16> to vector<16x384xbf16>
    %c64_62 = arith.constant 64 : index
    %c768_63 = arith.constant 768 : index
    %81 = vector.load %arg5[%c64_62, %c768_63] : memref<432x1536xbf16, #tpu.memory_space<vmem>>, vector<16x384xbf16>
    tpu.vector_store %arg5[%c64_62, %c768_63], %80 {strides = array<i32>} : memref<432x1536xbf16, #tpu.memory_space<vmem>>, vector<16x384xbf16>,
    %c208_64 = arith.constant 208 : index
    %c384_65 = arith.constant 384 : index
    %82 = vector.load %arg5[%c208_64, %c384_65] : memref<432x1536xbf16, #tpu.memory_space<vmem>>, vector<16x384xbf16>
    tpu.vector_store %arg5[%c208_64, %c384_65], %80 {strides = array<i32>} : memref<432x1536xbf16, #tpu.memory_space<vmem>>, vector<16x384xbf16>,
    %c352 = arith.constant 352 : index
    %c0_66 = arith.constant 0 : index
    %83 = vector.load %arg5[%c352, %c0_66] : memref<432x1536xbf16, #tpu.memory_space<vmem>>, vector<16x384xbf16>
    tpu.vector_store %arg5[%c352, %c0_66], %80 {strides = array<i32>} : memref<432x1536xbf16, #tpu.memory_space<vmem>>, vector<16x384xbf16>,
    %84 = vector.extract_strided_slice %63 {offsets = [0, 20], sizes = [16, 384], strides = [1, 1]} : vector<16x422xbf16> to vector<16x384xbf16>
    %c80_67 = arith.constant 80 : index
    %c768_68 = arith.constant 768 : index
    %85 = vector.load %arg5[%c80_67, %c768_68] : memref<432x1536xbf16, #tpu.memory_space<vmem>>, vector<16x384xbf16>
    tpu.vector_store %arg5[%c80_67, %c768_68], %84 {strides = array<i32>} : memref<432x1536xbf16, #tpu.memory_space<vmem>>, vector<16x384xbf16>,
    %c224_69 = arith.constant 224 : index
    %c384_70 = arith.constant 384 : index
    %86 = vector.load %arg5[%c224_69, %c384_70] : memref<432x1536xbf16, #tpu.memory_space<vmem>>, vector<16x384xbf16>
    tpu.vector_store %arg5[%c224_69, %c384_70], %84 {strides = array<i32>} : memref<432x1536xbf16, #tpu.memory_space<vmem>>, vector<16x384xbf16>,
    %c368 = arith.constant 368 : index
    %c0_71 = arith.constant 0 : index
    %87 = vector.load %arg5[%c368, %c0_71] : memref<432x1536xbf16, #tpu.memory_space<vmem>>, vector<16x384xbf16>
    tpu.vector_store %arg5[%c368, %c0_71], %84 {strides = array<i32>} : memref<432x1536xbf16, #tpu.memory_space<vmem>>, vector<16x384xbf16>,
    %88 = vector.extract_strided_slice %63 {offsets = [0, 36], sizes = [16, 384], strides = [1, 1]} : vector<16x422xbf16> to vector<16x384xbf16>
    %c96_72 = arith.constant 96 : index
    %c768_73 = arith.constant 768 : index
    %89 = vector.load %arg5[%c96_72, %c768_73] : memref<432x1536xbf16, #tpu.memory_space<vmem>>, vector<16x384xbf16>
    tpu.vector_store %arg5[%c96_72, %c768_73], %88 {strides = array<i32>} : memref<432x1536xbf16, #tpu.memory_space<vmem>>, vector<16x384xbf16>,
    %c240_74 = arith.constant 240 : index
    %c384_75 = arith.constant 384 : index
    %90 = vector.load %arg5[%c240_74, %c384_75] : memref<432x1536xbf16, #tpu.memory_space<vmem>>, vector<16x384xbf16>
    tpu.vector_store %arg5[%c240_74, %c384_75], %88 {strides = array<i32>} : memref<432x1536xbf16, #tpu.memory_space<vmem>>, vector<16x384xbf16>,
    %c384_76 = arith.constant 384 : index
    %c0_77 = arith.constant 0 : index
    %91 = vector.load %arg5[%c384_76, %c0_77] : memref<432x1536xbf16, #tpu.memory_space<vmem>>, vector<16x384xbf16>
    tpu.vector_store %arg5[%c384_76, %c0_77], %88 {strides = array<i32>} : memref<432x1536xbf16, #tpu.memory_space<vmem>>, vector<16x384xbf16>,
    %92 = vector.extract_strided_slice %63 {offsets = [0, 37], sizes = [16, 384], strides = [1, 1]} : vector<16x422xbf16> to vector<16x384xbf16>
    %c112_78 = arith.constant 112 : index
    %c768_79 = arith.constant 768 : index
    %93 = vector.load %arg5[%c112_78, %c768_79] : memref<432x1536xbf16, #tpu.memory_space<vmem>>, vector<16x384xbf16>
    tpu.vector_store %arg5[%c112_78, %c768_79], %92 {strides = array<i32>} : memref<432x1536xbf16, #tpu.memory_space<vmem>>, vector<16x384xbf16>,
    %c256_80 = arith.constant 256 : index
    %c384_81 = arith.constant 384 : index
    %94 = vector.load %arg5[%c256_80, %c384_81] : memref<432x1536xbf16, #tpu.memory_space<vmem>>, vector<16x384xbf16>
    tpu.vector_store %arg5[%c256_80, %c384_81], %92 {strides = array<i32>} : memref<432x1536xbf16, #tpu.memory_space<vmem>>, vector<16x384xbf16>,
    %c400 = arith.constant 400 : index
    %c0_82 = arith.constant 0 : index
    %95 = vector.load %arg5[%c400, %c0_82] : memref<432x1536xbf16, #tpu.memory_space<vmem>>, vector<16x384xbf16>
    tpu.vector_store %arg5[%c400, %c0_82], %92 {strides = array<i32>} : memref<432x1536xbf16, #tpu.memory_space<vmem>>, vector<16x384xbf16>,
    %96 = vector.extract_strided_slice %63 {offsets = [0, 38], sizes = [16, 384], strides = [1, 1]} : vector<16x422xbf16> to vector<16x384xbf16>
    %c128_83 = arith.constant 128 : index
    %c768_84 = arith.constant 768 : index
    %97 = vector.load %arg5[%c128_83, %c768_84] : memref<432x1536xbf16, #tpu.memory_space<vmem>>, vector<16x384xbf16>
    tpu.vector_store %arg5[%c128_83, %c768_84], %96 {strides = array<i32>} : memref<432x1536xbf16, #tpu.memory_space<vmem>>, vector<16x384xbf16>,
    %c272_85 = arith.constant 272 : index
    %c384_86 = arith.constant 384 : index
    %98 = vector.load %arg5[%c272_85, %c384_86] : memref<432x1536xbf16, #tpu.memory_space<vmem>>, vector<16x384xbf16>
    tpu.vector_store %arg5[%c272_85, %c384_86], %96 {strides = array<i32>} : memref<432x1536xbf16, #tpu.memory_space<vmem>>, vector<16x384xbf16>,
    %c416 = arith.constant 416 : index
    %c0_87 = arith.constant 0 : index
    %99 = vector.load %arg5[%c416, %c0_87] : memref<432x1536xbf16, #tpu.memory_space<vmem>>, vector<16x384xbf16>
    tpu.vector_store %arg5[%c416, %c0_87], %96 {strides = array<i32>} : memref<432x1536xbf16, #tpu.memory_space<vmem>>, vector<16x384xbf16>,
    %c3_i32 = arith.constant 3 : i32
    %100 = arith.addi %0, %c3_i32 : i32
    %c16_i32_88 = arith.constant 16 : i32
    %101 = arith.muli %100, %c16_i32_88 : i32
    %102 = tpu.assume_multiple %101, 16 : i32
    %c0_89 = arith.constant 0 : index
    %103 = arith.index_cast %102 : i32 to index
    %c0_90 = arith.constant 0 : index
    %104 = vector.load %arg2[%c0_89, %103, %c0_90] : memref<1x288x422xbf16, #tpu.memory_space<vmem>>, vector<1x16x422xbf16>
    %105 = vector.shape_cast %104 : vector<1x16x422xbf16> to vector<16x422xbf16>
    %106 = vector.extract_strided_slice %105 {offsets = [0, 0], sizes = [16, 384], strides = [1, 1]} : vector<16x422xbf16> to vector<16x384xbf16>
    %c0_91 = arith.constant 0 : index
    %c1152 = arith.constant 1152 : index
    %107 = vector.load %arg5[%c0_91, %c1152] : memref<432x1536xbf16, #tpu.memory_space<vmem>>, vector<16x384xbf16>
    tpu.vector_store %arg5[%c0_91, %c1152], %106 {strides = array<i32>} : memref<432x1536xbf16, #tpu.memory_space<vmem>>, vector<16x384xbf16>,
    %c144_92 = arith.constant 144 : index
    %c768_93 = arith.constant 768 : index
    %108 = vector.load %arg5[%c144_92, %c768_93] : memref<432x1536xbf16, #tpu.memory_space<vmem>>, vector<16x384xbf16>
    tpu.vector_store %arg5[%c144_92, %c768_93], %106 {strides = array<i32>} : memref<432x1536xbf16, #tpu.memory_space<vmem>>, vector<16x384xbf16>,
    %c288_94 = arith.constant 288 : index
    %c384_95 = arith.constant 384 : index
    %109 = vector.load %arg5[%c288_94, %c384_95] : memref<432x1536xbf16, #tpu.memory_space<vmem>>, vector<16x384xbf16>
    tpu.vector_store %arg5[%c288_94, %c384_95], %106 {strides = array<i32>} : memref<432x1536xbf16, #tpu.memory_space<vmem>>, vector<16x384xbf16>,
    %110 = vector.extract_strided_slice %105 {offsets = [0, 1], sizes = [16, 384], strides = [1, 1]} : vector<16x422xbf16> to vector<16x384xbf16>
    %c16_96 = arith.constant 16 : index
    %c1152_97 = arith.constant 1152 : index
    %111 = vector.load %arg5[%c16_96, %c1152_97] : memref<432x1536xbf16, #tpu.memory_space<vmem>>, vector<16x384xbf16>
    tpu.vector_store %arg5[%c16_96, %c1152_97], %110 {strides = array<i32>} : memref<432x1536xbf16, #tpu.memory_space<vmem>>, vector<16x384xbf16>,
    %c160_98 = arith.constant 160 : index
    %c768_99 = arith.constant 768 : index
    %112 = vector.load %arg5[%c160_98, %c768_99] : memref<432x1536xbf16, #tpu.memory_space<vmem>>, vector<16x384xbf16>
    tpu.vector_store %arg5[%c160_98, %c768_99], %110 {strides = array<i32>} : memref<432x1536xbf16, #tpu.memory_space<vmem>>, vector<16x384xbf16>,
    %c304_100 = arith.constant 304 : index
    %c384_101 = arith.constant 384 : index
    %113 = vector.load %arg5[%c304_100, %c384_101] : memref<432x1536xbf16, #tpu.memory_space<vmem>>, vector<16x384xbf16>
    tpu.vector_store %arg5[%c304_100, %c384_101], %110 {strides = array<i32>} : memref<432x1536xbf16, #tpu.memory_space<vmem>>, vector<16x384xbf16>,
    %114 = vector.extract_strided_slice %105 {offsets = [0, 2], sizes = [16, 384], strides = [1, 1]} : vector<16x422xbf16> to vector<16x384xbf16>
    %c32_102 = arith.constant 32 : index
    %c1152_103 = arith.constant 1152 : index
    %115 = vector.load %arg5[%c32_102, %c1152_103] : memref<432x1536xbf16, #tpu.memory_space<vmem>>, vector<16x384xbf16>
    tpu.vector_store %arg5[%c32_102, %c1152_103], %114 {strides = array<i32>} : memref<432x1536xbf16, #tpu.memory_space<vmem>>, vector<16x384xbf16>,
    %c176_104 = arith.constant 176 : index
    %c768_105 = arith.constant 768 : index
    %116 = vector.load %arg5[%c176_104, %c768_105] : memref<432x1536xbf16, #tpu.memory_space<vmem>>, vector<16x384xbf16>
    tpu.vector_store %arg5[%c176_104, %c768_105], %114 {strides = array<i32>} : memref<432x1536xbf16, #tpu.memory_space<vmem>>, vector<16x384xbf16>,
    %c320_106 = arith.constant 320 : index
    %c384_107 = arith.constant 384 : index
    %117 = vector.load %arg5[%c320_106, %c384_107] : memref<432x1536xbf16, #tpu.memory_space<vmem>>, vector<16x384xbf16>
    tpu.vector_store %arg5[%c320_106, %c384_107], %114 {strides = array<i32>} : memref<432x1536xbf16, #tpu.memory_space<vmem>>, vector<16x384xbf16>,
    %118 = vector.extract_strided_slice %105 {offsets = [0, 18], sizes = [16, 384], strides = [1, 1]} : vector<16x422xbf16> to vector<16x384xbf16>
    %c48_108 = arith.constant 48 : index
    %c1152_109 = arith.constant 1152 : index
    %119 = vector.load %arg5[%c48_108, %c1152_109] : memref<432x1536xbf16, #tpu.memory_space<vmem>>, vector<16x384xbf16>
    tpu.vector_store %arg5[%c48_108, %c1152_109], %118 {strides = array<i32>} : memref<432x1536xbf16, #tpu.memory_space<vmem>>, vector<16x384xbf16>,
    %c192_110 = arith.constant 192 : index
    %c768_111 = arith.constant 768 : index
    %120 = vector.load %arg5[%c192_110, %c768_111] : memref<432x1536xbf16, #tpu.memory_space<vmem>>, vector<16x384xbf16>
    tpu.vector_store %arg5[%c192_110, %c768_111], %118 {strides = array<i32>} : memref<432x1536xbf16, #tpu.memory_space<vmem>>, vector<16x384xbf16>,
    %c336_112 = arith.constant 336 : index
    %c384_113 = arith.constant 384 : index
    %121 = vector.load %arg5[%c336_112, %c384_113] : memref<432x1536xbf16, #tpu.memory_space<vmem>>, vector<16x384xbf16>
    tpu.vector_store %arg5[%c336_112, %c384_113], %118 {strides = array<i32>} : memref<432x1536xbf16, #tpu.memory_space<vmem>>, vector<16x384xbf16>,
    %122 = vector.extract_strided_slice %105 {offsets = [0, 19], sizes = [16, 384], strides = [1, 1]} : vector<16x422xbf16> to vector<16x384xbf16>
    %c64_114 = arith.constant 64 : index
    %c1152_115 = arith.constant 1152 : index
    %123 = vector.load %arg5[%c64_114, %c1152_115] : memref<432x1536xbf16, #tpu.memory_space<vmem>>, vector<16x384xbf16>
    tpu.vector_store %arg5[%c64_114, %c1152_115], %122 {strides = array<i32>} : memref<432x1536xbf16, #tpu.memory_space<vmem>>, vector<16x384xbf16>,
    %c208_116 = arith.constant 208 : index
    %c768_117 = arith.constant 768 : index
    %124 = vector.load %arg5[%c208_116, %c768_117] : memref<432x1536xbf16, #tpu.memory_space<vmem>>, vector<16x384xbf16>
    tpu.vector_store %arg5[%c208_116, %c768_117], %122 {strides = array<i32>} : memref<432x1536xbf16, #tpu.memory_space<vmem>>, vector<16x384xbf16>,
    %c352_118 = arith.constant 352 : index
    %c384_119 = arith.constant 384 : index
    %125 = vector.load %arg5[%c352_118, %c384_119] : memref<432x1536xbf16, #tpu.memory_space<vmem>>, vector<16x384xbf16>
    tpu.vector_store %arg5[%c352_118, %c384_119], %122 {strides = array<i32>} : memref<432x1536xbf16, #tpu.memory_space<vmem>>, vector<16x384xbf16>,
    %126 = vector.extract_strided_slice %105 {offsets = [0, 20], sizes = [16, 384], strides = [1, 1]} : vector<16x422xbf16> to vector<16x384xbf16>
    %c80_120 = arith.constant 80 : index
    %c1152_121 = arith.constant 1152 : index
    %127 = vector.load %arg5[%c80_120, %c1152_121] : memref<432x1536xbf16, #tpu.memory_space<vmem>>, vector<16x384xbf16>
    tpu.vector_store %arg5[%c80_120, %c1152_121], %126 {strides = array<i32>} : memref<432x1536xbf16, #tpu.memory_space<vmem>>, vector<16x384xbf16>,
    %c224_122 = arith.constant 224 : index
    %c768_123 = arith.constant 768 : index
    %128 = vector.load %arg5[%c224_122, %c768_123] : memref<432x1536xbf16, #tpu.memory_space<vmem>>, vector<16x384xbf16>
    tpu.vector_store %arg5[%c224_122, %c768_123], %126 {strides = array<i32>} : memref<432x1536xbf16, #tpu.memory_space<vmem>>, vector<16x384xbf16>,
    %c368_124 = arith.constant 368 : index
    %c384_125 = arith.constant 384 : index
    %129 = vector.load %arg5[%c368_124, %c384_125] : memref<432x1536xbf16, #tpu.memory_space<vmem>>, vector<16x384xbf16>
    tpu.vector_store %arg5[%c368_124, %c384_125], %126 {strides = array<i32>} : memref<432x1536xbf16, #tpu.memory_space<vmem>>, vector<16x384xbf16>,
    %130 = vector.extract_strided_slice %105 {offsets = [0, 36], sizes = [16, 384], strides = [1, 1]} : vector<16x422xbf16> to vector<16x384xbf16>
    %c96_126 = arith.constant 96 : index
    %c1152_127 = arith.constant 1152 : index
    %131 = vector.load %arg5[%c96_126, %c1152_127] : memref<432x1536xbf16, #tpu.memory_space<vmem>>, vector<16x384xbf16>
    tpu.vector_store %arg5[%c96_126, %c1152_127], %130 {strides = array<i32>} : memref<432x1536xbf16, #tpu.memory_space<vmem>>, vector<16x384xbf16>,
    %c240_128 = arith.constant 240 : index
    %c768_129 = arith.constant 768 : index
    %132 = vector.load %arg5[%c240_128, %c768_129] : memref<432x1536xbf16, #tpu.memory_space<vmem>>, vector<16x384xbf16>
    tpu.vector_store %arg5[%c240_128, %c768_129], %130 {strides = array<i32>} : memref<432x1536xbf16, #tpu.memory_space<vmem>>, vector<16x384xbf16>,
    %c384_130 = arith.constant 384 : index
    %c384_131 = arith.constant 384 : index
    %133 = vector.load %arg5[%c384_130, %c384_131] : memref<432x1536xbf16, #tpu.memory_space<vmem>>, vector<16x384xbf16>
    tpu.vector_store %arg5[%c384_130, %c384_131], %130 {strides = array<i32>} : memref<432x1536xbf16, #tpu.memory_space<vmem>>, vector<16x384xbf16>,
    %134 = vector.extract_strided_slice %105 {offsets = [0, 37], sizes = [16, 384], strides = [1, 1]} : vector<16x422xbf16> to vector<16x384xbf16>
    %c112_132 = arith.constant 112 : index
    %c1152_133 = arith.constant 1152 : index
    %135 = vector.load %arg5[%c112_132, %c1152_133] : memref<432x1536xbf16, #tpu.memory_space<vmem>>, vector<16x384xbf16>
    tpu.vector_store %arg5[%c112_132, %c1152_133], %134 {strides = array<i32>} : memref<432x1536xbf16, #tpu.memory_space<vmem>>, vector<16x384xbf16>,
    %c256_134 = arith.constant 256 : index
    %c768_135 = arith.constant 768 : index
    %136 = vector.load %arg5[%c256_134, %c768_135] : memref<432x1536xbf16, #tpu.memory_space<vmem>>, vector<16x384xbf16>
    tpu.vector_store %arg5[%c256_134, %c768_135], %134 {strides = array<i32>} : memref<432x1536xbf16, #tpu.memory_space<vmem>>, vector<16x384xbf16>,
    %c400_136 = arith.constant 400 : index
    %c384_137 = arith.constant 384 : index
    %137 = vector.load %arg5[%c400_136, %c384_137] : memref<432x1536xbf16, #tpu.memory_space<vmem>>, vector<16x384xbf16>
    tpu.vector_store %arg5[%c400_136, %c384_137], %134 {strides = array<i32>} : memref<432x1536xbf16, #tpu.memory_space<vmem>>, vector<16x384xbf16>,
    %138 = vector.extract_strided_slice %105 {offsets = [0, 38], sizes = [16, 384], strides = [1, 1]} : vector<16x422xbf16> to vector<16x384xbf16>
    %c128_138 = arith.constant 128 : index
    %c1152_139 = arith.constant 1152 : index
    %139 = vector.load %arg5[%c128_138, %c1152_139] : memref<432x1536xbf16, #tpu.memory_space<vmem>>, vector<16x384xbf16>
    tpu.vector_store %arg5[%c128_138, %c1152_139], %138 {strides = array<i32>} : memref<432x1536xbf16, #tpu.memory_space<vmem>>, vector<16x384xbf16>,
    %c272_140 = arith.constant 272 : index
    %c768_141 = arith.constant 768 : index
    %140 = vector.load %arg5[%c272_140, %c768_141] : memref<432x1536xbf16, #tpu.memory_space<vmem>>, vector<16x384xbf16>
    tpu.vector_store %arg5[%c272_140, %c768_141], %138 {strides = array<i32>} : memref<432x1536xbf16, #tpu.memory_space<vmem>>, vector<16x384xbf16>,
    %c416_142 = arith.constant 416 : index
    %c384_143 = arith.constant 384 : index
    %141 = vector.load %arg5[%c416_142, %c384_143] : memref<432x1536xbf16, #tpu.memory_space<vmem>>, vector<16x384xbf16>
    tpu.vector_store %arg5[%c416_142, %c384_143], %138 {strides = array<i32>} : memref<432x1536xbf16, #tpu.memory_space<vmem>>, vector<16x384xbf16>,
    %c4_i32_144 = arith.constant 4 : i32
    %142 = arith.addi %0, %c4_i32_144 : i32
    %c16_i32_145 = arith.constant 16 : i32
    %143 = arith.muli %142, %c16_i32_145 : i32
    %144 = tpu.assume_multiple %143, 16 : i32
    %c0_146 = arith.constant 0 : index
    %145 = arith.index_cast %144 : i32 to index
    %c0_147 = arith.constant 0 : index
    %146 = vector.load %arg2[%c0_146, %145, %c0_147] : memref<1x288x422xbf16, #tpu.memory_space<vmem>>, vector<1x16x422xbf16>
    %147 = vector.shape_cast %146 : vector<1x16x422xbf16> to vector<16x422xbf16>
    %148 = vector.extract_strided_slice %147 {offsets = [0, 0], sizes = [16, 384], strides = [1, 1]} : vector<16x422xbf16> to vector<16x384xbf16>
    %c144_148 = arith.constant 144 : index
    %c1152_149 = arith.constant 1152 : index
    %149 = vector.load %arg5[%c144_148, %c1152_149] : memref<432x1536xbf16, #tpu.memory_space<vmem>>, vector<16x384xbf16>
    tpu.vector_store %arg5[%c144_148, %c1152_149], %148 {strides = array<i32>} : memref<432x1536xbf16, #tpu.memory_space<vmem>>, vector<16x384xbf16>,
    %c288_150 = arith.constant 288 : index
    %c768_151 = arith.constant 768 : index
    %150 = vector.load %arg5[%c288_150, %c768_151] : memref<432x1536xbf16, #tpu.memory_space<vmem>>, vector<16x384xbf16>
    tpu.vector_store %arg5[%c288_150, %c768_151], %148 {strides = array<i32>} : memref<432x1536xbf16, #tpu.memory_space<vmem>>, vector<16x384xbf16>,
    %151 = vector.extract_strided_slice %147 {offsets = [0, 1], sizes = [16, 384], strides = [1, 1]} : vector<16x422xbf16> to vector<16x384xbf16>
    %c160_152 = arith.constant 160 : index
    %c1152_153 = arith.constant 1152 : index
    %152 = vector.load %arg5[%c160_152, %c1152_153] : memref<432x1536xbf16, #tpu.memory_space<vmem>>, vector<16x384xbf16>
    tpu.vector_store %arg5[%c160_152, %c1152_153], %151 {strides = array<i32>} : memref<432x1536xbf16, #tpu.memory_space<vmem>>, vector<16x384xbf16>,
    %c304_154 = arith.constant 304 : index
    %c768_155 = arith.constant 768 : index
    %153 = vector.load %arg5[%c304_154, %c768_155] : memref<432x1536xbf16, #tpu.memory_space<vmem>>, vector<16x384xbf16>
    tpu.vector_store %arg5[%c304_154, %c768_155], %151 {strides = array<i32>} : memref<432x1536xbf16, #tpu.memory_space<vmem>>, vector<16x384xbf16>,
    %154 = vector.extract_strided_slice %147 {offsets = [0, 2], sizes = [16, 384], strides = [1, 1]} : vector<16x422xbf16> to vector<16x384xbf16>
    %c176_156 = arith.constant 176 : index
    %c1152_157 = arith.constant 1152 : index
    %155 = vector.load %arg5[%c176_156, %c1152_157] : memref<432x1536xbf16, #tpu.memory_space<vmem>>, vector<16x384xbf16>
    tpu.vector_store %arg5[%c176_156, %c1152_157], %154 {strides = array<i32>} : memref<432x1536xbf16, #tpu.memory_space<vmem>>, vector<16x384xbf16>,
    %c320_158 = arith.constant 320 : index
    %c768_159 = arith.constant 768 : index
    %156 = vector.load %arg5[%c320_158, %c768_159] : memref<432x1536xbf16, #tpu.memory_space<vmem>>, vector<16x384xbf16>
    tpu.vector_store %arg5[%c320_158, %c768_159], %154 {strides = array<i32>} : memref<432x1536xbf16, #tpu.memory_space<vmem>>, vector<16x384xbf16>,
    %157 = vector.extract_strided_slice %147 {offsets = [0, 18], sizes = [16, 384], strides = [1, 1]} : vector<16x422xbf16> to vector<16x384xbf16>
    %c192_160 = arith.constant 192 : index
    %c1152_161 = arith.constant 1152 : index
    %158 = vector.load %arg5[%c192_160, %c1152_161] : memref<432x1536xbf16, #tpu.memory_space<vmem>>, vector<16x384xbf16>
    tpu.vector_store %arg5[%c192_160, %c1152_161], %157 {strides = array<i32>} : memref<432x1536xbf16, #tpu.memory_space<vmem>>, vector<16x384xbf16>,
    %c336_162 = arith.constant 336 : index
    %c768_163 = arith.constant 768 : index
    %159 = vector.load %arg5[%c336_162, %c768_163] : memref<432x1536xbf16, #tpu.memory_space<vmem>>, vector<16x384xbf16>
    tpu.vector_store %arg5[%c336_162, %c768_163], %157 {strides = array<i32>} : memref<432x1536xbf16, #tpu.memory_space<vmem>>, vector<16x384xbf16>,
    %160 = vector.extract_strided_slice %147 {offsets = [0, 19], sizes = [16, 384], strides = [1, 1]} : vector<16x422xbf16> to vector<16x384xbf16>
    %c208_164 = arith.constant 208 : index
    %c1152_165 = arith.constant 1152 : index
    %161 = vector.load %arg5[%c208_164, %c1152_165] : memref<432x1536xbf16, #tpu.memory_space<vmem>>, vector<16x384xbf16>
    tpu.vector_store %arg5[%c208_164, %c1152_165], %160 {strides = array<i32>} : memref<432x1536xbf16, #tpu.memory_space<vmem>>, vector<16x384xbf16>,
    %c352_166 = arith.constant 352 : index
    %c768_167 = arith.constant 768 : index
    %162 = vector.load %arg5[%c352_166, %c768_167] : memref<432x1536xbf16, #tpu.memory_space<vmem>>, vector<16x384xbf16>
    tpu.vector_store %arg5[%c352_166, %c768_167], %160 {strides = array<i32>} : memref<432x1536xbf16, #tpu.memory_space<vmem>>, vector<16x384xbf16>,
    %163 = vector.extract_strided_slice %147 {offsets = [0, 20], sizes = [16, 384], strides = [1, 1]} : vector<16x422xbf16> to vector<16x384xbf16>
    %c224_168 = arith.constant 224 : index
    %c1152_169 = arith.constant 1152 : index
    %164 = vector.load %arg5[%c224_168, %c1152_169] : memref<432x1536xbf16, #tpu.memory_space<vmem>>, vector<16x384xbf16>
    tpu.vector_store %arg5[%c224_168, %c1152_169], %163 {strides = array<i32>} : memref<432x1536xbf16, #tpu.memory_space<vmem>>, vector<16x384xbf16>,
    %c368_170 = arith.constant 368 : index
    %c768_171 = arith.constant 768 : index
    %165 = vector.load %arg5[%c368_170, %c768_171] : memref<432x1536xbf16, #tpu.memory_space<vmem>>, vector<16x384xbf16>
    tpu.vector_store %arg5[%c368_170, %c768_171], %163 {strides = array<i32>} : memref<432x1536xbf16, #tpu.memory_space<vmem>>, vector<16x384xbf16>,
    %166 = vector.extract_strided_slice %147 {offsets = [0, 36], sizes = [16, 384], strides = [1, 1]} : vector<16x422xbf16> to vector<16x384xbf16>
    %c240_172 = arith.constant 240 : index
    %c1152_173 = arith.constant 1152 : index
    %167 = vector.load %arg5[%c240_172, %c1152_173] : memref<432x1536xbf16, #tpu.memory_space<vmem>>, vector<16x384xbf16>
    tpu.vector_store %arg5[%c240_172, %c1152_173], %166 {strides = array<i32>} : memref<432x1536xbf16, #tpu.memory_space<vmem>>, vector<16x384xbf16>,
    %c384_174 = arith.constant 384 : index
    %c768_175 = arith.constant 768 : index
    %168 = vector.load %arg5[%c384_174, %c768_175] : memref<432x1536xbf16, #tpu.memory_space<vmem>>, vector<16x384xbf16>
    tpu.vector_store %arg5[%c384_174, %c768_175], %166 {strides = array<i32>} : memref<432x1536xbf16, #tpu.memory_space<vmem>>, vector<16x384xbf16>,
    %169 = vector.extract_strided_slice %147 {offsets = [0, 37], sizes = [16, 384], strides = [1, 1]} : vector<16x422xbf16> to vector<16x384xbf16>
    %c256_176 = arith.constant 256 : index
    %c1152_177 = arith.constant 1152 : index
    %170 = vector.load %arg5[%c256_176, %c1152_177] : memref<432x1536xbf16, #tpu.memory_space<vmem>>, vector<16x384xbf16>
    tpu.vector_store %arg5[%c256_176, %c1152_177], %169 {strides = array<i32>} : memref<432x1536xbf16, #tpu.memory_space<vmem>>, vector<16x384xbf16>,
    %c400_178 = arith.constant 400 : index
    %c768_179 = arith.constant 768 : index
    %171 = vector.load %arg5[%c400_178, %c768_179] : memref<432x1536xbf16, #tpu.memory_space<vmem>>, vector<16x384xbf16>
    tpu.vector_store %arg5[%c400_178, %c768_179], %169 {strides = array<i32>} : memref<432x1536xbf16, #tpu.memory_space<vmem>>, vector<16x384xbf16>,
    %172 = vector.extract_strided_slice %147 {offsets = [0, 38], sizes = [16, 384], strides = [1, 1]} : vector<16x422xbf16> to vector<16x384xbf16>
    %c272_180 = arith.constant 272 : index
    %c1152_181 = arith.constant 1152 : index
    %173 = vector.load %arg5[%c272_180, %c1152_181] : memref<432x1536xbf16, #tpu.memory_space<vmem>>, vector<16x384xbf16>
    tpu.vector_store %arg5[%c272_180, %c1152_181], %172 {strides = array<i32>} : memref<432x1536xbf16, #tpu.memory_space<vmem>>, vector<16x384xbf16>,
    %c416_182 = arith.constant 416 : index
    %c768_183 = arith.constant 768 : index
    %174 = vector.load %arg5[%c416_182, %c768_183] : memref<432x1536xbf16, #tpu.memory_space<vmem>>, vector<16x384xbf16>
    tpu.vector_store %arg5[%c416_182, %c768_183], %172 {strides = array<i32>} : memref<432x1536xbf16, #tpu.memory_space<vmem>>, vector<16x384xbf16>,
    %c5_i32 = arith.constant 5 : i32
    %175 = arith.addi %0, %c5_i32 : i32
    %c16_i32_184 = arith.constant 16 : i32
    %176 = arith.muli %175, %c16_i32_184 : i32
    %177 = tpu.assume_multiple %176, 16 : i32
    %c0_185 = arith.constant 0 : index
    %178 = arith.index_cast %177 : i32 to index
    %c0_186 = arith.constant 0 : index
    %179 = vector.load %arg2[%c0_185, %178, %c0_186] : memref<1x288x422xbf16, #tpu.memory_space<vmem>>, vector<1x16x422xbf16>
    %180 = vector.shape_cast %179 : vector<1x16x422xbf16> to vector<16x422xbf16>
    %181 = vector.extract_strided_slice %180 {offsets = [0, 0], sizes = [16, 384], strides = [1, 1]} : vector<16x422xbf16> to vector<16x384xbf16>
    %c288_187 = arith.constant 288 : index
    %c1152_188 = arith.constant 1152 : index
    %182 = vector.load %arg5[%c288_187, %c1152_188] : memref<432x1536xbf16, #tpu.memory_space<vmem>>, vector<16x384xbf16>
    tpu.vector_store %arg5[%c288_187, %c1152_188], %181 {strides = array<i32>} : memref<432x1536xbf16, #tpu.memory_space<vmem>>, vector<16x384xbf16>,
    %183 = vector.extract_strided_slice %180 {offsets = [0, 1], sizes = [16, 384], strides = [1, 1]} : vector<16x422xbf16> to vector<16x384xbf16>
    %c304_189 = arith.constant 304 : index
    %c1152_190 = arith.constant 1152 : index
    %184 = vector.load %arg5[%c304_189, %c1152_190] : memref<432x1536xbf16, #tpu.memory_space<vmem>>, vector<16x384xbf16>
    tpu.vector_store %arg5[%c304_189, %c1152_190], %183 {strides = array<i32>} : memref<432x1536xbf16, #tpu.memory_space<vmem>>, vector<16x384xbf16>,
    %185 = vector.extract_strided_slice %180 {offsets = [0, 2], sizes = [16, 384], strides = [1, 1]} : vector<16x422xbf16> to vector<16x384xbf16>
    %c320_191 = arith.constant 320 : index
    %c1152_192 = arith.constant 1152 : index
    %186 = vector.load %arg5[%c320_191, %c1152_192] : memref<432x1536xbf16, #tpu.memory_space<vmem>>, vector<16x384xbf16>
    tpu.vector_store %arg5[%c320_191, %c1152_192], %185 {strides = array<i32>} : memref<432x1536xbf16, #tpu.memory_space<vmem>>, vector<16x384xbf16>,
    %187 = vector.extract_strided_slice %180 {offsets = [0, 18], sizes = [16, 384], strides = [1, 1]} : vector<16x422xbf16> to vector<16x384xbf16>
    %c336_193 = arith.constant 336 : index
    %c1152_194 = arith.constant 1152 : index
    %188 = vector.load %arg5[%c336_193, %c1152_194] : memref<432x1536xbf16, #tpu.memory_space<vmem>>, vector<16x384xbf16>
    tpu.vector_store %arg5[%c336_193, %c1152_194], %187 {strides = array<i32>} : memref<432x1536xbf16, #tpu.memory_space<vmem>>, vector<16x384xbf16>,
    %189 = vector.extract_strided_slice %180 {offsets = [0, 19], sizes = [16, 384], strides = [1, 1]} : vector<16x422xbf16> to vector<16x384xbf16>
    %c352_195 = arith.constant 352 : index
    %c1152_196 = arith.constant 1152 : index
    %190 = vector.load %arg5[%c352_195, %c1152_196] : memref<432x1536xbf16, #tpu.memory_space<vmem>>, vector<16x384xbf16>
    tpu.vector_store %arg5[%c352_195, %c1152_196], %189 {strides = array<i32>} : memref<432x1536xbf16, #tpu.memory_space<vmem>>, vector<16x384xbf16>,
    %191 = vector.extract_strided_slice %180 {offsets = [0, 20], sizes = [16, 384], strides = [1, 1]} : vector<16x422xbf16> to vector<16x384xbf16>
    %c368_197 = arith.constant 368 : index
    %c1152_198 = arith.constant 1152 : index
    %192 = vector.load %arg5[%c368_197, %c1152_198] : memref<432x1536xbf16, #tpu.memory_space<vmem>>, vector<16x384xbf16>
    tpu.vector_store %arg5[%c368_197, %c1152_198], %191 {strides = array<i32>} : memref<432x1536xbf16, #tpu.memory_space<vmem>>, vector<16x384xbf16>,
    %193 = vector.extract_strided_slice %180 {offsets = [0, 36], sizes = [16, 384], strides = [1, 1]} : vector<16x422xbf16> to vector<16x384xbf16>
    %c384_199 = arith.constant 384 : index
    %c1152_200 = arith.constant 1152 : index
    %194 = vector.load %arg5[%c384_199, %c1152_200] : memref<432x1536xbf16, #tpu.memory_space<vmem>>, vector<16x384xbf16>
    tpu.vector_store %arg5[%c384_199, %c1152_200], %193 {strides = array<i32>} : memref<432x1536xbf16, #tpu.memory_space<vmem>>, vector<16x384xbf16>,
    %195 = vector.extract_strided_slice %180 {offsets = [0, 37], sizes = [16, 384], strides = [1, 1]} : vector<16x422xbf16> to vector<16x384xbf16>
    %c400_201 = arith.constant 400 : index
    %c1152_202 = arith.constant 1152 : index
    %196 = vector.load %arg5[%c400_201, %c1152_202] : memref<432x1536xbf16, #tpu.memory_space<vmem>>, vector<16x384xbf16>
    tpu.vector_store %arg5[%c400_201, %c1152_202], %195 {strides = array<i32>} : memref<432x1536xbf16, #tpu.memory_space<vmem>>, vector<16x384xbf16>,
    %197 = vector.extract_strided_slice %180 {offsets = [0, 38], sizes = [16, 384], strides = [1, 1]} : vector<16x422xbf16> to vector<16x384xbf16>
    %c416_203 = arith.constant 416 : index
    %c1152_204 = arith.constant 1152 : index
    %198 = vector.load %arg5[%c416_203, %c1152_204] : memref<432x1536xbf16, #tpu.memory_space<vmem>>, vector<16x384xbf16>
    tpu.vector_store %arg5[%c416_203, %c1152_204], %197 {strides = array<i32>} : memref<432x1536xbf16, #tpu.memory_space<vmem>>, vector<16x384xbf16>,
    %c0_205 = arith.constant 0 : index
    %c0_206 = arith.constant 0 : index
    %199 = vector.load %arg3[%c0_205, %c0_206] : memref<16x432xbf16, #tpu.memory_space<vmem>>, vector<16x432xbf16>
    %c0_207 = arith.constant 0 : index
    %c0_208 = arith.constant 0 : index
    %200 = vector.load %arg5[%c0_207, %c0_208] : memref<432x1536xbf16, #tpu.memory_space<vmem>>, vector<432x1536xbf16>
    %cst = arith.constant dense<0.000000e+00> : vector<16x1536xf32>
    %201 = tpu.matmul %199, %200, %cst {dimension_numbers = #tpu.dot_dimension_numbers<[1], [0], [0], [1], [0, 0, 1, 1], [], []>} : vector<16x432xbf16>, vector<432x1536xbf16>, vector<16x1536xf32> -> vector<16x1536xf32>
    %202 = vector.extract_strided_slice %201 {offsets = [0, 0], sizes = [8, 384], strides = [1, 1]} : vector<16x1536xf32> to vector<8x384xf32>
    %c0_209 = arith.constant 0 : index
    %c0_210 = arith.constant 0 : index
    %c0_211 = arith.constant 0 : index
    %c0_212 = arith.constant 0 : index
    %c0_213 = arith.constant 0 : index
    %203 = vector.load %arg4[%c0_209, %c0_210, %c0_211, %c0_212, %c0_213] : memref<1x1x4x8x384xf32, #tpu.memory_space<vmem>>, vector<1x1x1x8x384xf32>
    %204 = vector.shape_cast %203 : vector<1x1x1x8x384xf32> to vector<8x384xf32>
    %205 = vector.shape_cast %202 : vector<8x384xf32> to vector<1x1x1x8x384xf32>
    tpu.vector_store %arg4[%c0_209, %c0_210, %c0_211, %c0_212, %c0_213], %205 {strides = array<i32>} : memref<1x1x4x8x384xf32, #tpu.memory_space<vmem>>, vector<1x1x1x8x384xf32>,
    %206 = vector.extract_strided_slice %201 {offsets = [0, 384], sizes = [8, 384], strides = [1, 1]} : vector<16x1536xf32> to vector<8x384xf32>
    %c0_214 = arith.constant 0 : index
    %c0_215 = arith.constant 0 : index
    %c1 = arith.constant 1 : index
    %c0_216 = arith.constant 0 : index
    %c0_217 = arith.constant 0 : index
    %207 = vector.load %arg4[%c0_214, %c0_215, %c1, %c0_216, %c0_217] : memref<1x1x4x8x384xf32, #tpu.memory_space<vmem>>, vector<1x1x1x8x384xf32>
    %208 = vector.shape_cast %207 : vector<1x1x1x8x384xf32> to vector<8x384xf32>
    %209 = vector.shape_cast %206 : vector<8x384xf32> to vector<1x1x1x8x384xf32>
    tpu.vector_store %arg4[%c0_214, %c0_215, %c1, %c0_216, %c0_217], %209 {strides = array<i32>} : memref<1x1x4x8x384xf32, #tpu.memory_space<vmem>>, vector<1x1x1x8x384xf32>,
    %210 = vector.extract_strided_slice %201 {offsets = [0, 768], sizes = [8, 384], strides = [1, 1]} : vector<16x1536xf32> to vector<8x384xf32>
    %c0_218 = arith.constant 0 : index
    %c0_219 = arith.constant 0 : index
    %c2 = arith.constant 2 : index
    %c0_220 = arith.constant 0 : index
    %c0_221 = arith.constant 0 : index
    %211 = vector.load %arg4[%c0_218, %c0_219, %c2, %c0_220, %c0_221] : memref<1x1x4x8x384xf32, #tpu.memory_space<vmem>>, vector<1x1x1x8x384xf32>
    %212 = vector.shape_cast %211 : vector<1x1x1x8x384xf32> to vector<8x384xf32>
    %213 = vector.shape_cast %210 : vector<8x384xf32> to vector<1x1x1x8x384xf32>
    tpu.vector_store %arg4[%c0_218, %c0_219, %c2, %c0_220, %c0_221], %213 {strides = array<i32>} : memref<1x1x4x8x384xf32, #tpu.memory_space<vmem>>, vector<1x1x1x8x384xf32>,
    %214 = vector.extract_strided_slice %201 {offsets = [0, 1152], sizes = [8, 384], strides = [1, 1]} : vector<16x1536xf32> to vector<8x384xf32>
    %c0_222 = arith.constant 0 : index
    %c0_223 = arith.constant 0 : index
    %c3 = arith.constant 3 : index
    %c0_224 = arith.constant 0 : index
    %c0_225 = arith.constant 0 : index
    %215 = vector.load %arg4[%c0_222, %c0_223, %c3, %c0_224, %c0_225] : memref<1x1x4x8x384xf32, #tpu.memory_space<vmem>>, vector<1x1x1x8x384xf32>
    %216 = vector.shape_cast %215 : vector<1x1x1x8x384xf32> to vector<8x384xf32>
    %217 = vector.shape_cast %214 : vector<8x384xf32> to vector<1x1x1x8x384xf32>
    tpu.vector_store %arg4[%c0_222, %c0_223, %c3, %c0_224, %c0_225], %217 {strides = array<i32>} : memref<1x1x4x8x384xf32, #tpu.memory_space<vmem>>, vector<1x1x1x8x384xf32>,
    return
  }
  func.func @transform_0(%arg0: i32, %arg1: i32) -> (i32, i32, i32) {
    %c0_i32 = arith.constant 0 : i32
    %c0_i32_0 = arith.constant 0 : i32
    %c0_i32_1 = arith.constant 0 : i32
    return %arg0, %c0_i32, %c0_i32_0 : i32, i32, i32
  }
  func.func @transform_1(%arg0: i32, %arg1: i32) -> (i32, i32) {
    %c0_i32 = arith.constant 0 : i32
    %c0_i32_0 = arith.constant 0 : i32
    %c0_i32_1 = arith.constant 0 : i32
    return %c0_i32, %c0_i32_0 : i32, i32
  }
  func.func @transform_2(%arg0: i32, %arg1: i32) -> (i32, i32, i32, i32, i32) {
    %c0_i32 = arith.constant 0 : i32
    %c0_i32_0 = arith.constant 0 : i32
    %c0_i32_1 = arith.constant 0 : i32
    %c0_i32_2 = arith.constant 0 : i32
    return %arg0, %arg1, %c0_i32, %c0_i32_0, %c0_i32_1 : i32, i32, i32, i32, i32
  }
}

</mosaic_0001>

<bundles_post_ra>
// kernel: separable_conv3d.1
= control target key start
LH: loop header
LB: loop body
LE: loop exit
PB: predicated region body
PF: predicated region fallthrough
CT: control target
= control target key end

     0   :  { %s6286_s9 = smov 0   ;;  %s6288_s10 = smov 0   ;;  %s7660_s0 = inlined_call_operand.vmem [shape: bf16[2,288,422], index: 0, kind: input, shape index: {}]   ;;  %s7661_s1 = inlined_call_operand.vmem [shape: bf16[16,432], index: 1, kind: input, shape index: {}]   ;;  %s7662_s2 = inlined_call_operand.vmem [shape: f32[2,4,4,8,384], index: 2, kind: output, shape index: {}]  }
   0x1   :  { %s6290_s11 = smov 0   ;;  %s6292_s12 = smov 0  }
   0x2   :  { %s6294_s13 = smov 0  }
   0x3 LB: > { %s21_s14 = sadd.s32 1, %s6253_s11  ;;  %s24_s15 = sadd.s32 1, %s6257_s12  ;;  %s6261_s13 = sphi %s6294_s13, %s12_s13   ;;  %s6257_s12 = sphi %s6292_s12, %s7666_s12   ;;  %s6253_s11 = sphi %s6290_s11, %s7665_s11   ;;  %s6249_s10 = sphi %s6288_s10, %s7664_s10   ;;  %s6245_s9 = sphi %s6286_s9, %s7663_s9  }
   0x4   : > { %p22_p0 = scmp.ge.s32.totalorder %s21_s14, 4  ;;  %p4466_p1 = scmp.ge.s32.totalorder %s6261_s13, 1 }
   0x5   : > { %p126_p2 = scmp.lt.s32.totalorder %s6261_s13, 9 }
   0x6   : > { %s7668_s14 = smov (%p22_p0, %s21_s14), 0  ;;  %s7670_s15 = smov (!%p22_p0, %s24_s15), %s6257_s12 }
   0x7   : > { %p127_p3 = pnand %p4466_p1, %p126_p2  ;;  %p26_p4 = scmp.ge.s32.totalorder %s7670_s15, 2 }
   0x8   : > { %p152_p5 = scmp.lt.s32.totalorder (!%p127_p3), %s6249_s10, 1  ;;  %s6319_s16 = sshll.u32 (!%p127_p3), %s6245_s9, 6 }
   0x9   : > { %s7672_s15 = smov (%p26_p4, %s7670_s15), 0  ;;  %130 = sbr.rel (%p127_p3) target bundleno = 875 (0x36b), region = 28 }
   0xa   : > { %s169_s18 = sshra.s32 (!%p127_p3), %s6319_s16, 3  ;;  %s6263_s24 = smov (!%p127_p3), 127  }
   0xb   : > { %s5823_s19 = sshll.u32 (!%p127_p3), %s169_s18, 4  ;;  %s6264_s25 = smov (!%p127_p3), 126  }
   0xc   : > { %s6265_s26 = smov (!%p127_p3), 110   ;;  %s6266_s27 = smov (!%p127_p3), 109  }
   0xd   : > { %s5825_s28 = sadd.s32 (!%p127_p3), 16, %s6319_s16  ;;  %s6267_s30 = smov (!%p127_p3), 108  }
   0xe   : > { %s7674_s10 = smov (!%p152_p5, %s6249_s10), 1  ;;  %s405_s29 = sshra.s32 %s5825_s28, 3  ;;  %vm198_vm0 = vcmask 1043456   ;;  %vm227_vm1 = vcmask 1031168   ;;  %vm254_vm2 = vcmask 900096   ;;  %vm200_vm3 = vcmask 1039360  }
   0xf   : > { %s6172_s17 = smul.u32 576, %s7674_s10  ;;  %s5826_s3 = sshll.u32 %s405_s29, 4  ;;  %vm308_vm4 = vcmask 883712   ;;  %vm281_vm5 = vcmask 891904   ;;  %vm335_vm6 = vcmask 752640   ;;  %vm389_vm7 = vcmask 736256  }
  0x10   : > { %s6268_s5 = smov 92   ;;  %s6269_s6 = smov 91   ;;  %vm362_vm8 = vcmask 744448   ;;  %vm3721_vm9 = vcmask 392192  }
  0x11   : > { %s6328_s22 = scalar_lea.vmem %s7660_s0, %s6172_s17  ;;  %s6270_s7 = smov 90  }
  0x12   : > { %s173_s23 = scalar_lea.vmem %s6328_s22, %s5823_s19  ;;  %s409_s4 = scalar_lea.vmem %s6328_s22, %s5826_s3 }
  0x13   : > { %v176_v0 = vld [vmem:[%s173_s23 + $0x10] sm:$0xff]  ;;  %v174_v1 = vld [vmem:[%s173_s23] sm:$0xff]  ;;  %v177_v2 = vld [vmem:[%s173_s23 + $0x18] sm:$0xff]  ;;  %s5828_s8 = sadd.s32 32, %s6319_s16  ;;  %s5831_s20 = sadd.s32 48, %s6319_s16 }
  0x14   : > { %190 = vrot.lane.b32.xlu1 %v176_v0, %s6263_s24  ;;  %180 = vst [vmem:[#allocation2 + $0x30] sm:$0xff] %v176_v0  ;;  %186 = vrot.lane.b32.xlu0 %v174_v1, %s6263_s24  ;;  %v175_v3 = vld [vmem:[%s173_s23 + $0x8] sm:$0xff]  ;;  %v6353_v4 = vld [vmem:[%s409_s4 + $0x10] sm:$0xff]  ;;  %s668_s17 = sshra.s32 %s5828_s8, 3  ;;  %s967_s21 = sshra.s32 %s5831_s20, 3 }
  0x15   : > { %178 = vst [vmem:[#allocation2] sm:$0xff] %v174_v1  ;;  %214 = vrot.lane.b32.xlu2 %v174_v1, %s6264_s25  ;;  %v6358_v5 = vld [vmem:[%s409_s4 + $0x8] sm:$0xff]  ;;  %v6365_v6 = vld [vmem:[%s409_s4] sm:$0xff]  ;;  %v6372_v7 = vld [vmem:[%s409_s4 + $0x18] sm:$0xff]  ;;  %s5829_s18 = sshll.u32 %s668_s17, 4  ;;  %s5832_s23 = sshll.u32 %s967_s21, 4 }
  0x16   : > { %181 = vst [vmem:[#allocation2 + $0x38] sm:$0xf] %v177_v2  ;;  %s6435_s19 = scalar_lea.vmem %s6328_s22, %s5829_s18  ;;  %s6641_s28 = scalar_lea.vmem %s6328_s22, %s5832_s23 }
  0x17   : > { %179 = vst [vmem:[#allocation2 + $0x8] sm:$0xf] %v175_v3  ;;  %v6444_v34 = vld [vmem:[%s6435_s19 + $0x10] sm:$0xff]  ;;  %v6453_v41 = vld [vmem:[%s6435_s19 + $0x8] sm:$0xff]  ;;  %v6472_v48 = vld [vmem:[%s6435_s19] sm:$0xff]  ;;  %s5834_s17 = sadd.s32 64, %s6319_s16 }
  0x18   : > { %416 = vst [vmem:[#allocation2 + $0x3c] sm:$0xff] %v6353_v4  ;;  %v6493_v58 = vld [vmem:[%s6435_s19 + $0x18] sm:$0xff]  ;;  %s1266_s18 = sshra.s32 %s5834_s17, 3  ;;  %s5837_s23 = sadd.s32 80, %s6319_s16 }
  0x19   : > { %420 = vst [vmem:[#allocation2 + $0x390] sm:$0xff] %v6353_v4  ;;  %s5835_s19 = sshll.u32 %s1266_s18, 4  ;;  %s7127_s16 = sshra.s32 %s5837_s23, 3 }
  0x1a   : > { %415 = vst [vmem:[#allocation2 + $0x14] sm:$0xf] %v6358_v5  ;;  %s6893_s20 = scalar_lea.vmem %s6328_s22, %s5835_s19  ;;  %p159_p6 = scmp.lt.s32.totalorder %s6245_s9, 3 }
  0x1b   : > { %419 = vst [vmem:[#allocation2 + $0x368] sm:$0xf] %v6358_v5 }
  0x1c   : > { %192 = vrot.lane.b32.xlu1 %v177_v2, %s6263_s24  ;;  %188 = vrot.lane.b32.xlu0 %v175_v3, %s6263_s24  ;;  %414 = vst [vmem:[#allocation2 + $0xc] sm:$0xff] %v6365_v6  ;;  %s7676_s9 = smov (!%p159_p6, %s6245_s9), 3 }
  0x1d   : > { %216 = vrot.lane.b32.xlu2 %v175_v3, %s6264_s25  ;;  %418 = vst [vmem:[#allocation2 + $0x360] sm:$0xff] %v6365_v6 }
  0x1e   : > { %417 = vst [vmem:[#allocation2 + $0x44] sm:$0xf] %v6372_v7 }
  0x1f   : > { %421 = vst [vmem:[#allocation2 + $0x398] sm:$0xf] %v6372_v7 }
  0x20   : > { %679 = vst [vmem:[#allocation2 + $0x48] sm:$0xff] %v6444_v34 }
  0x21   : > { %683 = vst [vmem:[#allocation2 + $0x39c] sm:$0xff] %v6444_v34 }
  0x22   : > { %687 = vst [vmem:[#allocation2 + $0x6f0] sm:$0xff] %v6444_v34 }
  0x23   : > { %678 = vst [vmem:[#allocation2 + $0x20] sm:$0xf] %v6453_v41 }
  0x24   : > { %220 = vrot.lane.b32.xlu1 %v177_v2, %s6264_s25  ;;  %218 = vrot.lane.b32.xlu0 %v176_v0, %s6264_s25  ;;  %682 = vst [vmem:[#allocation2 + $0x374] sm:$0xf] %v6453_v41 }
  0x25   : > { %241 = vrot.lane.b32.xlu2 %v174_v1, %s6265_s26  ;;  %686 = vst [vmem:[#allocation2 + $0x6c8] sm:$0xf] %v6453_v41 }
  0x26   : > { %677 = vst [vmem:[#allocation2 + $0x18] sm:$0xff] %v6472_v48 }
  0x27   : > { %681 = vst [vmem:[#allocation2 + $0x36c] sm:$0xff] %v6472_v48 }
  0x28   : > { %685 = vst [vmem:[#allocation2 + $0x6c0] sm:$0xff] %v6472_v48 }
  0x29   : > { %680 = vst [vmem:[#allocation2 + $0x50] sm:$0xf] %v6493_v58 }
  0x2a   : > { %684 = vst [vmem:[#allocation2 + $0x3a4] sm:$0xf] %v6493_v58 }
  0x2b   : > { %688 = vst [vmem:[#allocation2 + $0x6f8] sm:$0xf] %v6493_v58 }
  0x2c   : > { %245 = vrot.lane.b32.xlu1 %v176_v0, %s6265_s26  ;;  %243 = vrot.lane.b32.xlu0 %v175_v3, %s6265_s26 }
  0x2d   : > { %247 = vrot.lane.b32.xlu2 %v177_v2, %s6265_s26 }
  0x34   : > { %270 = vrot.lane.b32.xlu1 %v175_v3, %s6266_s27  ;;  %268 = vrot.lane.b32.xlu0 %v174_v1, %s6266_s27 }
  0x35   : > { %272 = vrot.lane.b32.xlu2 %v176_v0, %s6266_s27 }
  0x3c   : > { %295 = vrot.lane.b32.xlu1 %v174_v1, %s6267_s30  ;;  %274 = vrot.lane.b32.xlu0 %v177_v2, %s6266_s27 }
  0x3d   : > { %297 = vrot.lane.b32.xlu2 %v175_v3, %s6267_s30 }
  0x44   : > { %301 = vrot.lane.b32.xlu1 %v177_v2, %s6267_s30  ;;  %299 = vrot.lane.b32.xlu0 %v176_v0, %s6267_s30 }
  0x45   : > { %322 = vrot.lane.b32.xlu2 %v174_v1, %s6268_s5 }
  0x4c   : > { %326 = vrot.lane.b32.xlu1 %v176_v0, %s6268_s5  ;;  %324 = vrot.lane.b32.xlu0 %v175_v3, %s6268_s5 }
  0x4d   : > { %328 = vrot.lane.b32.xlu2 %v177_v2, %s6268_s5 }
  0x54   : > { %351 = vrot.lane.b32.xlu1 %v175_v3, %s6269_s6  ;;  %349 = vrot.lane.b32.xlu0 %v174_v1, %s6269_s6 }
  0x55   : > { %353 = vrot.lane.b32.xlu2 %v176_v0, %s6269_s6 }
  0x5c   : > { %376 = vrot.lane.b32.xlu1 %v174_v1, %s6270_s7  ;;  %355 = vrot.lane.b32.xlu0 %v177_v2, %s6269_s6 }
  0x5d   : > { %378 = vrot.lane.b32.xlu2 %v175_v3, %s6270_s7 }
  0x64   : > { %382 = vrot.lane.b32.xlu1 %v177_v2, %s6270_s7  ;;  %380 = vrot.lane.b32.xlu0 %v176_v0, %s6270_s7 }
  0x65   : > { %426 = vrot.lane.b32.xlu2 %v6365_v6, %s6263_s24 }
  0x6c   : > { %430 = vrot.lane.b32.xlu1 %v6353_v4, %s6263_s24  ;;  %428 = vrot.lane.b32.xlu0 %v6358_v5, %s6263_s24 }
  0x6d   : > { %432 = vrot.lane.b32.xlu2 %v6372_v7, %s6263_s24 }
  0x6f   : > { %v215_v8 = vpop.permute.xlu2 %214 }
  0x70   : > { %v222_v9 = vrot.slane %v215_v8, 4 }
  0x74   : > { %458 = vrot.lane.b32.xlu1 %v6358_v5, %s6264_s25  ;;  %456 = vrot.lane.b32.xlu0 %v6365_v6, %s6264_s25 }
  0x75   : > { %460 = vrot.lane.b32.xlu2 %v6353_v4, %s6264_s25 }
  0x77   : > { %v217_v10 = vpop.permute.xlu2 %216 }
  0x78   : > { %v223_v11 = vrot.slane %v217_v10, 4 }
  0x7a   : > { %v226_v12 = vsel %vm198_vm0, %v222_v9, %v223_v11  ;;  %v229_v13 = vsel %vm227_vm1, %v217_v10, %v223_v11 }
  0x7b   : > { %v228_v14 = vsel %vm227_vm1, %v215_v8, %v226_v12  ;;  %238 = vst [vmem:[#allocation2 + $0xc8] sm:$0xf] %v229_v13 }
  0x7c   : > { %486 = vrot.lane.b32.xlu1 %v6365_v6, %s6265_s26  ;;  %462 = vrot.lane.b32.xlu0 %v6372_v7, %s6264_s25  ;;  %237 = vst [vmem:[#allocation2 + $0xc0] sm:$0xff] %v228_v14 }
  0x7d   : > { %488 = vrot.lane.b32.xlu2 %v6358_v5, %s6265_s26 }
  0x7f   : > { %v6404_v15 = vpop.permute.xlu2 %241 }
  0x80   : > { %v249_v49 = vrot.slane %v6404_v15, 4 }
  0x84   : > { %492 = vrot.lane.b32.xlu1 %v6372_v7, %s6265_s26  ;;  %490 = vrot.lane.b32.xlu0 %v6353_v4, %s6265_s26 }
  0x85   : > { %516 = vrot.lane.b32.xlu2 %v6365_v6, %s6266_s27 }
  0x86   : > { %v191_v16 = vpop.permute.xlu1 %190  ;;  %v187_v17 = vpop.permute.xlu0 %186 }
  0x87   : > { %v6412_v18 = vpop.permute.xlu2 %247  ;;  %v196_v23 = vrot.slane %v191_v16, 4  ;;  %v194_v24 = vrot.slane %v187_v17, 4 }
  0x88   : > { %v252_v19 = vrot.slane %v6412_v18, 4 }
  0x8a   : > { %v259_v20 = vsel %vm254_vm2, %v6412_v18, %v252_v19 }
  0x8b   : > { %267 = vst [vmem:[#allocation2 + $0x158] sm:$0xf] %v259_v20 }
  0x8c   : > { %520 = vrot.lane.b32.xlu1 %v6353_v4, %s6266_s27  ;;  %518 = vrot.lane.b32.xlu0 %v6358_v5, %s6266_s27 }
  0x8d   : > { %522 = vrot.lane.b32.xlu2 %v6372_v7, %s6266_s27 }
  0x8e   : > { %v193_v21 = vpop.permute.xlu1 %192  ;;  %v189_v22 = vpop.permute.xlu0 %188 }
  0x8f   : > { %v197_v25 = vrot.slane %v193_v21, 4  ;;  %v195_v26 = vrot.slane %v189_v22, 4  ;;  %v6426_v27 = vpop.permute.xlu2 %272 }
  0x90   : > { %v278_v11 = vrot.slane %v6426_v27, 4 }
  0x91   : > { %v203_v28 = vsel %vm198_vm0, %v196_v23, %v197_v25  ;;  %v205_v29 = vsel %vm200_vm3, %v193_v21, %v197_v25  ;;  %v199_v30 = vsel %vm198_vm0, %v194_v24, %v195_v26  ;;  %v202_v33 = vsel %vm200_vm3, %v189_v22, %v195_v26 }
  0x92   : > { %v204_v31 = vsel %vm200_vm3, %v191_v16, %v203_v28  ;;  %213 = vst [vmem:[#allocation2 + $0x98] sm:$0xf] %v205_v29  ;;  %v201_v32 = vsel %vm200_vm3, %v187_v17, %v199_v30 }
  0x93   : > { %212 = vst [vmem:[#allocation2 + $0x90] sm:$0xff] %v204_v31 }
  0x94   : > { %210 = vst [vmem:[#allocation2 + $0x60] sm:$0xff] %v201_v32  ;;  %548 = vrot.lane.b32.xlu1 %v6358_v5, %s6267_s30  ;;  %546 = vrot.lane.b32.xlu0 %v6365_v6, %s6267_s30 }
  0x95   : > { %211 = vst [vmem:[#allocation2 + $0x68] sm:$0xf] %v202_v33  ;;  %550 = vrot.lane.b32.xlu2 %v6353_v4, %s6267_s30 }
  0x96   : > { %v221_v35 = vpop.permute.xlu1 %220  ;;  %v219_v36 = vpop.permute.xlu0 %218 }
  0x97   : > { %v225_v37 = vrot.slane %v221_v35, 4  ;;  %v224_v38 = vrot.slane %v219_v36, 4  ;;  %v6447_v39 = vpop.permute.xlu2 %297 }
  0x98   : > { %v304_v40 = vrot.slane %v6447_v39, 4 }
  0x99   : > { %v232_v42 = vsel %vm227_vm1, %v221_v35, %v225_v37  ;;  %v230_v43 = vsel %vm198_vm0, %v224_v38, %v225_v37 }
  0x9a   : > { %240 = vst [vmem:[#allocation2 + $0xf8] sm:$0xf] %v232_v42  ;;  %v231_v44 = vsel %vm227_vm1, %v219_v36, %v230_v43  ;;  %v310_v45 = vsel %vm308_vm4, %v6447_v39, %v304_v40 }
  0x9b   : > { %239 = vst [vmem:[#allocation2 + $0xf0] sm:$0xff] %v231_v44 }
  0x9c   : > { %576 = vrot.lane.b32.xlu1 %v6365_v6, %s6268_s5  ;;  %552 = vrot.lane.b32.xlu0 %v6372_v7, %s6267_s30  ;;  %319 = vst [vmem:[#allocation2 + $0x1e8] sm:$0xf] %v310_v45 }
  0x9d   : > { %578 = vrot.lane.b32.xlu2 %v6358_v5, %s6268_s5 }
  0x9e   : > { %v246_v46 = vpop.permute.xlu1 %245  ;;  %v244_v47 = vpop.permute.xlu0 %243 }
  0x9f   : > { %v251_v50 = vrot.slane %v246_v46, 4  ;;  %v250_v51 = vrot.slane %v244_v47, 4  ;;  %v6475_v52 = vpop.permute.xlu2 %322 }
  0xa0   : > { %v330_v32 = vrot.slane %v6475_v52, 4 }
  0xa1   : > { %v257_v53 = vsel %vm198_vm0, %v251_v50, %v252_v19  ;;  %v253_v54 = vsel %vm198_vm0, %v249_v49, %v250_v51  ;;  %v256_v55 = vsel %vm254_vm2, %v244_v47, %v250_v51 }
  0xa2   : > { %v258_v56 = vsel %vm254_vm2, %v246_v46, %v257_v53  ;;  %v255_v57 = vsel %vm254_vm2, %v6404_v15, %v253_v54  ;;  %265 = vst [vmem:[#allocation2 + $0x128] sm:$0xf] %v256_v55 }
  0xa3   : > { %266 = vst [vmem:[#allocation2 + $0x150] sm:$0xff] %v258_v56 }
  0xa4   : > { %264 = vst [vmem:[#allocation2 + $0x120] sm:$0xff] %v255_v57  ;;  %582 = vrot.lane.b32.xlu1 %v6372_v7, %s6268_s5  ;;  %580 = vrot.lane.b32.xlu0 %v6353_v4, %s6268_s5 }
  0xa5   : > { %606 = vrot.lane.b32.xlu2 %v6365_v6, %s6269_s6 }
  0xa6   : > { %v271_v59 = vpop.permute.xlu1 %270  ;;  %v269_v60 = vpop.permute.xlu0 %268 }
  0xa7   : > { %v277_v61 = vrot.slane %v271_v59, 4  ;;  %v276_v62 = vrot.slane %v269_v60, 4  ;;  %v329_v63 = vpop.permute.xlu2 %328 }
  0xa8   : > { %v333_v0 = vrot.slane %v329_v63, 4 }
  0xa9   : > { %v283_v1 = vsel %vm281_vm5, %v271_v59, %v277_v61  ;;  %v280_v2 = vsel %vm198_vm0, %v276_v62, %v277_v61 }
  0xaa   : > { %292 = vst [vmem:[#allocation2 + $0x188] sm:$0xf] %v283_v1  ;;  %v282_v3 = vsel %vm281_vm5, %v269_v60, %v280_v2  ;;  %v340_v8 = vsel %vm335_vm6, %v329_v63, %v333_v0 }
  0xab   : > { %291 = vst [vmem:[#allocation2 + $0x180] sm:$0xff] %v282_v3 }
  0xac   : > { %610 = vrot.lane.b32.xlu1 %v6353_v4, %s6269_s6  ;;  %608 = vrot.lane.b32.xlu0 %v6358_v5, %s6269_s6  ;;  %348 = vst [vmem:[#allocation2 + $0x278] sm:$0xf] %v340_v8 }
  0xad   : > { %829 = vrot.lane.b32.xlu2 %v6472_v48, %s6267_s30 }
  0xae   : > { %v296_v9 = vpop.permute.xlu1 %295  ;;  %v275_v10 = vpop.permute.xlu0 %274 }
  0xaf   : > { %v303_v12 = vrot.slane %v296_v9, 4  ;;  %v279_v13 = vrot.slane %v275_v10, 4  ;;  %v6511_v14 = vpop.permute.xlu2 %353 }
  0xb0   : > { %v359_v56 = vrot.slane %v6511_v14, 4 }
  0xb1   : > { %v307_v15 = vsel %vm198_vm0, %v303_v12, %v304_v40  ;;  %v284_v16 = vsel %vm198_vm0, %v278_v11, %v279_v13  ;;  %v286_v17 = vsel %vm281_vm5, %v275_v10, %v279_v13 }
  0xb2   : > { %v309_v18 = vsel %vm308_vm4, %v296_v9, %v307_v15  ;;  %v285_v19 = vsel %vm281_vm5, %v6426_v27, %v284_v16  ;;  %294 = vst [vmem:[#allocation2 + $0x1b8] sm:$0xf] %v286_v17 }
  0xb3   : > { %318 = vst [vmem:[#allocation2 + $0x1e0] sm:$0xff] %v309_v18 }
  0xb4   : > { %293 = vst [vmem:[#allocation2 + $0x1b0] sm:$0xff] %v285_v19  ;;  %833 = vrot.lane.b32.xlu1 %v6444_v34, %s6267_s30  ;;  %831 = vrot.lane.b32.xlu0 %v6453_v41, %s6267_s30 }
  0xb5   : > { %835 = vrot.lane.b32.xlu2 %v6493_v58, %s6267_s30 }
  0xb6   : > { %v302_v20 = vpop.permute.xlu1 %301  ;;  %v300_v21 = vpop.permute.xlu0 %299 }
  0xb7   : > { %v306_v22 = vrot.slane %v302_v20, 4  ;;  %v305_v23 = vrot.slane %v300_v21, 4  ;;  %v379_v24 = vpop.permute.xlu2 %378 }
  0xb8   : > { %v385_v25 = vrot.slane %v379_v24, 4 }
  0xb9   : > { %v313_v26 = vsel %vm308_vm4, %v302_v20, %v306_v22  ;;  %v311_v27 = vsel %vm198_vm0, %v305_v23, %v306_v22 }
  0xba   : > { %321 = vst [vmem:[#allocation2 + $0x218] sm:$0xf] %v313_v26  ;;  %v312_v28 = vsel %vm308_vm4, %v300_v21, %v311_v27  ;;  %v391_v29 = vsel %vm389_vm7, %v379_v24, %v385_v25 }
  0xbb   : > { %320 = vst [vmem:[#allocation2 + $0x210] sm:$0xff] %v312_v28 }
  0xbc   : > { %797 = vrot.lane.b32.xlu1 %v6453_v41, %s6266_s27  ;;  %795 = vrot.lane.b32.xlu0 %v6472_v48, %s6266_s27  ;;  %400 = vst [vmem:[#allocation2 + $0x308] sm:$0xf] %v391_v29 }
  0xbd   : > { %799 = vrot.lane.b32.xlu2 %v6444_v34, %s6266_s27 }
  0xbe   : > { %v327_v30 = vpop.permute.xlu1 %326  ;;  %v325_v31 = vpop.permute.xlu0 %324 }
  0xbf   : > { %v332_v33 = vrot.slane %v327_v30, 4  ;;  %v331_v35 = vrot.slane %v325_v31, 4  ;;  %v6538_v36 = vpop.permute.xlu2 %426 }
  0xc0   : > { %v434_v23 = vrot.slane %v6538_v36, 4 }
  0xc1   : > { %v338_v37 = vsel %vm198_vm0, %v332_v33, %v333_v0  ;;  %v334_v38 = vsel %vm198_vm0, %v330_v32, %v331_v35  ;;  %v337_v39 = vsel %vm335_vm6, %v325_v31, %v331_v35  ;;  %v4746_v35 = vld [vmem:[#allocation2 + $0x1e0] sm:$0xf] }
  0xc2   : > { %v339_v40 = vsel %vm335_vm6, %v327_v30, %v338_v37  ;;  %v336_v42 = vsel %vm335_vm6, %v6475_v52, %v334_v38  ;;  %346 = vst [vmem:[#allocation2 + $0x248] sm:$0xf] %v337_v39  ;;  %v5909_v31 = vld [vmem:[#allocation2 + $0x20c] sm:$0xf0] }
  0xc3   : > { %347 = vst [vmem:[#allocation2 + $0x270] sm:$0xff] %v339_v40  ;;  %v4747_v37 = vor.u32 %v5909_v31, %v4746_v35  ;;  %v5897_v38 = vld [vmem:[#allocation2 + $0x1ac] sm:$0xf0]  ;;  %v4506_v35 = vld [vmem:[#allocation2] sm:$0xf] }
  0xc4   : > { %345 = vst [vmem:[#allocation2 + $0x240] sm:$0xff] %v336_v42  ;;  %761 = vrot.lane.b32.xlu1 %v6472_v48, %s6265_s26  ;;  %801 = vrot.lane.b32.xlu0 %v6493_v58, %s6266_s27 }
  0xc5   : > { %763 = vrot.lane.b32.xlu2 %v6453_v41, %s6265_s26 }
  0xc6   : > { %v352_v43 = vpop.permute.xlu1 %351  ;;  %v350_v44 = vpop.permute.xlu0 %349 }
  0xc7   : > { %v358_v45 = vrot.slane %v352_v43, 4  ;;  %v357_v46 = vrot.slane %v350_v44, 4  ;;  %v433_v47 = vpop.permute.xlu2 %432 }
  0xc8   : > { %v437_v49 = vrot.slane %v433_v47, 4 }
  0xc9   : > { %v364_v50 = vsel %vm362_vm8, %v352_v43, %v358_v45  ;;  %v361_v51 = vsel %vm198_vm0, %v357_v46, %v358_v45  ;;  %v4698_v43 = vld [vmem:[#allocation2 + $0x180] sm:$0xf] }
  0xca   : > { %373 = vst [vmem:[#allocation2 + $0x2a8] sm:$0xf] %v364_v50  ;;  %v363_v52 = vsel %vm362_vm8, %v350_v44, %v361_v51  ;;  %v443_v53 = vsel %vm200_vm3, %v433_v47, %v437_v49  ;;  %v5921_v20 = vld [vmem:[#allocation2 + $0x26c] sm:$0xf0]  ;;  %v4699_v45 = vor.u32 %v5897_v38, %v4698_v43  ;;  %v4650_v50 = vld [vmem:[#allocation2 + $0x120] sm:$0xf] }
  0xcb   : > { %372 = vst [vmem:[#allocation2 + $0x2a0] sm:$0xff] %v363_v52  ;;  %v4794_v19 = vld [vmem:[#allocation2 + $0x240] sm:$0xf]  ;;  %v5885_v51 = vld [vmem:[#allocation2 + $0x14c] sm:$0xf0] }
  0xcc   : > { %767 = vrot.lane.b32.xlu1 %v6493_v58, %s6265_s26  ;;  %765 = vrot.lane.b32.xlu0 %v6444_v34, %s6265_s26  ;;  %451 = vst [vmem:[#allocation2 + $0xa4] sm:$0xf] %v443_v53  ;;  %v4795_v27 = vor.u32 %v5921_v20, %v4794_v19 }
  0xcd   : > { %455 = vst [vmem:[#allocation2 + $0x3f8] sm:$0xf] %v443_v53  ;;  %727 = vrot.lane.b32.xlu2 %v6472_v48, %s6264_s25 }
  0xce   : > { %v377_v54 = vpop.permute.xlu1 %376  ;;  %v356_v55 = vpop.permute.xlu0 %355 }
  0xcf   : > { %v384_v57 = vrot.slane %v377_v54, 4  ;;  %v360_v59 = vrot.slane %v356_v55, 4  ;;  %v6563_v60 = vpop.permute.xlu2 %460 }
  0xd1   : > { %v388_v61 = vsel %vm198_vm0, %v384_v57, %v385_v25  ;;  %v365_v62 = vsel %vm198_vm0, %v359_v56, %v360_v59  ;;  %v367_v63 = vsel %vm362_vm8, %v356_v55, %v360_v59  ;;  %v5873_v55 = vld [vmem:[#allocation2 + $0xec] sm:$0xf0]  ;;  %v4602_v59 = vld [vmem:[#allocation2 + $0xc0] sm:$0xf] }
  0xd2   : > { %v390_v0 = vsel %vm389_vm7, %v377_v54, %v388_v61  ;;  %v366_v1 = vsel %vm362_vm8, %v6511_v14, %v365_v62  ;;  %375 = vst [vmem:[#allocation2 + $0x2d8] sm:$0xf] %v367_v63  ;;  %v4842_v16 = vld [vmem:[#allocation2 + $0x2a0] sm:$0xf]  ;;  %v4651_v54 = vor.u32 %v5885_v51, %v4650_v50  ;;  %v466_v61 = vrot.slane %v6563_v60, 4 }
  0xd3   : > { %399 = vst [vmem:[#allocation2 + $0x300] sm:$0xff] %v390_v0 }
  0xd4   : > { %374 = vst [vmem:[#allocation2 + $0x2d0] sm:$0xff] %v366_v1  ;;  %731 = vrot.lane.b32.xlu1 %v6444_v34, %s6264_s25  ;;  %729 = vrot.lane.b32.xlu0 %v6453_v41, %s6264_s25  ;;  %v4603_v1 = vor.u32 %v5873_v55, %v4602_v59 }
  0xd5   : > { %733 = vrot.lane.b32.xlu2 %v6493_v58, %s6264_s25 }
  0xd6   : > { %v383_v2 = vpop.permute.xlu1 %382  ;;  %v381_v3 = vpop.permute.xlu0 %380 }
  0xd7   : > { %v387_v8 = vrot.slane %v383_v2, 4  ;;  %v386_v9 = vrot.slane %v381_v3, 4  ;;  %v6577_v10 = vpop.permute.xlu2 %488 }
  0xd8   : > { %v495_v11 = vrot.slane %v6577_v10, 4 }
  0xd9   : > { %v394_v12 = vsel %vm389_vm7, %v383_v2, %v387_v8  ;;  %v392_v13 = vsel %vm198_vm0, %v386_v9, %v387_v8  ;;  %v4554_v8 = vld [vmem:[#allocation2 + $0x60] sm:$0xf]  ;;  %v5861_v9 = vld [vmem:[#allocation2 + $0x8c] sm:$0xf0] }
  0xda   : > { %402 = vst [vmem:[#allocation2 + $0x338] sm:$0xf] %v394_v12  ;;  %v393_v14 = vsel %vm389_vm7, %v381_v3, %v392_v13  ;;  %v500_v15 = vsel %vm254_vm2, %v6577_v10, %v495_v11  ;;  %v4555_v10 = vor.u32 %v5861_v9, %v4554_v8 }
  0xdb   : > { %401 = vst [vmem:[#allocation2 + $0x330] sm:$0xff] %v393_v14  ;;  %v5933_v17 = vld [vmem:[#allocation2 + $0x2cc] sm:$0xf0] }
  0xdc   : > { %695 = vrot.lane.b32.xlu1 %v6453_v41, %s6263_s24  ;;  %693 = vrot.lane.b32.xlu0 %v6472_v48, %s6263_s24  ;;  %v4843_v18 = vor.u32 %v5933_v17, %v4842_v16  ;;  %509 = vst [vmem:[#allocation2 + $0x134] sm:$0xf] %v500_v15 }
  0xdd   : > { %513 = vst [vmem:[#allocation2 + $0x488] sm:$0xf] %v500_v15  ;;  %697 = vrot.lane.b32.xlu2 %v6444_v34, %s6263_s24 }
  0xde   : > { %3725 = vmatpush.bf16.msra.mxu0 %v4843_v18  ;;  %v431_v21 = vpop.permute.xlu1 %430  ;;  %v429_v22 = vpop.permute.xlu0 %428 }
  0xdf   : > { %v436_v24 = vrot.slane %v431_v21, 4  ;;  %v435_v25 = vrot.slane %v429_v22, 4  ;;  %v6594_v26 = vpop.permute.xlu2 %516 }
  0xe1   : > { %v441_v28 = vsel %vm198_vm0, %v436_v24, %v437_v49  ;;  %v438_v29 = vsel %vm198_vm0, %v434_v23, %v435_v25  ;;  %v440_v30 = vsel %vm200_vm3, %v429_v22, %v435_v25  ;;  %v524_v23 = vrot.slane %v6594_v26, 4 }
  0xe2   : > { %v442_v32 = vsel %vm200_vm3, %v431_v21, %v441_v28  ;;  %v439_v33 = vsel %vm200_vm3, %v6538_v36, %v438_v29  ;;  %449 = vst [vmem:[#allocation2 + $0x74] sm:$0xf] %v440_v30  ;;  %3726 = vmatpush.bf16.msra.mxu0 %v4795_v27  ;;  %v6671_v28 = vld [vmem:[%s6641_s28] sm:$0xff] }
  0xe3   : > { %450 = vst [vmem:[#allocation2 + $0x9c] sm:$0xff] %v442_v32 }
  0xe4   : > { %454 = vst [vmem:[#allocation2 + $0x3f0] sm:$0xff] %v442_v32  ;;  %931 = vrot.lane.b32.xlu1 %v6472_v48, %s6270_s7  ;;  %699 = vrot.lane.b32.xlu0 %v6493_v58, %s6263_s24 }
  0xe5   : > { %448 = vst [vmem:[#allocation2 + $0x6c] sm:$0xff] %v439_v33  ;;  %933 = vrot.lane.b32.xlu2 %v6453_v41, %s6270_s7 }
  0xe6   : > { %452 = vst [vmem:[#allocation2 + $0x3c0] sm:$0xff] %v439_v33  ;;  %3727 = vmatpush.bf16.msra.mxu0 %v4747_v37  ;;  %v459_v36 = vpop.permute.xlu1 %458  ;;  %v457_v39 = vpop.permute.xlu0 %456  ;;  %v5849_v37 = vld [vmem:[#allocation2 + $0x2c] sm:$0xf0] }
  0xe7   : > { %453 = vst [vmem:[#allocation2 + $0x3c8] sm:$0xf] %v440_v30  ;;  %v465_v40 = vrot.slane %v459_v36, 4  ;;  %v464_v42 = vrot.slane %v457_v39, 4  ;;  %v6608_v44 = vpop.permute.xlu2 %522 }
  0xe8   : > { %v527_v46 = vrot.slane %v6608_v44, 4  ;;  %976 = vst [vmem:[#allocation2 + $0x24] sm:$0xff] %v6671_v28 }
  0xe9   : > { %v470_v47 = vsel %vm227_vm1, %v459_v36, %v465_v40  ;;  %v468_v49 = vsel %vm198_vm0, %v464_v42, %v465_v40  ;;  %980 = vst [vmem:[#allocation2 + $0x378] sm:$0xff] %v6671_v28 }
  0xea   : > { %479 = vst [vmem:[#allocation2 + $0xd4] sm:$0xf] %v470_v47  ;;  %v469_v52 = vsel %vm227_vm1, %v457_v39, %v468_v49  ;;  %3728 = vmatpush.bf16.msra.mxu0 %v4699_v45  ;;  %v533_v53 = vsel %vm281_vm5, %v6608_v44, %v527_v46  ;;  %v4507_v39 = vor.u32 %v5849_v37, %v4506_v35  ;;  %v6700_v44 = vld [vmem:[%s6641_s28 + $0x18] sm:$0xff]  ;;  %v5841_v37 = vld [vmem:[%s7661_s1 + $0xc] sm:$0xf0] }
  0xeb   : > { %483 = vst [vmem:[#allocation2 + $0x428] sm:$0xf] %v470_v47 }
  0xec   : > { %478 = vst [vmem:[#allocation2 + $0xcc] sm:$0xff] %v469_v52  ;;  %937 = vrot.lane.b32.xlu1 %v6493_v58, %s6270_s7  ;;  %935 = vrot.lane.b32.xlu0 %v6444_v34, %s6270_s7 }
  0xed   : > { %482 = vst [vmem:[#allocation2 + $0x420] sm:$0xff] %v469_v52  ;;  %636 = vrot.lane.b32.xlu2 %v6365_v6, %s6270_s7 }
  0xee   : > { %3729 = vmatpush.bf16.msra.mxu0 %v4651_v54  ;;  %v487_v56 = vpop.permute.xlu1 %486  ;;  %v463_v57 = vpop.permute.xlu0 %462  ;;  %541 = vst [vmem:[#allocation2 + $0x1c4] sm:$0xf] %v533_v53 }
  0xef   : > { %v494_v62 = vrot.slane %v487_v56, 4  ;;  %v467_v63 = vrot.slane %v463_v57, 4  ;;  %545 = vst [vmem:[#allocation2 + $0x518] sm:$0xf] %v533_v53  ;;  %v6626_v0 = vpop.permute.xlu2 %550 }
  0xf0   : > { %984 = vst [vmem:[#allocation2 + $0x6cc] sm:$0xff] %v6671_v28  ;;  %v556_v47 = vrot.slane %v6626_v0, 4 }
  0xf1   : > { %v498_v2 = vsel %vm198_vm0, %v494_v62, %v495_v11  ;;  %v471_v6 = vsel %vm198_vm0, %v466_v61, %v467_v63  ;;  %v473_v3 = vsel %vm227_vm1, %v463_v57, %v467_v63  ;;  %979 = vst [vmem:[#allocation2 + $0x5c] sm:$0xf] %v6700_v44 }
  0xf2   : > { %v499_v12 = vsel %vm254_vm2, %v487_v56, %v498_v2  ;;  %v472_v13 = vsel %vm227_vm1, %v6563_v60, %v471_v6  ;;  %481 = vst [vmem:[#allocation2 + $0x104] sm:$0xf] %v473_v3  ;;  %3730 = vmatpush.bf16.msra.mxu0 %v4603_v1 }
  0xf3   : > { %508 = vst [vmem:[#allocation2 + $0x12c] sm:$0xff] %v499_v12 }
  0xf4   : > { %512 = vst [vmem:[#allocation2 + $0x480] sm:$0xff] %v499_v12  ;;  %640 = vrot.lane.b32.xlu1 %v6353_v4, %s6270_s7  ;;  %638 = vrot.lane.b32.xlu0 %v6358_v5, %s6270_s7  ;;  %v6648_v4 = vld [vmem:[%s6641_s28 + $0x8] sm:$0xff] }
  0xf5   : > { %480 = vst [vmem:[#allocation2 + $0xfc] sm:$0xff] %v472_v13  ;;  %642 = vrot.lane.b32.xlu2 %v6372_v7, %s6270_s7 }
  0xf6   : > { %484 = vst [vmem:[#allocation2 + $0x450] sm:$0xff] %v472_v13  ;;  %3731 = vmatpush.bf16.msra.mxu0 %v4555_v10  ;;  %v493_v60 = vpop.permute.xlu1 %492  ;;  %v491_v11 = vpop.permute.xlu0 %490 }
  0xf7   : > { %485 = vst [vmem:[#allocation2 + $0x458] sm:$0xf] %v473_v3  ;;  %v497_v14 = vrot.slane %v493_v60, 4  ;;  %v496_v15 = vrot.slane %v491_v11, 4  ;;  %v6645_v16 = vpop.permute.xlu2 %578 }
  0xf8   : > { %v585_v5 = vrot.slane %v6645_v16, 4  ;;  %977 = vst [vmem:[#allocation2 + $0x2c] sm:$0xf] %v6648_v4 }
  0xf9   : > { %v503_v17 = vsel %vm254_vm2, %v493_v60, %v497_v14  ;;  %v501_v18 = vsel %vm198_vm0, %v496_v15, %v497_v14  ;;  %981 = vst [vmem:[#allocation2 + $0x380] sm:$0xf] %v6648_v4 }
  0xfa   : > { %511 = vst [vmem:[#allocation2 + $0x164] sm:$0xf] %v503_v17  ;;  %v502_v19 = vsel %vm254_vm2, %v491_v11, %v501_v18  ;;  %v590_v20 = vsel %vm335_vm6, %v6645_v16, %v585_v5  ;;  %3732 = vmatpush.bf16.msra.mxu0 %v4507_v39 }
  0xfb   : > { %515 = vst [vmem:[#allocation2 + $0x4b8] sm:$0xf] %v503_v17 }
  0xfc   : > { %510 = vst [vmem:[#allocation2 + $0x15c] sm:$0xff] %v502_v19  ;;  %899 = vrot.lane.b32.xlu1 %v6453_v41, %s6269_s6  ;;  %897 = vrot.lane.b32.xlu0 %v6472_v48, %s6269_s6 }
  0xfd   : > { %514 = vst [vmem:[#allocation2 + $0x4b0] sm:$0xff] %v502_v19  ;;  %901 = vrot.lane.b32.xlu2 %v6444_v34, %s6269_s6 }
  0xfe   : > { %v521_v21 = vpop.permute.xlu1 %520  ;;  %v519_v22 = vpop.permute.xlu0 %518  ;;  %599 = vst [vmem:[#allocation2 + $0x254] sm:$0xf] %v590_v20 }
  0xff   : > { %v526_v24 = vrot.slane %v521_v21, 4  ;;  %v525_v25 = vrot.slane %v519_v22, 4  ;;  %603 = vst [vmem:[#allocation2 + $0x5a8] sm:$0xf] %v590_v20  ;;  %v6667_v27 = vpop.permute.xlu2 %606 }
 0x100   : > { %985 = vst [vmem:[#allocation2 + $0x6d4] sm:$0xf] %v6648_v4  ;;  %v614_v8 = vrot.slane %v6667_v27, 4 }
 0x101   : > { %v531_v29 = vsel %vm198_vm0, %v526_v24, %v527_v46  ;;  %v528_v30 = vsel %vm198_vm0, %v524_v23, %v525_v25  ;;  %v530_v31 = vsel %vm281_vm5, %v519_v22, %v525_v25  ;;  %983 = vst [vmem:[#allocation2 + $0x3b0] sm:$0xf] %v6700_v44 }
 0x102   : > { %v532_v32 = vsel %vm281_vm5, %v521_v21, %v531_v29  ;;  %v529_v33 = vsel %vm281_vm5, %v6594_v26, %v528_v30  ;;  %539 = vst [vmem:[#allocation2 + $0x194] sm:$0xf] %v530_v31 }
 0x103   : > { %540 = vst [vmem:[#allocation2 + $0x1bc] sm:$0xff] %v532_v32 }
 0x104   : > { %544 = vst [vmem:[#allocation2 + $0x510] sm:$0xff] %v532_v32  ;;  %612 = vrot.lane.b32.xlu1 %v6372_v7, %s6269_s6  ;;  %903 = vrot.lane.b32.xlu0 %v6493_v58, %s6269_s6  ;;  %v4490_v32 = vld [vmem:[%s7661_s1] sm:$0xf] }
 0x105   : > { %538 = vst [vmem:[#allocation2 + $0x18c] sm:$0xff] %v529_v33  ;;  %863 = vrot.lane.b32.xlu2 %v6472_v48, %s6268_s5 }
 0x106   : > { %542 = vst [vmem:[#allocation2 + $0x4e0] sm:$0xff] %v529_v33  ;;  %v549_v38 = vpop.permute.xlu1 %548  ;;  %v547_v36 = vpop.permute.xlu0 %546 }
 0x107   : > { %543 = vst [vmem:[#allocation2 + $0x4e8] sm:$0xf] %v530_v31  ;;  %v555_v26 = vrot.slane %v549_v38, 4  ;;  %v554_v40 = vrot.slane %v547_v36, 4  ;;  %v6688_v42 = vpop.permute.xlu2 %829 }
 0x108   : > { %987 = vst [vmem:[#allocation2 + $0x704] sm:$0xf] %v6700_v44 }
 0x109   : > { %v560_v7 = vsel %vm308_vm4, %v549_v38, %v555_v26  ;;  %v558_v43 = vsel %vm198_vm0, %v554_v40, %v555_v26 }
 0x10a   : > { %569 = vst [vmem:[#allocation2 + $0x1f4] sm:$0xf] %v560_v7  ;;  %v559_v48 = vsel %vm308_vm4, %v547_v36, %v558_v43 }
 0x10b   : > { %573 = vst [vmem:[#allocation2 + $0x548] sm:$0xf] %v560_v7  ;;  %v6005_v26 = vld [vmem:[#allocation2 + $0x50c] sm:$0xf0]  ;;  %v5132_v40 = vld [vmem:[#allocation2 + $0x510] sm:$0xf0]  ;;  %v6780_v7 = vor.u32 %v5841_v37, %v4490_v32 }
 0x10c   : > { %568 = vst [vmem:[#allocation2 + $0x1ec] sm:$0xff] %v559_v48  ;;  %867 = vrot.lane.b32.xlu1 %v6444_v34, %s6268_s5  ;;  %865 = vrot.lane.b32.xlu0 %v6453_v41, %s6268_s5  ;;  %v6711_v41 = vld [vmem:[%s6641_s28 + $0x10] sm:$0xff]  ;;  %s5838_s28 = sshll.u32 %s7127_s16, 4 }
 0x10d   : > { %572 = vst [vmem:[#allocation2 + $0x540] sm:$0xff] %v559_v48  ;;  %869 = vrot.lane.b32.xlu2 %v6493_v58, %s6268_s5  ;;  %v5130_v48 = vld [vmem:[#allocation2 + $0x4e0] sm:$0xf]  ;;  %3733 = vmatmul.bf16.vlgmr.msra.gmra.mxu0 %v6780_v7  ;;  %v4940_v37 = vld [vmem:[#allocation2 + $0x390] sm:$0xf0]  ;;  %s7146_s29 = scalar_lea.vmem %s6328_s22, %s5838_s28  ;;  %s6173_s22 = smul.u32 12, %s7676_s9 }
 0x10e   : > { %v577_v45 = vpop.permute.xlu1 %576  ;;  %v553_v46 = vpop.permute.xlu0 %552  ;;  %978 = vst [vmem:[#allocation2 + $0x54] sm:$0xff] %v6711_v41 }
 0x10f   : > { %v584_v49 = vrot.slane %v577_v45, 4  ;;  %v557_v50 = vrot.slane %v553_v46, 4  ;;  %v6707_v34 = vpop.permute.xlu2 %835  ;;  %982 = vst [vmem:[#allocation2 + $0x3a8] sm:$0xff] %v6711_v41 }
 0x110   : > { %v840_v53 = vrot.slane %v6707_v34, 4  ;;  %986 = vst [vmem:[#allocation2 + $0x6fc] sm:$0xff] %v6711_v41 }
 0x111   : > { %v588_v58 = vsel %vm198_vm0, %v584_v49, %v585_v5  ;;  %v561_v51 = vsel %vm198_vm0, %v556_v47, %v557_v50  ;;  %v563_v52 = vsel %vm308_vm4, %v553_v46, %v557_v50  ;;  %v837_v5 = vrot.slane %v6688_v42, 4 }
 0x112   : > { %v589_v54 = vsel %vm335_vm6, %v577_v45, %v588_v58  ;;  %v562_v55 = vsel %vm308_vm4, %v6626_v0, %v561_v51  ;;  %571 = vst [vmem:[#allocation2 + $0x224] sm:$0xf] %v563_v52  ;;  %v846_v56 = vsel %vm308_vm4, %v6707_v34, %v840_v53  ;;  %v5999_v45 = vld [vmem:[#allocation2 + $0x4e4] sm:$0xf]  ;;  %v5131_v47 = vor.u32 %v6005_v26, %v5130_v48  ;;  %v5993_v34 = vld [vmem:[#allocation2 + $0x4ac] sm:$0xf0] }
 0x113   : > { %598 = vst [vmem:[#allocation2 + $0x24c] sm:$0xff] %v589_v54  ;;  %v5135_v49 = vor.u32 %v5999_v45, %v5132_v40  ;;  %v5084_v58 = vld [vmem:[#allocation2 + $0x4b0] sm:$0xf0]  ;;  %v5945_v26 = vld [vmem:[#allocation2 + $0x32c] sm:$0xf0] }
 0x114   : > { %602 = vst [vmem:[#allocation2 + $0x5a0] sm:$0xff] %v589_v54  ;;  %1130 = vrot.lane.b32.xlu1 %v6648_v4, %s6267_s30  ;;  %1128 = vrot.lane.b32.xlu0 %v6671_v28, %s6267_s30  ;;  %v5178_v25 = vld [vmem:[#allocation2 + $0x540] sm:$0xf] }
 0x115   : > { %570 = vst [vmem:[#allocation2 + $0x21c] sm:$0xff] %v562_v55  ;;  %1132 = vrot.lane.b32.xlu2 %v6711_v41, %s6267_s30  ;;  %v5082_v54 = vld [vmem:[#allocation2 + $0x480] sm:$0xf] }
 0x116   : > { %574 = vst [vmem:[#allocation2 + $0x570] sm:$0xff] %v562_v55  ;;  %v583_v57 = vpop.permute.xlu1 %582  ;;  %v581_v59 = vpop.permute.xlu0 %580  ;;  %v5987_v55 = vld [vmem:[#allocation2 + $0x484] sm:$0xf] }
 0x117   : > { %575 = vst [vmem:[#allocation2 + $0x578] sm:$0xf] %v563_v52  ;;  %v587_v61 = vrot.slane %v583_v57, 4  ;;  %v586_v62 = vrot.slane %v581_v59, 4  ;;  %v6733_v63 = vpop.permute.xlu2 %799 }
 0x118   : > { %854 = vst [vmem:[#allocation2 + $0x230] sm:$0xf] %v846_v56 }
 0x119   : > { %v593_v0 = vsel %vm335_vm6, %v583_v57, %v587_v61  ;;  %v591_v1 = vsel %vm198_vm0, %v586_v62, %v587_v61  ;;  %858 = vst [vmem:[#allocation2 + $0x584] sm:$0xf] %v846_v56  ;;  %v5087_v61 = vor.u32 %v5987_v55, %v5084_v58  ;;  %v5981_v62 = vld [vmem:[#allocation2 + $0x44c] sm:$0xf0] }
 0x11a   : > { %601 = vst [vmem:[#allocation2 + $0x284] sm:$0xf] %v593_v0  ;;  %v592_v2 = vsel %vm335_vm6, %v581_v59, %v591_v1  ;;  %v5083_v59 = vor.u32 %v5993_v34, %v5082_v54 }
 0x11b   : > { %605 = vst [vmem:[#allocation2 + $0x5d8] sm:$0xf] %v593_v0  ;;  %v5226_v14 = vld [vmem:[#allocation2 + $0x5a0] sm:$0xf]  ;;  %v6023_v15 = vld [vmem:[#allocation2 + $0x5a4] sm:$0xf] }
 0x11c   : > { %600 = vst [vmem:[#allocation2 + $0x27c] sm:$0xff] %v592_v2  ;;  %1094 = vrot.lane.b32.xlu1 %v6671_v28, %s6266_s27  ;;  %1134 = vrot.lane.b32.xlu0 %v6700_v44, %s6267_s30  ;;  %v5036_v0 = vld [vmem:[#allocation2 + $0x450] sm:$0xf0] }
 0x11d   : > { %604 = vst [vmem:[#allocation2 + $0x5d0] sm:$0xff] %v592_v2  ;;  %1096 = vrot.lane.b32.xlu2 %v6648_v4, %s6266_s27  ;;  %v6017_v21 = vld [vmem:[#allocation2 + $0x56c] sm:$0xf0]  ;;  %v5180_v22 = vld [vmem:[#allocation2 + $0x570] sm:$0xf0] }
 0x11e   : > { %v6744_v6 = vpop.permute.xlu1 %610  ;;  %v609_v3 = vpop.permute.xlu0 %608  ;;  %862 = vst [vmem:[#allocation2 + $0x8d8] sm:$0xf] %v846_v56  ;;  %v5179_v33 = vor.u32 %v6017_v21, %v5178_v25 }
 0x11f   : > { %v615_v9 = vrot.slane %v609_v3, 4  ;;  %v6748_v12 = vpop.permute.xlu2 %763 }
 0x120   : > { %v770_v13 = vrot.slane %v6748_v12, 4 }
 0x121   : > { %v618_v10 = vsel %vm198_vm0, %v614_v8, %v615_v9  ;;  %v620_v60 = vsel %vm362_vm8, %v609_v3, %v615_v9  ;;  %v5969_v3 = vld [vmem:[#allocation2 + $0x3ec] sm:$0xf0]  ;;  %v5034_v8 = vld [vmem:[#allocation2 + $0x420] sm:$0xf]  ;;  %v5975_v9 = vld [vmem:[#allocation2 + $0x424] sm:$0xf] }
 0x122   : > { %v619_v11 = vsel %vm362_vm8, %v6667_v27, %v618_v10  ;;  %629 = vst [vmem:[#allocation2 + $0x2b4] sm:$0xf] %v620_v60  ;;  %v775_v16 = vsel %vm254_vm2, %v6748_v12, %v770_v13  ;;  %v6011_v27 = vld [vmem:[#allocation2 + $0x544] sm:$0xf]  ;;  %v5035_v10 = vor.u32 %v5981_v62, %v5034_v8 }
 0x123   : > { %628 = vst [vmem:[#allocation2 + $0x2ac] sm:$0xff] %v619_v11  ;;  %v5183_v35 = vor.u32 %v6011_v27, %v5180_v22  ;;  %v4938_v22 = vld [vmem:[#allocation2 + $0x360] sm:$0xf]  ;;  %v5957_v27 = vld [vmem:[#allocation2 + $0x38c] sm:$0xf0] }
 0x124   : > { %632 = vst [vmem:[#allocation2 + $0x600] sm:$0xff] %v619_v11  ;;  %1100 = vrot.lane.b32.xlu1 %v6700_v44, %s6266_s27  ;;  %1098 = vrot.lane.b32.xlu0 %v6711_v41, %s6266_s27  ;;  %v6029_v17 = vld [vmem:[#allocation2 + $0x5cc] sm:$0xf0]  ;;  %v5228_v18 = vld [vmem:[#allocation2 + $0x5d0] sm:$0xf0]  ;;  %v4939_v12 = vor.u32 %v5957_v27, %v4938_v22 }
 0x125   : > { %633 = vst [vmem:[#allocation2 + $0x608] sm:$0xf] %v620_v60  ;;  %v5227_v19 = vor.u32 %v6029_v17, %v5226_v14  ;;  %v5231_v20 = vor.u32 %v6023_v15, %v5228_v18  ;;  %1060 = vrot.lane.b32.xlu2 %v6671_v28, %s6265_s26  ;;  %v5039_v60 = vor.u32 %v5975_v9, %v5036_v0  ;;  %v4986_v11 = vld [vmem:[#allocation2 + $0x3c0] sm:$0xf]  ;;  %v4988_v14 = vld [vmem:[#allocation2 + $0x3f0] sm:$0xf0] }
 0x126   : > { %v834_v23 = vpop.permute.xlu1 %833  ;;  %v832_v24 = vpop.permute.xlu0 %831  ;;  %784 = vst [vmem:[#allocation2 + $0x140] sm:$0xf] %v775_v16  ;;  %v5963_v17 = vld [vmem:[#allocation2 + $0x3c4] sm:$0xf]  ;;  %v4987_v25 = vor.u32 %v5969_v3, %v4986_v11 }
 0x127   : > { %3738 = vmatpush.bf16.msra.mxu1 %v5227_v19  ;;  %3790 = vmatpush.bf16.msrb.mxu0 %v5231_v20  ;;  %v839_v29 = vrot.slane %v834_v23, 4  ;;  %v838_v30 = vrot.slane %v832_v24, 4  ;;  %788 = vst [vmem:[#allocation2 + $0x494] sm:$0xf] %v775_v16  ;;  %v6767_v31 = vpop.permute.xlu2 %727  ;;  %v805_v19 = vrot.slane %v6733_v63, 4 }
 0x128   : > { %792 = vst [vmem:[#allocation2 + $0x7e8] sm:$0xf] %v775_v16 }
 0x129   : > { %v844_v38 = vsel %vm198_vm0, %v839_v29, %v840_v53  ;;  %v841_v36 = vsel %vm198_vm0, %v837_v5, %v838_v30  ;;  %v843_v39 = vsel %vm308_vm4, %v832_v24, %v838_v30 }
 0x12a   : > { %v845_v43 = vsel %vm308_vm4, %v834_v23, %v844_v38  ;;  %852 = vst [vmem:[#allocation2 + $0x200] sm:$0xf] %v843_v39  ;;  %v842_v46 = vsel %vm308_vm4, %v6688_v42, %v841_v36  ;;  %v4991_v36 = vor.u32 %v5963_v17, %v4988_v14 }
 0x12b   : > { %853 = vst [vmem:[#allocation2 + $0x228] sm:$0xff] %v845_v43  ;;  %3739 = vmatpush.bf16.msra.mxu1 %v5179_v33  ;;  %3791 = vmatpush.bf16.msrb.mxu0 %v5183_v35  ;;  %v5951_v35 = vld [vmem:[#allocation2 + $0x364] sm:$0xf] }
 0x12c   : > { %857 = vst [vmem:[#allocation2 + $0x57c] sm:$0xff] %v845_v43  ;;  %1064 = vrot.lane.b32.xlu1 %v6711_v41, %s6265_s26  ;;  %1062 = vrot.lane.b32.xlu0 %v6648_v4, %s6265_s26 }
 0x12d   : > { %861 = vst [vmem:[#allocation2 + $0x8d0] sm:$0xff] %v845_v43  ;;  %1066 = vrot.lane.b32.xlu2 %v6700_v44, %s6265_s26 }
 0x12e   : > { %851 = vst [vmem:[#allocation2 + $0x1f8] sm:$0xff] %v842_v46  ;;  %v798_v50 = vpop.permute.xlu1 %797  ;;  %v796_v42 = vpop.permute.xlu0 %795 }
 0x12f   : > { %855 = vst [vmem:[#allocation2 + $0x54c] sm:$0xff] %v842_v46  ;;  %3740 = vmatpush.bf16.msra.mxu1 %v5131_v47  ;;  %3792 = vmatpush.bf16.msrb.mxu0 %v5135_v49  ;;  %v804_v51 = vrot.slane %v798_v50, 4  ;;  %v803_v52 = vrot.slane %v796_v42, 4  ;;  %v6792_v53 = vpop.permute.xlu2 %733 }
 0x130   : > { %856 = vst [vmem:[#allocation2 + $0x554] sm:$0xf] %v843_v39  ;;  %v738_v1 = vrot.slane %v6792_v53, 4 }
 0x131   : > { %859 = vst [vmem:[#allocation2 + $0x8a0] sm:$0xff] %v842_v46  ;;  %v809_v56 = vsel %vm281_vm5, %v798_v50, %v804_v51  ;;  %v807_v57 = vsel %vm198_vm0, %v803_v52, %v804_v51  ;;  %v4890_v50 = vld [vmem:[#allocation2 + $0x300] sm:$0xf]  ;;  %v5939_v52 = vld [vmem:[#allocation2 + $0x304] sm:$0xf] }
 0x132   : > { %860 = vst [vmem:[#allocation2 + $0x8a8] sm:$0xf] %v843_v39  ;;  %v808_v2 = vsel %vm281_vm5, %v796_v42, %v807_v57  ;;  %v6808_v18 = vsel %vm227_vm1, %v6792_v53, %v738_v1  ;;  %v4891_v51 = vor.u32 %v5945_v26, %v4890_v50 }
 0x133   : > { %818 = vst [vmem:[#allocation2 + $0x1a0] sm:$0xf] %v809_v56  ;;  %3741 = vmatpush.bf16.msra.mxu1 %v5083_v59  ;;  %3793 = vmatpush.bf16.msrb.mxu0 %v5087_v61 }
 0x134   : > { %822 = vst [vmem:[#allocation2 + $0x4f4] sm:$0xf] %v809_v56  ;;  %1028 = vrot.lane.b32.xlu1 %v6648_v4, %s6264_s25  ;;  %1026 = vrot.lane.b32.xlu0 %v6671_v28, %s6264_s25  ;;  %v6125_v15 = vld [vmem:[#allocation2 + $0x8cc] sm:$0xf0]  ;;  %v5612_v48 = vld [vmem:[#allocation2 + $0x8d0] sm:$0xf0] }
 0x135   : > { %826 = vst [vmem:[#allocation2 + $0x848] sm:$0xf] %v809_v56  ;;  %1030 = vrot.lane.b32.xlu2 %v6711_v41, %s6264_s25  ;;  %v6126_v56 = vld [vmem:[#allocation2 + $0x8d4] sm:$0xf0] }
 0x136   : > { %817 = vst [vmem:[#allocation2 + $0x198] sm:$0xff] %v808_v2  ;;  %v762_v16 = vpop.permute.xlu1 %761  ;;  %v802_v5 = vpop.permute.xlu0 %801 }
 0x137   : > { %821 = vst [vmem:[#allocation2 + $0x4ec] sm:$0xff] %v808_v2  ;;  %3742 = vmatpush.bf16.msra.mxu1 %v5035_v10  ;;  %3794 = vmatpush.bf16.msrb.mxu0 %v5039_v60  ;;  %v769_v20 = vrot.slane %v762_v16, 4  ;;  %v806_v21 = vrot.slane %v802_v5, 4  ;;  %v6811_v23 = vpop.permute.xlu2 %697 }
 0x138   : > { %825 = vst [vmem:[#allocation2 + $0x840] sm:$0xff] %v808_v2  ;;  %v5610_v24 = vld [vmem:[#allocation2 + $0x8a0] sm:$0xf]  ;;  %v6119_v47 = vld [vmem:[#allocation2 + $0x8a4] sm:$0xf]  ;;  %v735_v2 = vrot.slane %v6767_v31, 4 }
 0x139   : > { %v5611_v29 = vor.u32 %v6125_v15, %v5610_v24  ;;  %v773_v30 = vsel %vm198_vm0, %v769_v20, %v770_v13  ;;  %v810_v32 = vsel %vm198_vm0, %v805_v19, %v806_v21  ;;  %v812_v33 = vsel %vm281_vm5, %v802_v5, %v806_v21  ;;  %752 = vst [vmem:[#allocation2 + $0x110] sm:$0xf] %v6808_v18  ;;  %v5618_v42 = vld [vmem:[#allocation2 + $0x8a8] sm:$0xf] }
 0x13a   : > { %v774_v38 = vsel %vm254_vm2, %v762_v16, %v773_v30  ;;  %820 = vst [vmem:[#allocation2 + $0x1d0] sm:$0xf] %v812_v33  ;;  %v811_v39 = vsel %vm281_vm5, %v6733_v63, %v810_v32  ;;  %v4943_v13 = vor.u32 %v5951_v35, %v4940_v37  ;;  %v4892_v63 = vld [vmem:[#allocation2 + $0x330] sm:$0xf0]  ;;  %v5615_v55 = vor.u32 %v6119_v47, %v5612_v48 }
 0x13b   : > { %3751 = vmatpush.bf16.msra.mxu2 %v5611_v29  ;;  %783 = vst [vmem:[#allocation2 + $0x138] sm:$0xff] %v774_v38  ;;  %3743 = vmatpush.bf16.msra.mxu1 %v4987_v25  ;;  %v4895_v54 = vor.u32 %v5939_v52, %v4892_v63  ;;  %v5619_v59 = vor.u32 %v6126_v56, %v5618_v42  ;;  %v703_v50 = vrot.slane %v6811_v23, 4 }
 0x13c   : > { %787 = vst [vmem:[#allocation2 + $0x48c] sm:$0xff] %v774_v38  ;;  %3795 = vmatpush.bf16.msrb.mxu0 %v4991_v36  ;;  %992 = vrot.lane.b32.xlu1 %v6671_v28, %s6263_s24  ;;  %v5570_v17 = vld [vmem:[#allocation2 + $0x848] sm:$0xf] }
 0x13d   : > { %791 = vst [vmem:[#allocation2 + $0x7e0] sm:$0xff] %v774_v38  ;;  %1032 = vrot.lane.b32.xlu0 %v6700_v44, %s6264_s25  ;;  %994 = vrot.lane.b32.xlu2 %v6648_v4, %s6263_s24 }
 0x13e   : > { %819 = vst [vmem:[#allocation2 + $0x1c8] sm:$0xff] %v811_v39  ;;  %v768_v40 = vpop.permute.xlu1 %767  ;;  %v766_v43 = vpop.permute.xlu0 %765 }
 0x13f   : > { %823 = vst [vmem:[#allocation2 + $0x51c] sm:$0xff] %v811_v39  ;;  %3744 = vmatpush.bf16.msra.mxu1 %v4939_v12  ;;  %v772_v45 = vrot.slane %v768_v40, 4  ;;  %v771_v46 = vrot.slane %v766_v43, 4  ;;  %v6828_v49 = vpop.permute.xlu2 %933  ;;  %v5562_v61 = vld [vmem:[#allocation2 + $0x840] sm:$0xf] }
 0x140   : > { %824 = vst [vmem:[#allocation2 + $0x524] sm:$0xf] %v812_v33  ;;  %3796 = vmatpush.bf16.msrb.mxu0 %v4943_v13  ;;  %v6107_v8 = vld [vmem:[#allocation2 + $0x844] sm:$0xf]  ;;  %v940_v13 = vrot.slane %v6828_v49, 4 }
 0x141   : > { %827 = vst [vmem:[#allocation2 + $0x870] sm:$0xff] %v811_v39  ;;  %v778_v34 = vsel %vm254_vm2, %v768_v40, %v772_v45  ;;  %v776_v58 = vsel %vm198_vm0, %v771_v46, %v772_v45 }
 0x142   : > { %828 = vst [vmem:[#allocation2 + $0x878] sm:$0xf] %v812_v33  ;;  %v777_v57 = vsel %vm254_vm2, %v766_v43, %v776_v58  ;;  %v945_v48 = vsel %vm389_vm7, %v6828_v49, %v940_v13 }
 0x143   : > { %786 = vst [vmem:[#allocation2 + $0x170] sm:$0xf] %v778_v34  ;;  %3745 = vmatpush.bf16.msra.mxu1 %v4891_v51 }
 0x144   : > { %790 = vst [vmem:[#allocation2 + $0x4c4] sm:$0xf] %v778_v34  ;;  %3797 = vmatpush.bf16.msrb.mxu0 %v4895_v54  ;;  %998 = vrot.lane.b32.xlu1 %v6700_v44, %s6263_s24  ;;  %v5514_v25 = vld [vmem:[#allocation2 + $0x7e0] sm:$0xf]  ;;  %v6095_v27 = vld [vmem:[#allocation2 + $0x7e4] sm:$0xf] }
 0x145   : > { %794 = vst [vmem:[#allocation2 + $0x818] sm:$0xf] %v778_v34  ;;  %996 = vrot.lane.b32.xlu0 %v6711_v41, %s6263_s24  ;;  %1230 = vrot.lane.b32.xlu2 %v6671_v28, %s6270_s7 }
 0x146   : > { %785 = vst [vmem:[#allocation2 + $0x168] sm:$0xff] %v777_v57  ;;  %v732_v62 = vpop.permute.xlu1 %731  ;;  %v730_v0 = vpop.permute.xlu0 %729 }
 0x147   : > { %3803 = vmatpush.bf16.msrb.mxu1 %v5615_v55  ;;  %789 = vst [vmem:[#allocation2 + $0x4bc] sm:$0xff] %v777_v57  ;;  %v737_v3 = vrot.slane %v732_v62, 4  ;;  %v736_v9 = vrot.slane %v730_v0, 4  ;;  %v6840_v10 = vpop.permute.xlu2 %636 }
 0x148   : > { %3855 = vmatpush.bf16.msra.mxu0 %v5619_v59  ;;  %793 = vst [vmem:[#allocation2 + $0x810] sm:$0xff] %v777_v57  ;;  %v6113_v60 = vld [vmem:[#allocation2 + $0x86c] sm:$0xf0]  ;;  %v5564_v11 = vld [vmem:[#allocation2 + $0x870] sm:$0xf0] }
 0x149   : > { %756 = vst [vmem:[#allocation2 + $0x464] sm:$0xf] %v6808_v18  ;;  %v5563_v14 = vor.u32 %v6113_v60, %v5562_v61  ;;  %v742_v15 = vsel %vm198_vm0, %v737_v3, %v738_v1  ;;  %v5567_v16 = vor.u32 %v6107_v8, %v5564_v11  ;;  %v739_v5 = vsel %vm198_vm0, %v735_v2, %v736_v9  ;;  %v6114_v19 = vld [vmem:[#allocation2 + $0x874] sm:$0xf0]  ;;  %v5522_v1 = vld [vmem:[#allocation2 + $0x7e8] sm:$0xf] }
 0x14a   : > { %760 = vst [vmem:[#allocation2 + $0x7b8] sm:$0xf] %v6808_v18  ;;  %v743_v20 = vsel %vm227_vm1, %v732_v62, %v742_v15  ;;  %v5571_v21 = vor.u32 %v6114_v19, %v5570_v17  ;;  %v740_v22 = vsel %vm227_vm1, %v6767_v31, %v739_v5  ;;  %v741_v53 = vsel %vm227_vm1, %v730_v0, %v736_v9  ;;  %v6899_v60 = vld [vmem:[%s6893_s20] sm:$0xff] }
 0x14b   : > { %3752 = vmatpush.bf16.msra.mxu2 %v5563_v14  ;;  %751 = vst [vmem:[#allocation2 + $0x108] sm:$0xff] %v743_v20  ;;  %3804 = vmatpush.bf16.msrb.mxu1 %v5567_v16 }
 0x14c   : > { %755 = vst [vmem:[#allocation2 + $0x45c] sm:$0xff] %v743_v20  ;;  %3856 = vmatpush.bf16.msra.mxu0 %v5571_v21  ;;  %v6102_v24 = vld [vmem:[#allocation2 + $0x814] sm:$0xf0]  ;;  %1234 = vrot.lane.b32.xlu1 %v6711_v41, %s6270_s7  ;;  %v6059_v21 = vld [vmem:[#allocation2 + $0x6c4] sm:$0xf] }
 0x14d   : > { %759 = vst [vmem:[#allocation2 + $0x7b0] sm:$0xff] %v743_v20  ;;  %v5523_v18 = vor.u32 %v6102_v24, %v5522_v1  ;;  %1232 = vrot.lane.b32.xlu0 %v6648_v4, %s6270_s7  ;;  %1236 = vrot.lane.b32.xlu2 %v6700_v44, %s6270_s7  ;;  %v6065_v20 = vld [vmem:[#allocation2 + $0x6ec] sm:$0xf0] }
 0x14e   : > { %749 = vst [vmem:[#allocation2 + $0xd8] sm:$0xff] %v740_v22  ;;  %v696_v29 = vpop.permute.xlu1 %695  ;;  %v694_v30 = vpop.permute.xlu0 %693 }
 0x14f   : > { %750 = vst [vmem:[#allocation2 + $0xe0] sm:$0xf] %v741_v53  ;;  %v6101_v31 = vld [vmem:[#allocation2 + $0x80c] sm:$0xf0]  ;;  %v5516_v32 = vld [vmem:[#allocation2 + $0x810] sm:$0xf0]  ;;  %v6858_v33 = vpop.permute.xlu2 %642 }
 0x150   : > { %753 = vst [vmem:[#allocation2 + $0x42c] sm:$0xff] %v740_v22  ;;  %3857 = vmatpush.bf16.msra.mxu0 %v5523_v18  ;;  %v5515_v35 = vor.u32 %v6101_v31, %v5514_v25  ;;  %v5519_v37 = vor.u32 %v6095_v27, %v5516_v32  ;;  %v702_v38 = vrot.slane %v696_v29, 4  ;;  %v701_v36 = vrot.slane %v694_v30, 4  ;;  %v6912_v18 = vld [vmem:[%s6893_s20 + $0x10] sm:$0xff]  ;;  %v5378_v25 = vld [vmem:[#allocation2 + $0x6c8] sm:$0xf] }
 0x151   : > { %754 = vst [vmem:[#allocation2 + $0x434] sm:$0xf] %v741_v53  ;;  %v6090_v54 = vld [vmem:[#allocation2 + $0x7b4] sm:$0xf0]  ;;  %v6916_v32 = vld [vmem:[%s6893_s20 + $0x8] sm:$0xff] }
 0x152   : > { %757 = vst [vmem:[#allocation2 + $0x780] sm:$0xff] %v740_v22  ;;  %3753 = vmatpush.bf16.msra.mxu2 %v5515_v35  ;;  %3805 = vmatpush.bf16.msrb.mxu1 %v5519_v37  ;;  %v707_v39 = vsel %vm200_vm3, %v696_v29, %v702_v38  ;;  %v705_v12 = vsel %vm198_vm0, %v701_v36, %v702_v38  ;;  %v5372_v22 = vld [vmem:[#allocation2 + $0x6f0] sm:$0xf0]  ;;  %v6066_v27 = vld [vmem:[#allocation2 + $0x6f4] sm:$0xf0] }
 0x153   : > { %758 = vst [vmem:[#allocation2 + $0x788] sm:$0xf] %v741_v53  ;;  %v706_v26 = vsel %vm200_vm3, %v694_v30, %v705_v12 }
 0x154   : > { %716 = vst [vmem:[#allocation2 + $0x80] sm:$0xf] %v707_v39  ;;  %1198 = vrot.lane.b32.xlu1 %v6648_v4, %s6269_s6  ;;  %v6089_v40 = vld [vmem:[#allocation2 + $0x7ac] sm:$0xf0]  ;;  %v5468_v45 = vld [vmem:[#allocation2 + $0x7b0] sm:$0xf0] }
 0x155   : > { %720 = vst [vmem:[#allocation2 + $0x3d4] sm:$0xf] %v707_v39  ;;  %1196 = vrot.lane.b32.xlu0 %v6671_v28, %s6269_s6  ;;  %1200 = vrot.lane.b32.xlu2 %v6711_v41, %s6269_s6 }
 0x156   : > { %724 = vst [vmem:[#allocation2 + $0x728] sm:$0xf] %v707_v39  ;;  %v932_v43 = vpop.permute.xlu1 %931  ;;  %v700_v63 = vpop.permute.xlu0 %699 }
 0x157   : > { %715 = vst [vmem:[#allocation2 + $0x78] sm:$0xff] %v706_v26  ;;  %v939_v46 = vrot.slane %v932_v43, 4  ;;  %v704_v47 = vrot.slane %v700_v63, 4  ;;  %v6874_v51 = vpop.permute.xlu2 %901 }
 0x158   : > { %719 = vst [vmem:[#allocation2 + $0x3cc] sm:$0xff] %v706_v26 }
 0x159   : > { %723 = vst [vmem:[#allocation2 + $0x720] sm:$0xff] %v706_v26  ;;  %v5466_v42 = vld [vmem:[#allocation2 + $0x780] sm:$0xf]  ;;  %v6083_v34 = vld [vmem:[#allocation2 + $0x784] sm:$0xf]  ;;  %v943_v58 = vsel %vm198_vm0, %v939_v46, %v940_v13  ;;  %v708_v57 = vsel %vm198_vm0, %v703_v50, %v704_v47  ;;  %v710_v62 = vsel %vm200_vm3, %v700_v63, %v704_v47  ;;  %v5375_v63 = vor.u32 %v6059_v21, %v5372_v22 }
 0x15a   : > { %954 = vst [vmem:[#allocation2 + $0x320] sm:$0xf] %v945_v48  ;;  %v5474_v52 = vld [vmem:[#allocation2 + $0x788] sm:$0xf]  ;;  %v5467_v55 = vor.u32 %v6089_v40, %v5466_v42  ;;  %v5471_v56 = vor.u32 %v6083_v34, %v5468_v45  ;;  %v944_v49 = vsel %vm389_vm7, %v932_v43, %v943_v58  ;;  %v709_v61 = vsel %vm200_vm3, %v6811_v23, %v708_v57  ;;  %v5839_v47 = vld [vmem:[%s7661_s1 + $0x4] sm:$0xf] }
 0x15b   : > { %958 = vst [vmem:[#allocation2 + $0x674] sm:$0xf] %v945_v48  ;;  %v5475_v59 = vor.u32 %v6090_v54, %v5474_v52  ;;  %v4492_v50 = vld [vmem:[%s7661_s1 + $0x10] sm:$0xf0] }
 0x15c   : > { %962 = vst [vmem:[#allocation2 + $0x9c8] sm:$0xf] %v945_v48  ;;  %3754 = vmatpush.bf16.msra.mxu2 %v5467_v55  ;;  %3806 = vmatpush.bf16.msrb.mxu1 %v5471_v56  ;;  %v6928_v48 = vld [vmem:[%s6893_s20 + $0x18] sm:$0xff]  ;;  %v6938_v58 = vor.u32 %v5839_v47, %v4492_v50 }
 0x15d   : > { %3858 = vmatpush.bf16.msra.mxu0 %v5475_v59  ;;  %953 = vst [vmem:[#allocation2 + $0x318] sm:$0xff] %v944_v49  ;;  %1162 = vrot.lane.b32.xlu1 %v6671_v28, %s6268_s5 }
 0x15e   : > { %957 = vst [vmem:[#allocation2 + $0x66c] sm:$0xff] %v944_v49  ;;  %1202 = vrot.lane.b32.xlu0 %v6700_v44, %s6269_s6  ;;  %v938_v0 = vpop.permute.xlu1 %937  ;;  %v936_v2 = vpop.permute.xlu0 %935  ;;  %1164 = vrot.lane.b32.xlu2 %v6648_v4, %s6268_s5  ;;  %v647_v4 = vrot.slane %v6858_v33, 4 }
 0x15f   : > { %961 = vst [vmem:[#allocation2 + $0x9c0] sm:$0xff] %v944_v49  ;;  %v942_v3 = vrot.slane %v938_v0, 4  ;;  %v941_v8 = vrot.slane %v936_v2, 4  ;;  %v6890_v9 = vpop.permute.xlu2 %863  ;;  %3746 = vmatmul.bf16.vlgmr.msra.gmra.mxu1 %v6938_v58  ;;  %3798 = vmatmul.bf16.vlgmr.msrb.gmra.mxu0 %v6938_v58 }
 0x160   : > { %717 = vst [vmem:[#allocation2 + $0xa8] sm:$0xff] %v709_v61  ;;  %v653_v17 = vsel %vm389_vm7, %v6858_v33, %v647_v4  ;;  %v5418_v53 = vld [vmem:[#allocation2 + $0x720] sm:$0xf]  ;;  %v6071_v1 = vld [vmem:[#allocation2 + $0x724] sm:$0xf] }
 0x161   : > { %718 = vst [vmem:[#allocation2 + $0xb0] sm:$0xf] %v710_v62  ;;  %v948_v28 = vsel %vm389_vm7, %v938_v0, %v942_v3  ;;  %v946_v23 = vsel %vm198_vm0, %v941_v8, %v942_v3  ;;  %v5426_v33 = vld [vmem:[#allocation2 + $0x728] sm:$0xf]  ;;  %v616_v0 = vrot.slane %v6744_v6, 4 }
 0x162   : > { %721 = vst [vmem:[#allocation2 + $0x3fc] sm:$0xff] %v709_v61  ;;  %v947_v11 = vsel %vm389_vm7, %v936_v2, %v946_v23 }
 0x163   : > { %722 = vst [vmem:[#allocation2 + $0x404] sm:$0xf] %v710_v62  ;;  %v5762_v47 = vld [vmem:[#allocation2 + $0x9c8] sm:$0xf] }
 0x164   : > { %725 = vst [vmem:[#allocation2 + $0x750] sm:$0xff] %v709_v61 }
 0x165   : > { %726 = vst [vmem:[#allocation2 + $0x758] sm:$0xf] %v710_v62  ;;  %1168 = vrot.lane.b32.xlu1 %v6700_v44, %s6268_s5  ;;  %v644_v44 = vrot.slane %v6840_v10, 4 }
 0x166   : > { %956 = vst [vmem:[#allocation2 + $0x350] sm:$0xf] %v948_v28  ;;  %1166 = vrot.lane.b32.xlu0 %v6711_v41, %s6268_s5  ;;  %v641_v14 = vpop.permute.xlu1 %640  ;;  %v639_v15 = vpop.permute.xlu0 %638  ;;  %1407 = vrot.lane.b32.xlu2 %v6899_v60, %s6267_s30  ;;  %v5370_v41 = vld [vmem:[#allocation2 + $0x6c0] sm:$0xf] }
 0x167   : > { %960 = vst [vmem:[#allocation2 + $0x6a4] sm:$0xf] %v948_v28  ;;  %v646_v16 = vrot.slane %v641_v14, 4  ;;  %v645_v5 = vrot.slane %v639_v15, 4  ;;  %v6922_v12 = vpop.permute.xlu2 %869  ;;  %v5371_v43 = vor.u32 %v6065_v20, %v5370_v41  ;;  %v5754_v42 = vld [vmem:[#allocation2 + $0x9c0] sm:$0xf] }
 0x168   : > { %964 = vst [vmem:[#allocation2 + $0x9f8] sm:$0xf] %v948_v28 }
 0x169   : > { %955 = vst [vmem:[#allocation2 + $0x348] sm:$0xff] %v947_v11  ;;  %v651_v19 = vsel %vm198_vm0, %v646_v16, %v647_v4  ;;  %v648_v24 = vsel %vm198_vm0, %v644_v44, %v645_v5  ;;  %v650_v13 = vsel %vm389_vm7, %v639_v15, %v645_v5  ;;  %v907_v5 = vrot.slane %v6874_v51, 4 }
 0x16a   : > { %959 = vst [vmem:[#allocation2 + $0x69c] sm:$0xff] %v947_v11  ;;  %v652_v31 = vsel %vm389_vm7, %v641_v14, %v651_v19  ;;  %v649_v39 = vsel %vm389_vm7, %v6840_v10, %v648_v24  ;;  %v5379_v10 = vor.u32 %v6066_v27, %v5378_v25  ;;  %v871_v24 = vrot.slane %v6890_v9, 4 }
 0x16b   : > { %963 = vst [vmem:[#allocation2 + $0x9f0] sm:$0xff] %v947_v11  ;;  %v6077_v29 = vld [vmem:[#allocation2 + $0x74c] sm:$0xf0]  ;;  %v5420_v30 = vld [vmem:[#allocation2 + $0x750] sm:$0xf0] }
 0x16c   : > { %661 = vst [vmem:[#allocation2 + $0x344] sm:$0xf] %v653_v17  ;;  %v6078_v35 = vld [vmem:[#allocation2 + $0x754] sm:$0xf0]  ;;  %v5419_v37 = vor.u32 %v6077_v29, %v5418_v53  ;;  %v5423_v38 = vor.u32 %v6071_v1, %v5420_v30  ;;  %v874_v53 = vrot.slane %v6922_v12, 4 }
 0x16d   : > { %665 = vst [vmem:[#allocation2 + $0x698] sm:$0xf] %v653_v17  ;;  %v5427_v36 = vor.u32 %v6078_v35, %v5426_v33  ;;  %1411 = vrot.lane.b32.xlu1 %v6912_v18, %s6267_s30  ;;  %v5274_v29 = vld [vmem:[#allocation2 + $0x600] sm:$0xf]  ;;  %v6035_v30 = vld [vmem:[#allocation2 + $0x604] sm:$0xf] }
 0x16e   : > { %3755 = vmatpush.bf16.msra.mxu2 %v5419_v37  ;;  %3807 = vmatpush.bf16.msrb.mxu1 %v5423_v38  ;;  %660 = vst [vmem:[#allocation2 + $0x33c] sm:$0xff] %v652_v31  ;;  %v900_v26 = vpop.permute.xlu1 %899  ;;  %v898_v40 = vpop.permute.xlu0 %897  ;;  %v5282_v37 = vld [vmem:[#allocation2 + $0x608] sm:$0xf] }
 0x16f   : > { %3859 = vmatpush.bf16.msra.mxu0 %v5427_v36  ;;  %664 = vst [vmem:[#allocation2 + $0x690] sm:$0xff] %v652_v31  ;;  %1409 = vrot.lane.b32.xlu0 %v6916_v32, %s6267_s30  ;;  %v906_v45 = vrot.slane %v900_v26, 4  ;;  %v905_v46 = vrot.slane %v898_v40, 4  ;;  %v6952_v62 = vpop.permute.xlu2 %1132  ;;  %v6162_v33 = vld [vmem:[#allocation2 + $0x9f4] sm:$0xf0] }
 0x170   : > { %658 = vst [vmem:[#allocation2 + $0x30c] sm:$0xff] %v649_v39  ;;  %1413 = vrot.lane.b32.xlu2 %v6928_v48, %s6267_s30  ;;  %v4498_v38 = vld [vmem:[%s7661_s1 + $0x8] sm:$0xf]  ;;  %v5842_v36 = vld [vmem:[%s7661_s1 + $0x14] sm:$0xf0] }
 0x171   : > { %659 = vst [vmem:[#allocation2 + $0x314] sm:$0xf] %v650_v13  ;;  %v911_v54 = vsel %vm362_vm8, %v900_v26, %v906_v45  ;;  %v909_v55 = vsel %vm198_vm0, %v905_v46, %v906_v45  ;;  %v7003_v50 = vor.u32 %v5842_v36, %v4498_v38 }
 0x172   : > { %662 = vst [vmem:[#allocation2 + $0x660] sm:$0xff] %v649_v39  ;;  %v6161_v34 = vld [vmem:[#allocation2 + $0x9ec] sm:$0xf0]  ;;  %3756 = vmatpush.bf16.msra.mxu2 %v5371_v43  ;;  %3808 = vmatpush.bf16.msrb.mxu1 %v5375_v63  ;;  %v910_v2 = vsel %vm362_vm8, %v898_v40, %v909_v55  ;;  %v5756_v31 = vld [vmem:[#allocation2 + $0x9f0] sm:$0xf0] }
 0x173   : > { %663 = vst [vmem:[#allocation2 + $0x668] sm:$0xf] %v650_v13  ;;  %v5755_v52 = vor.u32 %v6161_v34, %v5754_v42  ;;  %3860 = vmatpush.bf16.msra.mxu0 %v5379_v10  ;;  %v6155_v10 = vld [vmem:[#allocation2 + $0x9c4] sm:$0xf] }
 0x174   : > { %1277 = vst [vmem:[#allocation2 + $0x3b4] sm:$0xff] %v6912_v18  ;;  %v6054_v3 = vld [vmem:[#allocation2 + $0x694] sm:$0xf0]  ;;  %v5759_v46 = vor.u32 %v6155_v10, %v5756_v31  ;;  %v4796_v10 = vld [vmem:[#allocation2 + $0x270] sm:$0xf0] }
 0x175   : > { %1281 = vst [vmem:[#allocation2 + $0x708] sm:$0xff] %v6912_v18  ;;  %3769 = vmatpush.bf16.msra.mxu3 %v5755_v52  ;;  %1379 = vrot.lane.b32.xlu1 %v6916_v32, %s6266_s27  ;;  %v5763_v52 = vor.u32 %v6162_v33, %v5762_v47  ;;  %v5915_v47 = vld [vmem:[#allocation2 + $0x244] sm:$0xf] }
 0x176   : > { %1276 = vst [vmem:[#allocation2 + $0x38c] sm:$0xf] %v6916_v32  ;;  %v6053_v56 = vld [vmem:[#allocation2 + $0x68c] sm:$0xf0]  ;;  %v613_v49 = vpop.permute.xlu1 %612  ;;  %v904_v57 = vpop.permute.xlu0 %903  ;;  %v5324_v59 = vld [vmem:[#allocation2 + $0x690] sm:$0xf0] }
 0x177   : > { %1280 = vst [vmem:[#allocation2 + $0x6e0] sm:$0xf] %v6916_v32  ;;  %1377 = vrot.lane.b32.xlu0 %v6899_v60, %s6266_s27  ;;  %v617_v61 = vrot.slane %v613_v49, 4  ;;  %v908_v15 = vrot.slane %v904_v57, 4  ;;  %v6972_v21 = vpop.permute.xlu2 %1096 }
 0x178   : > { %920 = vst [vmem:[#allocation2 + $0x2c0] sm:$0xf] %v911_v54  ;;  %1381 = vrot.lane.b32.xlu2 %v6912_v18, %s6266_s27 }
 0x179   : > { %924 = vst [vmem:[#allocation2 + $0x614] sm:$0xf] %v911_v54  ;;  %v5322_v8 = vld [vmem:[#allocation2 + $0x660] sm:$0xf]  ;;  %v6047_v28 = vld [vmem:[#allocation2 + $0x664] sm:$0xf]  ;;  %v621_v14 = vsel %vm198_vm0, %v616_v0, %v617_v61  ;;  %v623_v17 = vsel %vm362_vm8, %v613_v49, %v617_v61  ;;  %v912_v19 = vsel %vm198_vm0, %v907_v5, %v908_v15  ;;  %v914_v22 = vsel %vm362_vm8, %v904_v57, %v908_v15 }
 0x17a   : > { %928 = vst [vmem:[#allocation2 + $0x968] sm:$0xf] %v911_v54  ;;  %v5330_v23 = vld [vmem:[#allocation2 + $0x668] sm:$0xf]  ;;  %v5323_v4 = vor.u32 %v6053_v56, %v5322_v8  ;;  %v5327_v11 = vor.u32 %v6047_v28, %v5324_v59  ;;  %v622_v44 = vsel %vm362_vm8, %v6744_v6, %v621_v14  ;;  %v913_v6 = vsel %vm362_vm8, %v6874_v51, %v912_v19 }
 0x17b   : > { %919 = vst [vmem:[#allocation2 + $0x2b8] sm:$0xff] %v910_v2  ;;  %v5331_v16 = vor.u32 %v6054_v3, %v5330_v23  ;;  %v880_v51 = vsel %vm335_vm6, %v6922_v12, %v874_v53 }
 0x17c   : > { %923 = vst [vmem:[#allocation2 + $0x60c] sm:$0xff] %v910_v2  ;;  %3757 = vmatpush.bf16.msra.mxu2 %v5323_v4  ;;  %3809 = vmatpush.bf16.msrb.mxu1 %v5327_v11 }
 0x17d   : > { %927 = vst [vmem:[#allocation2 + $0x960] sm:$0xff] %v910_v2  ;;  %3861 = vmatpush.bf16.msra.mxu0 %v5331_v16  ;;  %1347 = vrot.lane.b32.xlu1 %v6899_v60, %s6265_s26 }
 0x17e   : > { %1275 = vst [vmem:[#allocation2 + $0x384] sm:$0xff] %v6899_v60  ;;  %v868_v41 = vpop.permute.xlu1 %867  ;;  %v6967_v20 = vpop.permute.xlu0 %865 }
 0x17f   : > { %1279 = vst [vmem:[#allocation2 + $0x6d8] sm:$0xff] %v6899_v60  ;;  %1383 = vrot.lane.b32.xlu0 %v6928_v48, %s6266_s27  ;;  %v873_v1 = vrot.slane %v868_v41, 4  ;;  %v872_v35 = vrot.slane %v6967_v20, 4  ;;  %v7001_v26 = vpop.permute.xlu2 %1060 }
 0x180   : > { %630 = vst [vmem:[#allocation2 + $0x2dc] sm:$0xff] %v622_v44  ;;  %1349 = vrot.lane.b32.xlu2 %v6916_v32, %s6265_s26 }
 0x181   : > { %631 = vst [vmem:[#allocation2 + $0x2e4] sm:$0xf] %v623_v17  ;;  %v878_v39 = vsel %vm198_vm0, %v873_v1, %v874_v53  ;;  %v875_v34 = vsel %vm198_vm0, %v871_v24, %v872_v35  ;;  %v877_v0 = vsel %vm335_vm6, %v6967_v20, %v872_v35  ;;  %v5714_v8 = vld [vmem:[#allocation2 + $0x968] sm:$0xf]  ;;  %v4844_v20 = vld [vmem:[#allocation2 + $0x2d0] sm:$0xf0] }
 0x182   : > { %634 = vst [vmem:[#allocation2 + $0x630] sm:$0xff] %v622_v44  ;;  %v879_v42 = vsel %vm335_vm6, %v868_v41, %v878_v39  ;;  %v876_v57 = vsel %vm335_vm6, %v6890_v9, %v875_v34  ;;  %v6030_v24 = vld [vmem:[#allocation2 + $0x5d4] sm:$0xf0] }
 0x183   : > { %635 = vst [vmem:[#allocation2 + $0x638] sm:$0xf] %v623_v17  ;;  %v1103_v17 = vrot.slane %v6972_v21, 4 }
 0x184   : > { %921 = vst [vmem:[#allocation2 + $0x2e8] sm:$0xff] %v913_v6  ;;  %v5706_v54 = vld [vmem:[#allocation2 + $0x960] sm:$0xf]  ;;  %v6143_v55 = vld [vmem:[#allocation2 + $0x964] sm:$0xf] }
 0x185   : > { %922 = vst [vmem:[#allocation2 + $0x2f0] sm:$0xf] %v914_v22  ;;  %1353 = vrot.lane.b32.xlu1 %v6928_v48, %s6265_s26 }
 0x186   : > { %925 = vst [vmem:[#allocation2 + $0x63c] sm:$0xff] %v913_v6  ;;  %v6983_v25 = vpop.permute.xlu1 %1130  ;;  %v6985_v27 = vpop.permute.xlu0 %1128 }
 0x187   : > { %926 = vst [vmem:[#allocation2 + $0x644] sm:$0xf] %v914_v22  ;;  %1351 = vrot.lane.b32.xlu0 %v6912_v18, %s6265_s26  ;;  %v1137_v9 = vrot.slane %v6983_v25, 4  ;;  %v1136_v23 = vrot.slane %v6985_v27, 4  ;;  %v7025_v11 = vpop.permute.xlu2 %1066 }
 0x188   : > { %929 = vst [vmem:[#allocation2 + $0x990] sm:$0xff] %v913_v6  ;;  %1317 = vrot.lane.b32.xlu2 %v6899_v60, %s6264_s25 }
 0x189   : > { %930 = vst [vmem:[#allocation2 + $0x998] sm:$0xf] %v914_v22  ;;  %v6041_v12 = vld [vmem:[#allocation2 + $0x62c] sm:$0xf0]  ;;  %v5276_v13 = vld [vmem:[#allocation2 + $0x630] sm:$0xf0]  ;;  %v1142_v14 = vsel %vm308_vm4, %v6983_v25, %v1137_v9  ;;  %v1140_v15 = vsel %vm198_vm0, %v1136_v23, %v1137_v9  ;;  %v1108_v22 = vsel %vm281_vm5, %v6972_v21, %v1103_v17 }
 0x18a   : > { %888 = vst [vmem:[#allocation2 + $0x290] sm:$0xf] %v880_v51  ;;  %v6042_v40 = vld [vmem:[#allocation2 + $0x634] sm:$0xf0]  ;;  %v5275_v43 = vor.u32 %v6041_v12, %v5274_v29  ;;  %v5279_v63 = vor.u32 %v6035_v30, %v5276_v13  ;;  %v1141_v19 = vsel %vm308_vm4, %v6985_v27, %v1140_v15  ;;  %v1138_v27 = vrot.slane %v6952_v62, 4 }
 0x18b   : > { %892 = vst [vmem:[#allocation2 + $0x5e4] sm:$0xf] %v880_v51  ;;  %v5283_v45 = vor.u32 %v6042_v40, %v5282_v37  ;;  %v5138_v9 = vld [vmem:[#allocation2 + $0x4e8] sm:$0xf]  ;;  %v5140_v23 = vld [vmem:[#allocation2 + $0x518] sm:$0xf0] }
 0x18c   : > { %896 = vst [vmem:[#allocation2 + $0x938] sm:$0xf] %v880_v51  ;;  %3758 = vmatpush.bf16.msra.mxu2 %v5275_v43  ;;  %3810 = vmatpush.bf16.msrb.mxu1 %v5279_v63  ;;  %v5927_v51 = vld [vmem:[#allocation2 + $0x2a4] sm:$0xf]  ;;  %v5234_v63 = vld [vmem:[#allocation2 + $0x5a8] sm:$0xf] }
 0x18d   : > { %1278 = vst [vmem:[#allocation2 + $0x3bc] sm:$0xf] %v6928_v48  ;;  %3862 = vmatpush.bf16.msra.mxu0 %v5283_v45  ;;  %1321 = vrot.lane.b32.xlu1 %v6912_v18, %s6264_s25  ;;  %v4847_v40 = vor.u32 %v5927_v51, %v4844_v20  ;;  %v5235_v45 = vor.u32 %v6030_v24, %v5234_v63  ;;  %v6000_v20 = vld [vmem:[#allocation2 + $0x4ec] sm:$0xf]  ;;  %v1071_v24 = vrot.slane %v7025_v11, 4 }
 0x18e   : > { %1282 = vst [vmem:[#allocation2 + $0x710] sm:$0xf] %v6928_v48  ;;  %v1095_v56 = vpop.permute.xlu1 %1094  ;;  %v7011_v49 = vpop.permute.xlu0 %1134  ;;  %v5044_v63 = vld [vmem:[#allocation2 + $0x458] sm:$0xf0] }
 0x18f   : > { %887 = vst [vmem:[#allocation2 + $0x288] sm:$0xff] %v879_v42  ;;  %v6149_v59 = vld [vmem:[#allocation2 + $0x98c] sm:$0xf0]  ;;  %v5708_v61 = vld [vmem:[#allocation2 + $0x990] sm:$0xf0]  ;;  %1319 = vrot.lane.b32.xlu0 %v6916_v32, %s6264_s25  ;;  %3759 = vmatmul.bf16.vlgmr.msra.gmra.mxu2 %v7003_v50  ;;  %v1102_v16 = vrot.slane %v1095_v56, 4  ;;  %v7048_v25 = vpop.permute.xlu2 %1030 }
 0x190   : > { %3821 = vmatpush.bf16.msrb.mxu2 %v5759_v46  ;;  %3873 = vmatpush.bf16.msra.mxu1 %v5763_v52  ;;  %891 = vst [vmem:[#allocation2 + $0x5dc] sm:$0xff] %v879_v42  ;;  %v5707_v2 = vor.u32 %v6149_v59, %v5706_v54  ;;  %v5711_v3 = vor.u32 %v6143_v55, %v5708_v61  ;;  %v6150_v28 = vld [vmem:[#allocation2 + $0x994] sm:$0xf0]  ;;  %v1139_v6 = vrot.slane %v7011_v49, 4  ;;  %v6012_v52 = vld [vmem:[#allocation2 + $0x54c] sm:$0xf] }
 0x191   : > { %3811 = vmatmul.bf16.vlgmr.msrb.gmra.mxu1 %v7003_v50  ;;  %1323 = vrot.lane.b32.xlu2 %v6928_v48, %s6264_s25  ;;  %895 = vst [vmem:[#allocation2 + $0x930] sm:$0xff] %v879_v42  ;;  %v5715_v4 = vor.u32 %v6150_v28, %v5714_v8  ;;  %v1106_v41 = vsel %vm198_vm0, %v1102_v16, %v1103_v17  ;;  %v6018_v42 = vld [vmem:[#allocation2 + $0x574] sm:$0xf0]  ;;  %v5188_v54 = vld [vmem:[#allocation2 + $0x578] sm:$0xf0] }
 0x192   : > { %3863 = vmatmul.bf16.vlgmr.msra.gmra.mxu0 %v7003_v50  ;;  %885 = vst [vmem:[#allocation2 + $0x258] sm:$0xff] %v876_v57  ;;  %3770 = vmatpush.bf16.msra.mxu3 %v5707_v2  ;;  %v1107_v33 = vsel %vm281_vm5, %v1095_v56, %v1106_v41  ;;  %v1143_v39 = vsel %vm198_vm0, %v1138_v27, %v1139_v6  ;;  %v5840_v56 = vld [vmem:[%s7661_s1 + $0xc] sm:$0xf]  ;;  %v4748_v28 = vld [vmem:[#allocation2 + $0x210] sm:$0xf0] }
 0x193   : > { %886 = vst [vmem:[#allocation2 + $0x260] sm:$0xf] %v877_v0  ;;  %v6138_v36 = vld [vmem:[#allocation2 + $0x934] sm:$0xf0]  ;;  %v1144_v34 = vsel %vm308_vm4, %v6952_v62, %v1143_v39  ;;  %v1145_v55 = vsel %vm308_vm4, %v7011_v49, %v1139_v6  ;;  %v4799_v59 = vor.u32 %v5915_v47, %v4796_v10  ;;  %v5186_v62 = vld [vmem:[#allocation2 + $0x548] sm:$0xf]  ;;  %v5191_v8 = vor.u32 %v6012_v52, %v5188_v54 }
 0x194   : > { %3822 = vmatpush.bf16.msrb.mxu2 %v5711_v3  ;;  %3874 = vmatpush.bf16.msra.mxu1 %v5715_v4  ;;  %889 = vst [vmem:[#allocation2 + $0x5ac] sm:$0xff] %v876_v57  ;;  %v5187_v3 = vor.u32 %v6018_v42, %v5186_v62  ;;  %v5903_v4 = vld [vmem:[#allocation2 + $0x1e4] sm:$0xf]  ;;  %v6006_v41 = vld [vmem:[#allocation2 + $0x514] sm:$0xf0] }
 0x195   : > { %890 = vst [vmem:[#allocation2 + $0x5b4] sm:$0xf] %v877_v0  ;;  %1289 = vrot.lane.b32.xlu1 %v6916_v32, %s6263_s24  ;;  %v4751_v17 = vor.u32 %v5903_v4, %v4748_v28  ;;  %v5139_v6 = vor.u32 %v6006_v41, %v5138_v9  ;;  %v5982_v39 = vld [vmem:[#allocation2 + $0x454] sm:$0xf0]  ;;  %v5042_v42 = vld [vmem:[#allocation2 + $0x428] sm:$0xf] }
 0x196   : > { %893 = vst [vmem:[#allocation2 + $0x900] sm:$0xff] %v876_v57  ;;  %v7033_v5 = vpop.permute.xlu1 %1100  ;;  %v7035_v44 = vpop.permute.xlu0 %1098  ;;  %v4500_v57 = vld [vmem:[%s7661_s1 + $0x18] sm:$0xf0]  ;;  %v5970_v62 = vld [vmem:[#allocation2 + $0x3f4] sm:$0xf0] }
 0x197   : > { %894 = vst [vmem:[#allocation2 + $0x908] sm:$0xf] %v877_v0  ;;  %1287 = vrot.lane.b32.xlu0 %v6899_v60, %s6263_s24  ;;  %v5236_v30 = vld [vmem:[#allocation2 + $0x5d8] sm:$0xf0]  ;;  %v1105_v61 = vrot.slane %v7033_v5, 4  ;;  %v1104_v0 = vrot.slane %v7035_v44, 4  ;;  %v7073_v2 = vor.u32 %v5840_v56, %v4500_v57  ;;  %v7075_v49 = vpop.permute.xlu2 %994 }
 0x198   : > { %1151 = vst [vmem:[#allocation2 + $0x20c] sm:$0xf] %v1142_v14  ;;  %v6137_v53 = vld [vmem:[#allocation2 + $0x92c] sm:$0xf0]  ;;  %v5660_v1 = vld [vmem:[#allocation2 + $0x930] sm:$0xf0] }
 0x199   : > { %1291 = vrot.lane.b32.xlu2 %v6912_v18, %s6263_s24  ;;  %1155 = vst [vmem:[#allocation2 + $0x560] sm:$0xf] %v1142_v14  ;;  %v1111_v16 = vsel %vm281_vm5, %v7033_v5, %v1105_v61  ;;  %v5092_v5 = vld [vmem:[#allocation2 + $0x4b8] sm:$0xf0]  ;;  %v5867_v57 = vld [vmem:[#allocation2 + $0xc4] sm:$0xf] }
 0x19a   : > { %1159 = vst [vmem:[#allocation2 + $0x8b4] sm:$0xf] %v1142_v14  ;;  %v5952_v9 = vld [vmem:[#allocation2 + $0x36c] sm:$0xf]  ;;  %v4556_v41 = vld [vmem:[#allocation2 + $0x90] sm:$0xf0] }
 0x19b   : > { %1150 = vst [vmem:[#allocation2 + $0x204] sm:$0xff] %v1141_v19  ;;  %v6024_v29 = vld [vmem:[#allocation2 + $0x5ac] sm:$0xf] }
 0x19c   : > { %1154 = vst [vmem:[#allocation2 + $0x558] sm:$0xff] %v1141_v19  ;;  %v5239_v46 = vor.u32 %v6024_v29, %v5236_v30  ;;  %v5891_v29 = vld [vmem:[#allocation2 + $0x184] sm:$0xf] }
 0x19d   : > { %1158 = vst [vmem:[#allocation2 + $0x8ac] sm:$0xff] %v1141_v19  ;;  %v5658_v31 = vld [vmem:[#allocation2 + $0x900] sm:$0xf]  ;;  %v6131_v35 = vld [vmem:[#allocation2 + $0x904] sm:$0xf]  ;;  %1497 = vrot.lane.b32.xlu1 %v6899_v60, %s6270_s7  ;;  %v1109_v19 = vsel %vm198_vm0, %v1104_v0, %v1105_v61 }
 0x19e   : > { %1117 = vst [vmem:[#allocation2 + $0x1ac] sm:$0xf] %v1108_v22  ;;  %v5659_v37 = vor.u32 %v6137_v53, %v5658_v31  ;;  %v5663_v38 = vor.u32 %v6131_v35, %v5660_v1  ;;  %v5666_v21 = vld [vmem:[#allocation2 + $0x908] sm:$0xf]  ;;  %v7055_v12 = vpop.permute.xlu1 %1064  ;;  %v7057_v13 = vpop.permute.xlu0 %1062  ;;  %v4700_v53 = vld [vmem:[#allocation2 + $0x1b0] sm:$0xf0]  ;;  %v1110_v51 = vsel %vm281_vm5, %v7035_v44, %v1109_v19  ;;  %v1077_v44 = vsel %vm254_vm2, %v7025_v11, %v1071_v24 }
 0x19f   : > { %1121 = vst [vmem:[#allocation2 + $0x500] sm:$0xf] %v1108_v22  ;;  %v5667_v43 = vor.u32 %v6138_v36, %v5666_v21  ;;  %1293 = vrot.lane.b32.xlu0 %v6928_v48, %s6263_s24  ;;  %v5994_v1 = vld [vmem:[#allocation2 + $0x4b4] sm:$0xf0]  ;;  %v1070_v27 = vrot.slane %v7055_v12, 4  ;;  %v1069_v36 = vrot.slane %v7057_v13, 4  ;;  %v7106_v10 = vpop.permute.xlu2 %1230 }
 0x1a0   : > { %1125 = vst [vmem:[#allocation2 + $0x854] sm:$0xf] %v1108_v22  ;;  %3771 = vmatpush.bf16.msra.mxu3 %v5659_v37  ;;  %3823 = vmatpush.bf16.msrb.mxu2 %v5663_v38  ;;  %v5143_v22 = vor.u32 %v6000_v20, %v5140_v23  ;;  %v5879_v30 = vld [vmem:[#allocation2 + $0x124] sm:$0xf]  ;;  %v4652_v31 = vld [vmem:[#allocation2 + $0x150] sm:$0xf0] }
 0x1a1   : > { %1116 = vst [vmem:[#allocation2 + $0x1a4] sm:$0xff] %v1107_v33  ;;  %3875 = vmatpush.bf16.msra.mxu1 %v5667_v43  ;;  %1499 = vrot.lane.b32.xlu2 %v6916_v32, %s6270_s7  ;;  %v5090_v35 = vld [vmem:[#allocation2 + $0x488] sm:$0xf]  ;;  %v5988_v37 = vld [vmem:[#allocation2 + $0x48c] sm:$0xf]  ;;  %v4655_v47 = vor.u32 %v5879_v30, %v4652_v31  ;;  %v1074_v4 = vsel %vm254_vm2, %v7057_v13, %v1069_v36 }
 0x1a2   : > { %1120 = vst [vmem:[#allocation2 + $0x4f8] sm:$0xff] %v1107_v33  ;;  %v5091_v38 = vor.u32 %v5994_v1, %v5090_v35  ;;  %v5095_v21 = vor.u32 %v5988_v37, %v5092_v5  ;;  %v5976_v43 = vld [vmem:[#allocation2 + $0x42c] sm:$0xf]  ;;  %v4996_v0 = vld [vmem:[#allocation2 + $0x3f8] sm:$0xf0] }
 0x1a3   : > { %1124 = vst [vmem:[#allocation2 + $0x84c] sm:$0xff] %v1107_v33  ;;  %5801 = vmatmul.msk.bf16.vlgmr.msrb.gmra.mxu2 %vm3721_vm9, %v7073_v2  ;;  %5800 = vmatmul.msk.bf16.vlgmr.msra.gmra.mxu3 %vm3721_vm9, %v7073_v2  ;;  %v4703_v33 = vor.u32 %v5891_v29, %v4700_v53  ;;  %v5047_v56 = vor.u32 %v5976_v43, %v5044_v63  ;;  %v5964_v61 = vld [vmem:[#allocation2 + $0x3cc] sm:$0xf]  ;;  %v4948_v23 = vld [vmem:[#allocation2 + $0x398] sm:$0xf0] }
 0x1a4   : > { %3777 = vmatpush.bf16.msrb.mxu3 %v4847_v40  ;;  %3842 = vmatpush.bf16.msra.mxu2 %v5235_v45  ;;  %1152 = vst [vmem:[#allocation2 + $0x234] sm:$0xff] %v1144_v34  ;;  %v1075_v40 = vsel %vm198_vm0, %v1070_v27, %v1071_v24  ;;  %v1068_v45 = vrot.slane %v7001_v26, 4  ;;  %v5855_v19 = vld [vmem:[#allocation2 + $0x64] sm:$0xf]  ;;  %v4508_v13 = vld [vmem:[#allocation2 + $0x30] sm:$0xf0] }
 0x1a5   : > { %3894 = vmatpush.bf16.msrb.mxu1 %v5239_v46  ;;  %1153 = vst [vmem:[#allocation2 + $0x23c] sm:$0xf] %v1145_v55  ;;  %1503 = vrot.lane.b32.xlu1 %v6928_v48, %s6270_s7  ;;  %v1076_v52 = vsel %vm254_vm2, %v7055_v12, %v1075_v40  ;;  %v5843_v53 = vld [vmem:[#allocation2 + $0x4] sm:$0xf]  ;;  %v4559_v1 = vor.u32 %v5855_v19, %v4556_v41  ;;  %v5934_v27 = vld [vmem:[#allocation2 + $0x2d4] sm:$0xf0] }
 0x1a6   : > { %1156 = vst [vmem:[#allocation2 + $0x588] sm:$0xff] %v1144_v34  ;;  %v7081_v14 = vpop.permute.xlu1 %1028  ;;  %v7083_v15 = vpop.permute.xlu0 %1026  ;;  %5802 = vmatmul.msk.bf16.vlgmr.msra.gmra.mxu1 %vm3721_vm9, %v7073_v2  ;;  %v1072_v54 = vsel %vm198_vm0, %v1068_v45, %v1069_v36  ;;  %v4511_v30 = vor.u32 %v5843_v53, %v4508_v13  ;;  %v4850_v31 = vld [vmem:[#allocation2 + $0x2a8] sm:$0xf]  ;;  %v4900_v35 = vld [vmem:[#allocation2 + $0x338] sm:$0xf0] }
 0x1a7   : > { %1157 = vst [vmem:[#allocation2 + $0x590] sm:$0xf] %v1145_v55  ;;  %1501 = vrot.lane.b32.xlu0 %v6912_v18, %s6270_s7  ;;  %v1073_v12 = vsel %vm254_vm2, %v7001_v26, %v1072_v54  ;;  %v1035_v26 = vrot.slane %v7081_v14, 4  ;;  %v1034_v20 = vrot.slane %v7083_v15, 4  ;;  %v7138_v24 = vpop.permute.xlu2 %1236  ;;  %v5940_v37 = vld [vmem:[#allocation2 + $0x30c] sm:$0xf] }
 0x1a8   : > { %3778 = vmatpush.bf16.msrb.mxu3 %v4799_v59  ;;  %3843 = vmatpush.bf16.msra.mxu2 %v5187_v3  ;;  %1160 = vst [vmem:[#allocation2 + $0x8dc] sm:$0xff] %v1144_v34  ;;  %v4604_v34 = vld [vmem:[#allocation2 + $0xf0] sm:$0xf0]  ;;  %v4994_v59 = vld [vmem:[#allocation2 + $0x3c8] sm:$0xf]  ;;  %v4903_v45 = vor.u32 %v5940_v37, %v4900_v35 }
 0x1a9   : > { %3895 = vmatpush.bf16.msrb.mxu1 %v5191_v8  ;;  %1161 = vst [vmem:[#allocation2 + $0x8e4] sm:$0xf] %v1145_v55  ;;  %1467 = vrot.lane.b32.xlu2 %v6899_v60, %s6269_s6  ;;  %v5043_v55 = vor.u32 %v5982_v39, %v5042_v42  ;;  %v4946_v3 = vld [vmem:[#allocation2 + $0x368] sm:$0xf]  ;;  %v5958_v8 = vld [vmem:[#allocation2 + $0x394] sm:$0xf0]  ;;  %v4607_v28 = vor.u32 %v5867_v57, %v4604_v34 }
 0x1aa   : > { %1119 = vst [vmem:[#allocation2 + $0x1dc] sm:$0xf] %v1111_v16  ;;  %v1040_v29 = vsel %vm227_vm1, %v7081_v14, %v1035_v26  ;;  %v6120_v43 = vld [vmem:[#allocation2 + $0x8ac] sm:$0xf]  ;;  %v4802_v63 = vld [vmem:[#allocation2 + $0x248] sm:$0xf] }
 0x1ab   : > { %1123 = vst [vmem:[#allocation2 + $0x530] sm:$0xf] %v1111_v16  ;;  %v5626_v42 = vld [vmem:[#allocation2 + $0x8b0] sm:$0xf]  ;;  %v7155_v34 = vld [vmem:[%s7146_s29] sm:$0xff] }
 0x1ac   : > { %3779 = vmatpush.bf16.msrb.mxu3 %v4751_v17  ;;  %3844 = vmatpush.bf16.msra.mxu2 %v5139_v6  ;;  %1127 = vst [vmem:[#allocation2 + $0x884] sm:$0xf] %v1111_v16  ;;  %v4995_v16 = vor.u32 %v5970_v62, %v4994_v59  ;;  %v4999_v17 = vor.u32 %v5964_v61, %v4996_v0  ;;  %v1036_v62 = vrot.slane %v7048_v25, 4  ;;  %v6108_v0 = vld [vmem:[#allocation2 + $0x84c] sm:$0xf] }
 0x1ad   : > { %3896 = vmatpush.bf16.msrb.mxu1 %v5143_v22  ;;  %1118 = vst [vmem:[#allocation2 + $0x1d4] sm:$0xff] %v1110_v51  ;;  %1471 = vrot.lane.b32.xlu1 %v6912_v18, %s6269_s6  ;;  %v4947_v6 = vor.u32 %v5958_v8, %v4946_v3  ;;  %v4951_v22 = vor.u32 %v5952_v9, %v4948_v23  ;;  %v5578_v8 = vld [vmem:[#allocation2 + $0x850] sm:$0xf]  ;;  %v5886_v37 = vld [vmem:[#allocation2 + $0x154] sm:$0xf0] }
 0x1ae   : > { %1122 = vst [vmem:[#allocation2 + $0x528] sm:$0xff] %v1110_v51  ;;  %v7109_v46 = vpop.permute.xlu1 %992 }
 0x1af   : > { %1126 = vst [vmem:[#allocation2 + $0x87c] sm:$0xff] %v1110_v51  ;;  %1469 = vrot.lane.b32.xlu0 %v6916_v32, %s6269_s6  ;;  %v7115_v11 = vpop.permute.xlu0 %1032  ;;  %v6127_v14 = vld [vmem:[#allocation2 + $0x8dc] sm:$0xf0]  ;;  %v1000_v36 = vrot.slane %v7109_v46, 4  ;;  %v7170_v9 = vpop.permute.xlu2 %1200 }
 0x1b0   : > { %3780 = vmatpush.bf16.msrb.mxu3 %v4703_v33  ;;  %3845 = vmatpush.bf16.msra.mxu2 %v5091_v38  ;;  %1085 = vst [vmem:[#allocation2 + $0x17c] sm:$0xf] %v1077_v44  ;;  %v5946_v33 = vld [vmem:[#allocation2 + $0x334] sm:$0xf0]  ;;  %v5620_v38 = vld [vmem:[#allocation2 + $0x8d8] sm:$0xf0] }
 0x1b1   : > { %3897 = vmatpush.bf16.msrb.mxu1 %v5095_v21  ;;  %1089 = vst [vmem:[#allocation2 + $0x4d0] sm:$0xf] %v1077_v44  ;;  %1473 = vrot.lane.b32.xlu2 %v6928_v48, %s6269_s6  ;;  %v1001_v21 = vrot.slane %v7075_v49, 4 }
 0x1b2   : > { %1093 = vst [vmem:[#allocation2 + $0x824] sm:$0xf] %v1077_v44  ;;  %v4851_v44 = vor.u32 %v5934_v27, %v4850_v31  ;;  %v4658_v31 = vld [vmem:[#allocation2 + $0x128] sm:$0xf] }
 0x1b3   : > { %1084 = vst [vmem:[#allocation2 + $0x174] sm:$0xff] %v1076_v52 }
 0x1b4   : > { %3781 = vmatpush.bf16.msrb.mxu3 %v4655_v47  ;;  %3846 = vmatpush.bf16.msra.mxu2 %v5043_v55  ;;  %1088 = vst [vmem:[#allocation2 + $0x4c8] sm:$0xff] %v1076_v52  ;;  %v5623_v47 = vor.u32 %v6120_v43, %v5620_v38  ;;  %v1004_v55 = vsel %vm198_vm0, %v1000_v36, %v1001_v21 }
 0x1b5   : > { %3898 = vmatpush.bf16.msrb.mxu1 %v5047_v56  ;;  %1092 = vst [vmem:[#allocation2 + $0x81c] sm:$0xff] %v1076_v52  ;;  %1439 = vrot.lane.b32.xlu1 %v6916_v32, %s6268_s5  ;;  %v1038_v32 = vsel %vm198_vm0, %v1034_v20, %v1035_v26  ;;  %v5627_v52 = vor.u32 %v6127_v14, %v5626_v42  ;;  %v5922_v56 = vld [vmem:[#allocation2 + $0x274] sm:$0xf0] }
 0x1b6   : > { %1082 = vst [vmem:[#allocation2 + $0x144] sm:$0xff] %v1073_v12  ;;  %v7135_v5 = vpop.permute.xlu1 %998  ;;  %v1039_v39 = vsel %vm227_vm1, %v7083_v15, %v1038_v32  ;;  %v5572_v54 = vld [vmem:[#allocation2 + $0x878] sm:$0xf0]  ;;  %v1006_v15 = vsel %vm200_vm3, %v7075_v49, %v1001_v21  ;;  %v6115_v57 = vld [vmem:[#allocation2 + $0x87c] sm:$0xf0]  ;;  %v4803_v61 = vor.u32 %v5922_v56, %v4802_v63  ;;  %v1005_v23 = vsel %vm200_vm3, %v7109_v46, %v1004_v55 }
 0x1b7   : > { %1083 = vst [vmem:[#allocation2 + $0x14c] sm:$0xf] %v1074_v4  ;;  %1437 = vrot.lane.b32.xlu0 %v6899_v60, %s6268_s5  ;;  %v7140_v51 = vpop.permute.xlu0 %996  ;;  %v4898_v60 = vld [vmem:[#allocation2 + $0x308] sm:$0xf]  ;;  %v5575_v49 = vor.u32 %v6108_v0, %v5572_v54  ;;  %v1003_v27 = vrot.slane %v7135_v5, 4  ;;  %v4659_v21 = vor.u32 %v5886_v37, %v4658_v31 }
 0x1b8   : > { %3782 = vmatpush.bf16.msrb.mxu3 %v4607_v28  ;;  %3847 = vmatpush.bf16.msra.mxu2 %v4995_v16  ;;  %1086 = vst [vmem:[#allocation2 + $0x498] sm:$0xff] %v1073_v12  ;;  %v4899_v40 = vor.u32 %v5946_v33, %v4898_v60  ;;  %v5910_v28 = vld [vmem:[#allocation2 + $0x214] sm:$0xf0]  ;;  %v5579_v16 = vor.u32 %v6115_v57, %v5578_v8  ;;  %v7199_v60 = vld [vmem:[%s7146_s29 + $0x8] sm:$0xff]  ;;  %v7206_v38 = vpop.permute.xlu2 %1164 }
 0x1b9   : > { %3899 = vmatpush.bf16.msrb.mxu1 %v4999_v17  ;;  %1087 = vst [vmem:[#allocation2 + $0x4a0] sm:$0xf] %v1074_v4  ;;  %1441 = vrot.lane.b32.xlu2 %v6912_v18, %s6268_s5  ;;  %v1037_v18 = vrot.slane %v7115_v11, 4  ;;  %v1009_v33 = vsel %vm200_vm3, %v7135_v5, %v1003_v27  ;;  %v5874_v14 = vld [vmem:[#allocation2 + $0xf4] sm:$0xf0] }
 0x1ba   : > { %1090 = vst [vmem:[#allocation2 + $0x7ec] sm:$0xff] %v1073_v12  ;;  %v4754_v12 = vld [vmem:[#allocation2 + $0x1e8] sm:$0xf]  ;;  %v5850_v0 = vld [vmem:[#allocation2 + $0x34] sm:$0xf0] }
 0x1bb   : > { %1091 = vst [vmem:[#allocation2 + $0x7f4] sm:$0xf] %v1074_v4  ;;  %v1041_v4 = vsel %vm198_vm0, %v1036_v62, %v1037_v18  ;;  %v4755_v26 = vor.u32 %v5910_v28, %v4754_v12  ;;  %v1043_v53 = vsel %vm227_vm1, %v7115_v11, %v1037_v18  ;;  %v4610_v5 = vld [vmem:[#allocation2 + $0xc8] sm:$0xf] }
 0x1bc   : > { %3783 = vmatpush.bf16.msrb.mxu3 %v4559_v1  ;;  %3848 = vmatpush.bf16.msra.mxu2 %v4947_v6  ;;  %1049 = vst [vmem:[#allocation2 + $0xec] sm:$0xf] %v1040_v29  ;;  %v5524_v19 = vld [vmem:[#allocation2 + $0x818] sm:$0xf0]  ;;  %v1042_v46 = vsel %vm227_vm1, %v7048_v25, %v1041_v4  ;;  %v5898_v6 = vld [vmem:[#allocation2 + $0x1b4] sm:$0xf0]  ;;  %v4611_v43 = vor.u32 %v5874_v14, %v4610_v5 }
 0x1bd   : > { %3900 = vmatpush.bf16.msrb.mxu1 %v4951_v22  ;;  %1053 = vst [vmem:[#allocation2 + $0x440] sm:$0xf] %v1040_v29  ;;  %1650 = vrot.lane.b32.xlu1 %v7155_v34, %s6267_s30  ;;  %v7181_v22 = vld [vmem:[%s7146_s29 + $0x18] sm:$0xff]  ;;  %v7186_v1 = vld [vmem:[%s7146_s29 + $0x10] sm:$0xff]  ;;  %v4706_v25 = vld [vmem:[#allocation2 + $0x188] sm:$0xf] }
 0x1be   : > { %1057 = vst [vmem:[#allocation2 + $0x794] sm:$0xf] %v1040_v29  ;;  %v7161_v59 = vpop.permute.xlu1 %1234  ;;  %v1002_v29 = vrot.slane %v7140_v51, 4  ;;  %v4852_v4 = vld [vmem:[#allocation2 + $0x2d8] sm:$0xf0] }
 0x1bf   : > { %1048 = vst [vmem:[#allocation2 + $0xe4] sm:$0xff] %v1039_v39  ;;  %v7166_v3 = vpop.permute.xlu0 %1232  ;;  %1443 = vrot.lane.b32.xlu0 %v6928_v48, %s6268_s5  ;;  %v6103_v48 = vld [vmem:[#allocation2 + $0x81c] sm:$0xf0]  ;;  %v4756_v14 = vld [vmem:[#allocation2 + $0x218] sm:$0xf0] }
 0x1c0   : > { %3784 = vmatpush.bf16.msrb.mxu3 %v4511_v30  ;;  %3849 = vmatpush.bf16.msra.mxu2 %v4899_v40  ;;  %1052 = vst [vmem:[#allocation2 + $0x438] sm:$0xff] %v1039_v39  ;;  %v4707_v30 = vor.u32 %v5898_v6, %v4706_v25  ;;  %v1007_v35 = vsel %vm198_vm0, %v1002_v29, %v1003_v27  ;;  %v7231_v12 = vpop.permute.xlu2 %1407  ;;  %v4804_v25 = vld [vmem:[#allocation2 + $0x278] sm:$0xf0] }
 0x1c1   : > { %3901 = vmatpush.bf16.msrb.mxu1 %v4903_v45  ;;  %1056 = vst [vmem:[#allocation2 + $0x78c] sm:$0xff] %v1039_v39  ;;  %v6096_v17 = vld [vmem:[#allocation2 + $0x7ec] sm:$0xf]  ;;  %v5530_v41 = vld [vmem:[#allocation2 + $0x7f0] sm:$0xf]  ;;  %1652 = vrot.lane.b32.xlu2 %v7199_v60, %s6267_s30  ;;  %v1008_v36 = vsel %vm200_vm3, %v7140_v51, %v1007_v35  ;;  %v1241_v39 = vrot.slane %v7138_v24, 4 }
 0x1c2   : > { %1015 = vst [vmem:[#allocation2 + $0x8c] sm:$0xf] %v1006_v15  ;;  %v5527_v20 = vor.u32 %v6096_v17, %v5524_v19  ;;  %v5531_v13 = vor.u32 %v6103_v48, %v5530_v41  ;;  %v1239_v45 = vrot.slane %v7166_v3, 4  ;;  %v4562_v51 = vld [vmem:[#allocation2 + $0x68] sm:$0xf] }
 0x1c3   : > { %3785 = vmatmul.bf16.vlgmr.msrb.gmra.mxu3 %v6780_v7  ;;  %1019 = vst [vmem:[#allocation2 + $0x3e0] sm:$0xf] %v1006_v15  ;;  %3850 = vmatmul.bf16.vlgmr.msra.gmra.mxu2 %v6938_v58  ;;  %v1247_v42 = vsel %vm389_vm7, %v7138_v24, %v1241_v39  ;;  %v5380_v19 = vld [vmem:[#allocation2 + $0x6f8] sm:$0xf0]  ;;  %v5386_v41 = vld [vmem:[#allocation2 + $0x6d0] sm:$0xf] }
 0x1c4   : > { %3829 = vmatpush.bf16.msra.mxu3 %v4851_v44  ;;  %3907 = vmatpush.bf16.msrb.mxu2 %v5623_v47  ;;  %1023 = vst [vmem:[#allocation2 + $0x734] sm:$0xf] %v1006_v15  ;;  %v1240_v44 = vrot.slane %v7161_v59, 4  ;;  %v5862_v47 = vld [vmem:[#allocation2 + $0x94] sm:$0xf0]  ;;  %v1238_v15 = vrot.slane %v7106_v10, 4 }
 0x1c5   : > { %3959 = vmatpush.bf16.msra.mxu1 %v5627_v52  ;;  %1014 = vst [vmem:[#allocation2 + $0x84] sm:$0xff] %v1005_v23  ;;  %1656 = vrot.lane.b32.xlu1 %v7181_v22, %s6267_s30  ;;  %v4563_v8 = vor.u32 %v5862_v47, %v4562_v51  ;;  %v6067_v48 = vld [vmem:[#allocation2 + $0x6fc] sm:$0xf0]  ;;  %v5916_v35 = vld [vmem:[#allocation2 + $0x24c] sm:$0xf] }
 0x1c6   : > { %3902 = vmatmul.bf16.vlgmr.msrb.gmra.mxu1 %v6938_v58  ;;  %1018 = vst [vmem:[#allocation2 + $0x3d8] sm:$0xff] %v1005_v23  ;;  %v7190_v32 = vpop.permute.xlu1 %1198  ;;  %v1245_v54 = vsel %vm198_vm0, %v1240_v44, %v1241_v39  ;;  %v5332_v5 = vld [vmem:[#allocation2 + $0x698] sm:$0xf0]  ;;  %v5892_v51 = vld [vmem:[#allocation2 + $0x18c] sm:$0xf] }
 0x1c7   : > { %1022 = vst [vmem:[#allocation2 + $0x72c] sm:$0xff] %v1005_v23  ;;  %v7194_v11 = vpop.permute.xlu0 %1196  ;;  %1654 = vrot.lane.b32.xlu0 %v7186_v1, %s6267_s30  ;;  %v1246_v24 = vsel %vm389_vm7, %v7161_v59, %v1245_v54  ;;  %v5928_v23 = vld [vmem:[#allocation2 + $0x2ac] sm:$0xf] }
 0x1c8   : > { %3830 = vmatpush.bf16.msra.mxu3 %v4803_v61  ;;  %3908 = vmatpush.bf16.msrb.mxu2 %v5575_v49  ;;  %1050 = vst [vmem:[#allocation2 + $0x114] sm:$0xff] %v1042_v46  ;;  %v6084_v52 = vld [vmem:[#allocation2 + $0x78c] sm:$0xf]  ;;  %v5482_v18 = vld [vmem:[#allocation2 + $0x790] sm:$0xf]  ;;  %v1242_v49 = vsel %vm198_vm0, %v1238_v15, %v1239_v45 }
 0x1c9   : > { %3960 = vmatpush.bf16.msra.mxu1 %v5579_v16  ;;  %1051 = vst [vmem:[#allocation2 + $0x11c] sm:$0xf] %v1043_v53  ;;  %1624 = vrot.lane.b32.xlu2 %v7155_v34, %s6266_s27  ;;  %v4514_v61 = vld [vmem:[#allocation2 + $0x8] sm:$0xf]  ;;  %v1243_v17 = vsel %vm389_vm7, %v7106_v10, %v1242_v49  ;;  %v6060_v59 = vld [vmem:[#allocation2 + $0x6cc] sm:$0xf] }
 0x1ca   : > { %1054 = vst [vmem:[#allocation2 + $0x468] sm:$0xff] %v1042_v46  ;;  %v4515_v28 = vor.u32 %v5850_v0, %v4514_v61  ;;  %v5383_v31 = vor.u32 %v6060_v59, %v5380_v19  ;;  %v7249_v37 = vpop.permute.xlu2 %1413  ;;  %v6036_v61 = vld [vmem:[#allocation2 + $0x60c] sm:$0xf]  ;;  %v5284_v0 = vld [vmem:[#allocation2 + $0x638] sm:$0xf0] }
 0x1cb   : > { %1055 = vst [vmem:[#allocation2 + $0x470] sm:$0xf] %v1043_v53 }
 0x1cc   : > { %3831 = vmatpush.bf16.msra.mxu3 %v4755_v26  ;;  %3909 = vmatpush.bf16.msrb.mxu2 %v5527_v20  ;;  %1058 = vst [vmem:[#allocation2 + $0x7bc] sm:$0xff] %v1042_v46  ;;  %v1244_v46 = vsel %vm389_vm7, %v7166_v3, %v1239_v45  ;;  %v1205_v3 = vrot.slane %v7190_v32, 4  ;;  %v5904_v45 = vld [vmem:[#allocation2 + $0x1ec] sm:$0xf] }
 0x1cd   : > { %3961 = vmatpush.bf16.msra.mxu1 %v5531_v13  ;;  %1059 = vst [vmem:[#allocation2 + $0x7c4] sm:$0xf] %v1043_v53  ;;  %1628 = vrot.lane.b32.xlu1 %v7186_v1, %s6266_s27  ;;  %v4855_v13 = vor.u32 %v5928_v23, %v4852_v4 }
 0x1ce   : > { %1017 = vst [vmem:[#allocation2 + $0xbc] sm:$0xf] %v1009_v33  ;;  %v6072_v20 = vld [vmem:[#allocation2 + $0x72c] sm:$0xf]  ;;  %v5434_v6 = vld [vmem:[#allocation2 + $0x730] sm:$0xf]  ;;  %v1210_v39 = vsel %vm362_vm8, %v7190_v32, %v1205_v3 }
 0x1cf   : > { %1021 = vst [vmem:[#allocation2 + $0x410] sm:$0xf] %v1009_v33  ;;  %v7212_v40 = vpop.permute.xlu1 %1162  ;;  %1626 = vrot.lane.b32.xlu0 %v7199_v60, %s6266_s27  ;;  %v1171_v32 = vrot.slane %v7206_v38, 4 }
 0x1d0   : > { %3832 = vmatpush.bf16.msra.mxu3 %v4707_v30  ;;  %1025 = vst [vmem:[#allocation2 + $0x764] sm:$0xf] %v1009_v33  ;;  %v7216_v63 = vpop.permute.xlu0 %1202  ;;  %v1204_v30 = vrot.slane %v7194_v11, 4  ;;  %v5387_v33 = vor.u32 %v6067_v48, %v5386_v41  ;;  %v5287_v48 = vor.u32 %v6036_v61, %v5284_v0  ;;  %v4858_v61 = vld [vmem:[#allocation2 + $0x2b0] sm:$0xf] }
 0x1d1   : > { %1016 = vst [vmem:[#allocation2 + $0xb4] sm:$0xff] %v1008_v36  ;;  %1630 = vrot.lane.b32.xlu2 %v7181_v22, %s6266_s27  ;;  %v1207_v4 = vrot.slane %v7216_v63, 4 }
 0x1d2   : > { %1020 = vst [vmem:[#allocation2 + $0x408] sm:$0xff] %v1008_v36  ;;  %v1208_v44 = vsel %vm198_vm0, %v1204_v30, %v1205_v3 }
 0x1d3   : > { %1024 = vst [vmem:[#allocation2 + $0x75c] sm:$0xff] %v1008_v36  ;;  %v5476_v55 = vld [vmem:[#allocation2 + $0x7b8] sm:$0xf0]  ;;  %v6091_v56 = vld [vmem:[#allocation2 + $0x7bc] sm:$0xf0]  ;;  %v1209_v54 = vsel %vm362_vm8, %v7194_v11, %v1208_v44  ;;  %v1176_v11 = vsel %vm335_vm6, %v7206_v38, %v1171_v32 }
 0x1d4   : > { %3833 = vmatpush.bf16.msra.mxu3 %v4659_v21  ;;  %1538 = vst [vmem:[#allocation2 + $0x6e4] sm:$0xff] %v7155_v34  ;;  %v5479_v57 = vor.u32 %v6084_v52, %v5476_v55  ;;  %v5483_v62 = vor.u32 %v6091_v56, %v5482_v18  ;;  %v4807_v21 = vor.u32 %v5916_v35, %v4804_v25  ;;  %v5338_v52 = vld [vmem:[#allocation2 + $0x670] sm:$0xf]  ;;  %v1170_v56 = vrot.slane %v7212_v40, 4  ;;  %v5868_v35 = vld [vmem:[#allocation2 + $0xcc] sm:$0xf] }
 0x1d5   : > { %1255 = vst [vmem:[#allocation2 + $0x35c] sm:$0xf] %v1247_v42  ;;  %1600 = vrot.lane.b32.xlu1 %v7199_v60, %s6265_s26  ;;  %v4759_v18 = vor.u32 %v5904_v45, %v4756_v14  ;;  %v1213_v14 = vsel %vm362_vm8, %v7216_v63, %v1207_v4  ;;  %v5856_v44 = vld [vmem:[#allocation2 + $0x6c] sm:$0xf] }
 0x1d6   : > { %1259 = vst [vmem:[#allocation2 + $0x6b0] sm:$0xf] %v1247_v42  ;;  %3910 = vmatpush.bf16.msrb.mxu2 %v5479_v57  ;;  %3962 = vmatpush.bf16.msra.mxu1 %v5483_v62  ;;  %v4708_v57 = vld [vmem:[#allocation2 + $0x1b8] sm:$0xf0]  ;;  %v1174_v41 = vsel %vm198_vm0, %v1170_v56, %v1171_v32  ;;  %v1418_v56 = vrot.slane %v7249_v37, 4 }
 0x1d7   : > { %1263 = vst [vmem:[#allocation2 + $0xa04] sm:$0xf] %v1247_v42  ;;  %v7233_v16 = vpop.permute.xlu1 %1168  ;;  %1598 = vrot.lane.b32.xlu0 %v7155_v34, %s6265_s26  ;;  %v6048_v42 = vld [vmem:[#allocation2 + $0x66c] sm:$0xf]  ;;  %v4711_v59 = vor.u32 %v5892_v51, %v4708_v57  ;;  %v1175_v3 = vsel %vm335_vm6, %v7212_v40, %v1174_v41  ;;  %v4516_v32 = vld [vmem:[#allocation2 + $0x38] sm:$0xf0] }
 0x1d8   : > { %3834 = vmatpush.bf16.msra.mxu3 %v4611_v43  ;;  %1254 = vst [vmem:[#allocation2 + $0x354] sm:$0xff] %v1246_v24  ;;  %v7239_v26 = vpop.permute.xlu0 %1166  ;;  %v6055_v43 = vld [vmem:[#allocation2 + $0x69c] sm:$0xf0]  ;;  %v5335_v15 = vor.u32 %v6048_v42, %v5332_v5  ;;  %v1173_v5 = vrot.slane %v7233_v16, 4  ;;  %v5844_v51 = vld [vmem:[#allocation2 + $0xc] sm:$0xf] }
 0x1d9   : > { %1258 = vst [vmem:[#allocation2 + $0x6a8] sm:$0xff] %v1246_v24  ;;  %1602 = vrot.lane.b32.xlu2 %v7186_v1, %s6265_s26  ;;  %v5339_v55 = vor.u32 %v6055_v43, %v5338_v52  ;;  %v1172_v43 = vrot.slane %v7239_v26, 4 }
 0x1da   : > { %1262 = vst [vmem:[#allocation2 + $0x9fc] sm:$0xff] %v1246_v24  ;;  %v5428_v10 = vld [vmem:[#allocation2 + $0x758] sm:$0xf0]  ;;  %v6079_v53 = vld [vmem:[#allocation2 + $0x75c] sm:$0xf0]  ;;  %v1179_v52 = vsel %vm335_vm6, %v7233_v16, %v1173_v5 }
 0x1db   : > { %1252 = vst [vmem:[#allocation2 + $0x324] sm:$0xff] %v1243_v17  ;;  %v5431_v27 = vor.u32 %v6072_v20, %v5428_v10  ;;  %v5435_v29 = vor.u32 %v6079_v53, %v5434_v6  ;;  %v6043_v24 = vld [vmem:[#allocation2 + $0x63c] sm:$0xf0]  ;;  %v1206_v10 = vrot.slane %v7170_v9, 4 }
 0x1dc   : > { %3835 = vmatpush.bf16.msra.mxu3 %v4563_v8  ;;  %1253 = vst [vmem:[#allocation2 + $0x32c] sm:$0xf] %v1244_v46  ;;  %v4660_v8 = vld [vmem:[#allocation2 + $0x158] sm:$0xf0] }
 0x1dd   : > { %1256 = vst [vmem:[#allocation2 + $0x678] sm:$0xff] %v1243_v17  ;;  %3911 = vmatpush.bf16.msrb.mxu2 %v5431_v27  ;;  %3963 = vmatpush.bf16.msra.mxu1 %v5435_v29  ;;  %v5880_v29 = vld [vmem:[#allocation2 + $0x12c] sm:$0xf]  ;;  %v1211_v30 = vsel %vm198_vm0, %v1206_v10, %v1207_v4 }
 0x1de   : > { %1257 = vst [vmem:[#allocation2 + $0x680] sm:$0xf] %v1244_v46  ;;  %1572 = vrot.lane.b32.xlu1 %v7155_v34, %s6264_s25  ;;  %v5772_v38 = vld [vmem:[#allocation2 + $0xa00] sm:$0xf0]  ;;  %v1212_v40 = vsel %vm362_vm8, %v7170_v9, %v1211_v30  ;;  %v4564_v9 = vld [vmem:[#allocation2 + $0x98] sm:$0xf0] }
 0x1df   : > { %1260 = vst [vmem:[#allocation2 + $0x9cc] sm:$0xff] %v1243_v17  ;;  %v7252_v36 = vpop.permute.xlu1 %1411  ;;  %1604 = vrot.lane.b32.xlu0 %v7181_v22, %s6265_s26  ;;  %v4567_v63 = vor.u32 %v5856_v44, %v4564_v9  ;;  %v6031_v44 = vld [vmem:[#allocation2 + $0x5dc] sm:$0xf0] }
 0x1e0   : > { %3836 = vmatpush.bf16.msra.mxu3 %v4515_v28  ;;  %1261 = vst [vmem:[#allocation2 + $0x9d4] sm:$0xf] %v1244_v46  ;;  %v7271_v28 = vpop.permute.xlu2 %1381  ;;  %v5290_v46 = vld [vmem:[#allocation2 + $0x610] sm:$0xf] }
 0x1e1   : > { %1541 = vst [vmem:[#allocation2 + $0x71c] sm:$0xf] %v7181_v22  ;;  %3912 = vmatpush.bf16.msrb.mxu2 %v5383_v31  ;;  %3964 = vmatpush.bf16.msra.mxu1 %v5387_v33  ;;  %v7260_v47 = vpop.permute.xlu0 %1409  ;;  %v5764_v62 = vld [vmem:[#allocation2 + $0x9f8] sm:$0xf0]  ;;  %v6163_v49 = vld [vmem:[#allocation2 + $0x9fc] sm:$0xf0]  ;;  %v5291_v53 = vor.u32 %v6043_v24, %v5290_v46  ;;  %v4663_v31 = vor.u32 %v5880_v29, %v4660_v8 }
 0x1e2   : > { %1540 = vst [vmem:[#allocation2 + $0x714] sm:$0xff] %v7186_v1  ;;  %v4612_v33 = vld [vmem:[#allocation2 + $0xf8] sm:$0xf0]  ;;  %1574 = vrot.lane.b32.xlu2 %v7199_v60, %s6264_s25 }
 0x1e3   : > { %3837 = vmatmul.bf16.vlgmr.msra.gmra.mxu3 %v6780_v7  ;;  %1219 = vst [vmem:[#allocation2 + $0x2cc] sm:$0xf] %v1210_v39 }
 0x1e4   : > { %3881 = vmatpush.bf16.msrb.mxu3 %v4855_v13  ;;  %1223 = vst [vmem:[#allocation2 + $0x620] sm:$0xf] %v1210_v39 }
 0x1e5   : > { %1227 = vst [vmem:[#allocation2 + $0x974] sm:$0xf] %v1210_v39  ;;  %3913 = vmatpush.bf16.msrb.mxu2 %v5335_v15  ;;  %3965 = vmatpush.bf16.msra.mxu1 %v5339_v55  ;;  %v4615_v39 = vor.u32 %v5868_v35, %v4612_v33  ;;  %v4519_v15 = vor.u32 %v5844_v51, %v4516_v32  ;;  %v5935_v55 = vld [vmem:[#allocation2 + $0x2dc] sm:$0xf0]  ;;  %v5936_v33 = vld [vmem:[#allocation2 + $0x2e4] sm:$0xf0] }
 0x1e6   : > { %1218 = vst [vmem:[#allocation2 + $0x2c4] sm:$0xff] %v1209_v54  ;;  %v6156_v23 = vld [vmem:[#allocation2 + $0x9cc] sm:$0xf]  ;;  %v5770_v17 = vld [vmem:[#allocation2 + $0x9d0] sm:$0xf]  ;;  %1578 = vrot.lane.b32.xlu1 %v7181_v22, %s6264_s25  ;;  %v4859_v0 = vor.u32 %v5935_v55, %v4858_v61 }
 0x1e7   : > { %1222 = vst [vmem:[#allocation2 + $0x618] sm:$0xff] %v1209_v54  ;;  %v5767_v19 = vor.u32 %v6156_v23, %v5764_v62  ;;  %v6157_v20 = vld [vmem:[#allocation2 + $0x9d4] sm:$0xf]  ;;  %v7277_v6 = vpop.permute.xlu1 %1379  ;;  %v5771_v13 = vor.u32 %v6163_v49, %v5770_v17  ;;  %1576 = vrot.lane.b32.xlu0 %v7186_v1, %s6264_s25  ;;  %v1416_v62 = vrot.slane %v7260_v47, 4  ;;  %v1415_v49 = vrot.slane %v7231_v12, 4 }
 0x1e8   : > { %3882 = vmatpush.bf16.msrb.mxu3 %v4807_v21  ;;  %1226 = vst [vmem:[#allocation2 + $0x96c] sm:$0xff] %v1209_v54  ;;  %v5775_v27 = vor.u32 %v6157_v20, %v5772_v38  ;;  %v7294_v21 = vpop.permute.xlu2 %1349  ;;  %v1417_v54 = vrot.slane %v7252_v36, 4  ;;  %v4810_v23 = vld [vmem:[#allocation2 + $0x250] sm:$0xf]  ;;  %v1386_v41 = vrot.slane %v7277_v6, 4 }
 0x1e9   : > { %1185 = vst [vmem:[#allocation2 + $0x26c] sm:$0xf] %v1176_v11  ;;  %3925 = vmatpush.bf16.msrb.mxu0 %v5767_v19  ;;  %3914 = vmatpush.bf16.msrb.mxu2 %v5287_v48  ;;  %v7282_v25 = vpop.permute.xlu0 %1377  ;;  %v1419_v19 = vsel %vm198_vm0, %v1415_v49, %v1416_v62  ;;  %v5911_v48 = vld [vmem:[#allocation2 + $0x21c] sm:$0xf0]  ;;  %v5242_v51 = vld [vmem:[#allocation2 + $0x5b0] sm:$0xf] }
 0x1ea   : > { %1189 = vst [vmem:[#allocation2 + $0x5c0] sm:$0xf] %v1176_v11  ;;  %3966 = vmatpush.bf16.msra.mxu1 %v5291_v53  ;;  %1546 = vrot.lane.b32.xlu2 %v7155_v34, %s6263_s24  ;;  %v1422_v8 = vsel %vm198_vm0, %v1417_v54, %v1418_v56  ;;  %v1420_v30 = vsel %vm308_vm4, %v7231_v12, %v1419_v19  ;;  %v4860_v12 = vld [vmem:[#allocation2 + $0x2e0] sm:$0xf0]  ;;  %v1356_v32 = vrot.slane %v7294_v21, 4 }
 0x1eb   : > { %1193 = vst [vmem:[#allocation2 + $0x914] sm:$0xf] %v1176_v11  ;;  %v5923_v11 = vld [vmem:[#allocation2 + $0x27c] sm:$0xf0]  ;;  %v1423_v10 = vsel %vm308_vm4, %v7252_v36, %v1422_v8  ;;  %v1391_v55 = vsel %vm281_vm5, %v7277_v6, %v1386_v41  ;;  %v1387_v6 = vrot.slane %v7271_v28, 4  ;;  %v5243_v19 = vor.u32 %v6031_v44, %v5242_v51 }
 0x1ec   : > { %3883 = vmatpush.bf16.msrb.mxu3 %v4759_v18  ;;  %1539 = vst [vmem:[#allocation2 + $0x6ec] sm:$0xf] %v7199_v60  ;;  %3915 = vmatmul.bf16.vlgmr.msrb.gmra.mxu2 %v7003_v50  ;;  %v1177_v18 = vsel %vm198_vm0, %v1172_v43, %v1173_v5  ;;  %v4811_v53 = vor.u32 %v5923_v11, %v4810_v23  ;;  %v4818_v23 = vld [vmem:[#allocation2 + $0x258] sm:$0xf] }
 0x1ed   : > { %3977 = vmatpush.bf16.msra.mxu2 %v5771_v13  ;;  %1184 = vst [vmem:[#allocation2 + $0x264] sm:$0xff] %v1175_v3  ;;  %3967 = vmatmul.bf16.vlgmr.msra.gmra.mxu1 %v7003_v50  ;;  %v1178_v16 = vsel %vm335_vm6, %v7239_v26, %v1177_v18  ;;  %v1424_v26 = vsel %vm308_vm4, %v7249_v37, %v1418_v56  ;;  %v1385_v37 = vrot.slane %v7282_v25, 4  ;;  %v6145_v13 = vld [vmem:[#allocation2 + $0x974] sm:$0xf] }
 0x1ee   : > { %4029 = vmatpush.bf16.msrb.mxu1 %v5775_v27  ;;  %1188 = vst [vmem:[#allocation2 + $0x5b8] sm:$0xff] %v1175_v3  ;;  %1550 = vrot.lane.b32.xlu1 %v7186_v1, %s6263_s24  ;;  %v5929_v56 = vld [vmem:[#allocation2 + $0x2b4] sm:$0xf] }
 0x1ef   : > { %1192 = vst [vmem:[#allocation2 + $0x90c] sm:$0xff] %v1175_v3  ;;  %v7302_v45 = vpop.permute.xlu1 %1347  ;;  %1548 = vrot.lane.b32.xlu0 %v7199_v60, %s6263_s24  ;;  %v6144_v17 = vld [vmem:[#allocation2 + $0x96c] sm:$0xf]  ;;  %v1389_v9 = vsel %vm198_vm0, %v1385_v37, %v1386_v41  ;;  %v4812_v41 = vld [vmem:[#allocation2 + $0x280] sm:$0xf0] }
 0x1f0   : > { %3884 = vmatpush.bf16.msrb.mxu3 %v4711_v59  ;;  %1220 = vst [vmem:[#allocation2 + $0x2f4] sm:$0xff] %v1212_v40  ;;  %v7315_v57 = vpop.permute.xlu2 %1317  ;;  %v5722_v59 = vld [vmem:[#allocation2 + $0x970] sm:$0xf] }
 0x1f1   : > { %1221 = vst [vmem:[#allocation2 + $0x2fc] sm:$0xf] %v1213_v14  ;;  %v7306_v42 = vpop.permute.xlu0 %1383 }
 0x1f2   : > { %1224 = vst [vmem:[#allocation2 + $0x648] sm:$0xff] %v1212_v40  ;;  %1552 = vrot.lane.b32.xlu2 %v7181_v22, %s6263_s24  ;;  %v6133_v35 = vld [vmem:[#allocation2 + $0x914] sm:$0xf]  ;;  %v1388_v49 = vrot.slane %v7306_v42, 4  ;;  %s6174_s24 = smul.u32 48, %s7674_s10 }
 0x1f3   : > { %1225 = vst [vmem:[#allocation2 + $0x650] sm:$0xf] %v1213_v14 }
 0x1f4   : > { %3885 = vmatpush.bf16.msrb.mxu3 %v4663_v31  ;;  %1228 = vst [vmem:[#allocation2 + $0x99c] sm:$0xff] %v1212_v40  ;;  %v1421_v31 = vsel %vm308_vm4, %v7260_v47, %v1416_v62  ;;  %v4762_v40 = vld [vmem:[#allocation2 + $0x1f0] sm:$0xf]  ;;  %v1394_v51 = vsel %vm281_vm5, %v7306_v42, %v1388_v49  ;;  %s7522_s25 = sadd.s32 %s6174_s24, %s6173_s22 }
 0x1f5   : > { %1229 = vst [vmem:[#allocation2 + $0x9a4] sm:$0xf] %v1213_v14  ;;  %v4763_v5 = vor.u32 %v5911_v48, %v4762_v40  ;;  %v4714_v47 = vld [vmem:[#allocation2 + $0x190] sm:$0xf]  ;;  %v4764_v40 = vld [vmem:[#allocation2 + $0x220] sm:$0xf0] }
 0x1f6   : > { %1187 = vst [vmem:[#allocation2 + $0x29c] sm:$0xf] %v1179_v52  ;;  %1730 = vrot.lane.b32.xlu1 %v7199_v60, %s6270_s7  ;;  %v6132_v54 = vld [vmem:[#allocation2 + $0x90c] sm:$0xf]  ;;  %s4468_s9 = sshll.u32 %s7522_s25, 3 }
 0x1f7   : > { %1191 = vst [vmem:[#allocation2 + $0x5f0] sm:$0xf] %v1179_v52  ;;  %v7322_v24 = vpop.permute.xlu1 %1353  ;;  %1728 = vrot.lane.b32.xlu0 %v7155_v34, %s6270_s7  ;;  %s7534_s27 = scalar_lea.vmem %s7662_s2, %s4468_s9 }
 0x1f8   : > { %3886 = vmatpush.bf16.msrb.mxu3 %v4615_v39  ;;  %1195 = vst [vmem:[#allocation2 + $0x944] sm:$0xf] %v1179_v52  ;;  %v7342_v36 = vpop.permute.xlu2 %1323  ;;  %v4866_v39 = vld [vmem:[#allocation2 + $0x2b8] sm:$0xf]  ;;  %v5899_v52 = vld [vmem:[#allocation2 + $0x1bc] sm:$0xf0] }
 0x1f9   : > { %1186 = vst [vmem:[#allocation2 + $0x294] sm:$0xff] %v1178_v16  ;;  %v7330_v4 = vpop.permute.xlu0 %1351 }
 0x1fa   : > { %1190 = vst [vmem:[#allocation2 + $0x5e8] sm:$0xff] %v1178_v16  ;;  %1732 = vrot.lane.b32.xlu2 %v7186_v1, %s6270_s7 }
 0x1fb   : > { %1194 = vst [vmem:[#allocation2 + $0x93c] sm:$0xff] %v1178_v16  ;;  %v5716_v46 = vld [vmem:[#allocation2 + $0x998] sm:$0xf0]  ;;  %v6151_v20 = vld [vmem:[#allocation2 + $0x99c] sm:$0xf0] }
 0x1fc   : > { %3887 = vmatpush.bf16.msrb.mxu3 %v4567_v63  ;;  %1432 = vst [vmem:[#allocation2 + $0x59c] sm:$0xf] %v1424_v26  ;;  %v5724_v38 = vld [vmem:[#allocation2 + $0x9a0] sm:$0xf0]  ;;  %v5719_v27 = vor.u32 %v6144_v17, %v5716_v46  ;;  %v5723_v29 = vor.u32 %v6151_v20, %v5722_v59  ;;  %v1355_v63 = vrot.slane %v7302_v45, 4  ;;  %v4863_v59 = vor.u32 %v5929_v56, %v4860_v12 }
 0x1fd   : > { %1436 = vst [vmem:[#allocation2 + $0x8f0] sm:$0xf] %v1424_v26  ;;  %v5727_v3 = vor.u32 %v6145_v13, %v5724_v38  ;;  %v1390_v26 = vsel %vm281_vm5, %v7282_v25, %v1389_v9  ;;  %v5924_v17 = vld [vmem:[#allocation2 + $0x284] sm:$0xf0]  ;;  %v5194_v46 = vld [vmem:[#allocation2 + $0x550] sm:$0xf]  ;;  %v1361_v25 = vsel %vm254_vm2, %v7294_v21, %v1356_v32  ;;  %v1392_v38 = vsel %vm198_vm0, %v1387_v6, %v1388_v49 }
 0x1fe   : > { %3926 = vmatpush.bf16.msrb.mxu0 %v5719_v27  ;;  %3978 = vmatpush.bf16.msra.mxu2 %v5723_v29  ;;  %1431 = vst [vmem:[#allocation2 + $0x594] sm:$0xff] %v1423_v10  ;;  %v1359_v48 = vsel %vm198_vm0, %v1355_v63, %v1356_v32  ;;  %v6019_v20 = vld [vmem:[#allocation2 + $0x57c] sm:$0xf0]  ;;  %v5917_v13 = vld [vmem:[#allocation2 + $0x254] sm:$0xf] }
 0x1ff   : > { %4030 = vmatpush.bf16.msrb.mxu1 %v5727_v3  ;;  %1435 = vst [vmem:[#allocation2 + $0x8e8] sm:$0xff] %v1423_v10  ;;  %v5676_v14 = vld [vmem:[#allocation2 + $0x940] sm:$0xf0]  ;;  %1702 = vrot.lane.b32.xlu1 %v7155_v34, %s6269_s6  ;;  %v7353_v18 = vpop.permute.xlu1 %1321  ;;  %v4715_v10 = vor.u32 %v5899_v52, %v4714_v47  ;;  %v4666_v27 = vld [vmem:[#allocation2 + $0x130] sm:$0xf]  ;;  %v5195_v21 = vor.u32 %v6019_v20, %v5194_v46 }
 0x200   : > { %3888 = vmatpush.bf16.msrb.mxu3 %v4519_v15  ;;  %1429 = vst [vmem:[#allocation2 + $0x564] sm:$0xff] %v1420_v30  ;;  %v5679_v43 = vor.u32 %v6133_v35, %v5676_v14  ;;  %v5674_v15 = vld [vmem:[#allocation2 + $0x910] sm:$0xf]  ;;  %1734 = vrot.lane.b32.xlu0 %v7181_v22, %s6270_s7  ;;  %v7368_v37 = vpop.permute.xlu2 %1291  ;;  %v5887_v29 = vld [vmem:[#allocation2 + $0x15c] sm:$0xf0]  ;;  %v1358_v35 = vrot.slane %v7322_v24, 4 }
 0x201   : > { %1430 = vst [vmem:[#allocation2 + $0x56c] sm:$0xf] %v1421_v31  ;;  %v7357_v16 = vpop.permute.xlu0 %1319  ;;  %v4770_v3 = vld [vmem:[#allocation2 + $0x1f8] sm:$0xf]  ;;  %v1357_v14 = vrot.slane %v7330_v4, 4  ;;  %v4667_v44 = vor.u32 %v5887_v29, %v4666_v27  ;;  %v1327_v42 = vrot.slane %v7353_v18, 4 }
 0x202   : > { %1433 = vst [vmem:[#allocation2 + $0x8b8] sm:$0xff] %v1420_v30  ;;  %v5668_v62 = vld [vmem:[#allocation2 + $0x938] sm:$0xf0]  ;;  %v6139_v61 = vld [vmem:[#allocation2 + $0x93c] sm:$0xf0]  ;;  %v1364_v49 = vsel %vm254_vm2, %v7322_v24, %v1358_v35  ;;  %1704 = vrot.lane.b32.xlu2 %v7199_v60, %s6269_s6 }
 0x203   : > { %3889 = vmatmul.bf16.vlgmr.msrb.gmra.mxu3 %v6780_v7  ;;  %1434 = vst [vmem:[#allocation2 + $0x8c0] sm:$0xf] %v1421_v31  ;;  %4031 = vmatpush.bf16.msrb.mxu1 %v5679_v43  ;;  %v5671_v8 = vor.u32 %v6132_v54, %v5668_v62  ;;  %v5675_v11 = vor.u32 %v6139_v61, %v5674_v15  ;;  %v5912_v30 = vld [vmem:[#allocation2 + $0x224] sm:$0xf0]  ;;  %v6007_v12 = vld [vmem:[#allocation2 + $0x51c] sm:$0xf0] }
 0x204   : > { %3933 = vmatpush.bf16.msra.mxu3 %v4859_v0  ;;  %v4867_v0 = vor.u32 %v5936_v33, %v4866_v39  ;;  %1400 = vst [vmem:[#allocation2 + $0x50c] sm:$0xf] %v1391_v55  ;;  %v1360_v31 = vsel %vm254_vm2, %v7302_v45, %v1359_v48  ;;  %v4815_v33 = vor.u32 %v5917_v13, %v4812_v41  ;;  %v5905_v9 = vld [vmem:[#allocation2 + $0x1f4] sm:$0xf]  ;;  %v4618_v32 = vld [vmem:[#allocation2 + $0xd0] sm:$0xf] }
 0x205   : > { %3927 = vmatpush.bf16.msrb.mxu0 %v5671_v8  ;;  %3979 = vmatpush.bf16.msra.mxu2 %v5675_v11  ;;  %1404 = vst [vmem:[#allocation2 + $0x860] sm:$0xf] %v1391_v55  ;;  %v1393_v45 = vsel %vm281_vm5, %v7271_v28, %v1392_v38  ;;  %v4771_v43 = vor.u32 %v5912_v30, %v4770_v3  ;;  %v5875_v28 = vld [vmem:[#allocation2 + $0xfc] sm:$0xf0]  ;;  %v5146_v47 = vld [vmem:[#allocation2 + $0x4f0] sm:$0xf] }
 0x206   : > { %1399 = vst [vmem:[#allocation2 + $0x504] sm:$0xff] %v1390_v26  ;;  %5805 = vmatmul.msk.bf16.vlgmr.msrb.gmra.mxu1 %vm3721_vm9, %v7073_v2  ;;  %v4767_v63 = vor.u32 %v5905_v9, %v4764_v40  ;;  %v5900_v52 = vld [vmem:[#allocation2 + $0x1c4] sm:$0xf0]  ;;  %v5147_v54 = vor.u32 %v6007_v12, %v5146_v47  ;;  %v4722_v15 = vld [vmem:[#allocation2 + $0x198] sm:$0xf]  ;;  %v1362_v56 = vsel %vm198_vm0, %v1357_v14, %v1358_v35  ;;  %v1328_v11 = vrot.slane %v7342_v36, 4 }
 0x207   : > { %4037 = vmatpush.bf16.msra.mxu1 %v4867_v0  ;;  %1403 = vst [vmem:[#allocation2 + $0x858] sm:$0xff] %v1390_v26  ;;  %v7379_v39 = vpop.permute.xlu1 %1289  ;;  %1708 = vrot.lane.b32.xlu1 %v7181_v22, %s6269_s6  ;;  %v5893_v55 = vld [vmem:[#allocation2 + $0x194] sm:$0xf]  ;;  %v4570_v62 = vld [vmem:[#allocation2 + $0x70] sm:$0xf]  ;;  %v4619_v8 = vor.u32 %v5875_v28, %v4618_v32  ;;  %v1363_v24 = vsel %vm254_vm2, %v7330_v4, %v1362_v56 }
 0x208   : > { %3934 = vmatpush.bf16.msra.mxu3 %v4811_v53  ;;  %v4819_v53 = vor.u32 %v5924_v17, %v4818_v23  ;;  %1370 = vst [vmem:[#allocation2 + $0x4ac] sm:$0xf] %v1361_v25  ;;  %5803 = vmatmul.msk.bf16.vlgmr.msrb.gmra.mxu0 %vm3721_vm9, %v7073_v2  ;;  %v5863_v61 = vld [vmem:[#allocation2 + $0x9c] sm:$0xf0]  ;;  %v7400_v26 = vpop.permute.xlu2 %1499  ;;  %v4723_v23 = vor.u32 %v5900_v52, %v4722_v15  ;;  %v5098_v17 = vld [vmem:[#allocation2 + $0x490] sm:$0xf] }
 0x209   : > { %3985 = vmatpush.bf16.msrb.mxu2 %v4863_v59  ;;  %3946 = vmatpush.bf16.msra.mxu0 %v5243_v19  ;;  %1374 = vst [vmem:[#allocation2 + $0x800] sm:$0xf] %v1361_v25  ;;  %v5995_v0 = vld [vmem:[#allocation2 + $0x4bc] sm:$0xf0]  ;;  %v4716_v6 = vld [vmem:[#allocation2 + $0x1c0] sm:$0xf0]  ;;  %v1334_v30 = vsel %vm227_vm1, %v7342_v36, %v1328_v11 }
 0x20a   : > { %5804 = vmatmul.msk.bf16.vlgmr.msra.gmra.mxu2 %vm3721_vm9, %v7073_v2  ;;  %1369 = vst [vmem:[#allocation2 + $0x4a4] sm:$0xff] %v1360_v31  ;;  %1706 = vrot.lane.b32.xlu0 %v7186_v1, %s6269_s6  ;;  %v1326_v59 = vrot.slane %v7357_v16, 4  ;;  %v1325_v19 = vrot.slane %v7315_v57, 4  ;;  %v4674_v41 = vld [vmem:[#allocation2 + $0x138] sm:$0xf]  ;;  %v5099_v20 = vor.u32 %v5995_v0, %v5098_v17  ;;  %v4719_v25 = vor.u32 %v5893_v55, %v4716_v6 }
 0x20b   : > { %4038 = vmatpush.bf16.msra.mxu1 %v4819_v53  ;;  %1373 = vst [vmem:[#allocation2 + $0x7f8] sm:$0xff] %v1360_v31  ;;  %v5888_v48 = vld [vmem:[#allocation2 + $0x164] sm:$0xf0]  ;;  %v4668_v46 = vld [vmem:[#allocation2 + $0x160] sm:$0xf0]  ;;  %v4571_v31 = vor.u32 %v5863_v61, %v4570_v62  ;;  %v1296_v9 = vrot.slane %v7379_v39, 4  ;;  %1676 = vrot.lane.b32.xlu2 %v7155_v34, %s6268_s5 }
 0x20c   : > { %3935 = vmatpush.bf16.msra.mxu3 %v4763_v5  ;;  %v7387_v5 = vpop.permute.xlu0 %1287  ;;  %1401 = vst [vmem:[#allocation2 + $0x534] sm:$0xff] %v1393_v45  ;;  %v4522_v53 = vld [vmem:[#allocation2 + $0x10] sm:$0xf]  ;;  %v5851_v13 = vld [vmem:[#allocation2 + $0x3c] sm:$0xf0]  ;;  %v1329_v35 = vsel %vm198_vm0, %v1325_v19, %v1326_v59  ;;  %v1331_v56 = vsel %vm227_vm1, %v7357_v16, %v1326_v59  ;;  %v1506_v59 = vrot.slane %v7400_v26, 4 }
 0x20d   : > { %3947 = vmatpush.bf16.msra.mxu0 %v5195_v21  ;;  %3986 = vmatpush.bf16.msrb.mxu2 %v4815_v33  ;;  %1402 = vst [vmem:[#allocation2 + $0x53c] sm:$0xf] %v1394_v51  ;;  %v5881_v27 = vld [vmem:[#allocation2 + $0x134] sm:$0xf]  ;;  %v5050_v29 = vld [vmem:[#allocation2 + $0x430] sm:$0xf]  ;;  %v4675_v21 = vor.u32 %v5888_v48, %v4674_v41  ;;  %v1301_v16 = vsel %vm200_vm3, %v7379_v39, %v1296_v9 }
 0x20e   : > { %1405 = vst [vmem:[#allocation2 + $0x888] sm:$0xff] %v1393_v45  ;;  %v5983_v3 = vld [vmem:[#allocation2 + $0x45c] sm:$0xf0]  ;;  %v4626_v33 = vld [vmem:[#allocation2 + $0xd8] sm:$0xf]  ;;  %v4523_v45 = vor.u32 %v5851_v13, %v4522_v53 }
 0x20f   : > { %4039 = vmatpush.bf16.msra.mxu1 %v4771_v43  ;;  %1406 = vst [vmem:[#allocation2 + $0x890] sm:$0xf] %v1394_v51  ;;  %v7407_v38 = vpop.permute.xlu1 %1497  ;;  %1680 = vrot.lane.b32.xlu1 %v7186_v1, %s6268_s5  ;;  %v4620_v40 = vld [vmem:[#allocation2 + $0x100] sm:$0xf0]  ;;  %v5876_v14 = vld [vmem:[#allocation2 + $0x104] sm:$0xf0]  ;;  %v4671_v1 = vor.u32 %v5881_v27, %v4668_v46 }
 0x210   : > { %3936 = vmatpush.bf16.msra.mxu3 %v4715_v10  ;;  %1372 = vst [vmem:[#allocation2 + $0x4dc] sm:$0xf] %v1364_v49  ;;  %v1332_v10 = vsel %vm198_vm0, %v1327_v42, %v1328_v11  ;;  %v6025_v12 = vld [vmem:[#allocation2 + $0x5b4] sm:$0xf]  ;;  %v1295_v51 = vrot.slane %v7387_v5, 4  ;;  %v7426_v47 = vpop.permute.xlu2 %1467  ;;  %v4627_v52 = vor.u32 %v5876_v14, %v4626_v33 }
 0x211   : > { %3987 = vmatpush.bf16.msrb.mxu2 %v4767_v63  ;;  %3948 = vmatpush.bf16.msra.mxu0 %v5147_v54  ;;  %1376 = vst [vmem:[#allocation2 + $0x830] sm:$0xf] %v1364_v49  ;;  %v1333_v36 = vsel %vm227_vm1, %v7353_v18, %v1332_v10  ;;  %v5869_v43 = vld [vmem:[#allocation2 + $0xd4] sm:$0xf]  ;;  %v5971_v28 = vld [vmem:[#allocation2 + $0x3fc] sm:$0xf0]  ;;  %v1330_v18 = vsel %vm227_vm1, %v7315_v57, %v1329_v35 }
 0x212   : > { %1371 = vst [vmem:[#allocation2 + $0x4d4] sm:$0xff] %v1363_v24  ;;  %1678 = vrot.lane.b32.xlu0 %v7199_v60, %s6268_s5  ;;  %v6013_v32 = vld [vmem:[#allocation2 + $0x554] sm:$0xf]  ;;  %v5244_v63 = vld [vmem:[#allocation2 + $0x5e0] sm:$0xf0]  ;;  %v4623_v61 = vor.u32 %v5869_v43, %v4620_v40  ;;  %v1299_v11 = vsel %vm198_vm0, %v1295_v51, %v1296_v9  ;;  %v1511_v35 = vsel %vm389_vm7, %v7400_v26, %v1506_v59 }
 0x213   : > { %4040 = vmatpush.bf16.msra.mxu1 %v4723_v23  ;;  %1375 = vst [vmem:[#allocation2 + $0x828] sm:$0xff] %v1363_v24  ;;  %v5002_v54 = vld [vmem:[#allocation2 + $0x3d0] sm:$0xf]  ;;  %v5864_v15 = vld [vmem:[#allocation2 + $0xa4] sm:$0xf0]  ;;  %v5247_v62 = vor.u32 %v6025_v12, %v5244_v63  ;;  %v1505_v23 = vrot.slane %v7407_v38, 4  ;;  %v1300_v27 = vsel %vm200_vm3, %v7387_v5, %v1299_v11  ;;  %1682 = vrot.lane.b32.xlu2 %v7181_v22, %s6268_s5 }
 0x214   : > { %3937 = vmatpush.bf16.msra.mxu3 %v4667_v44  ;;  %v7413_v4 = vpop.permute.xlu0 %1293  ;;  %v5051_v44 = vor.u32 %v5983_v3, %v5050_v29  ;;  %1342 = vst [vmem:[#allocation2 + $0x47c] sm:$0xf] %v1334_v30  ;;  %v5857_v55 = vld [vmem:[#allocation2 + $0x74] sm:$0xf]  ;;  %v5196_v60 = vld [vmem:[#allocation2 + $0x580] sm:$0xf0]  ;;  %v5003_v57 = vor.u32 %v5971_v28, %v5002_v54 }
 0x215   : > { %3949 = vmatpush.bf16.msra.mxu0 %v5099_v20  ;;  %3988 = vmatpush.bf16.msrb.mxu2 %v4719_v25  ;;  %1346 = vst [vmem:[#allocation2 + $0x7d0] sm:$0xf] %v1334_v30  ;;  %v4954_v42 = vld [vmem:[#allocation2 + $0x370] sm:$0xf]  ;;  %v5959_v0 = vld [vmem:[#allocation2 + $0x39c] sm:$0xf0]  ;;  %v5199_v6 = vor.u32 %v6013_v32, %v5196_v60 }
 0x216   : > { %1341 = vst [vmem:[#allocation2 + $0x474] sm:$0xff] %v1333_v36  ;;  %v4578_v49 = vld [vmem:[#allocation2 + $0x78] sm:$0xf]  ;;  %v5852_v17 = vld [vmem:[#allocation2 + $0x44] sm:$0xf0]  ;;  %v4955_v24 = vor.u32 %v5959_v0, %v4954_v42  ;;  %v1298_v25 = vrot.slane %v7413_v4, 4 }
 0x217   : > { %4041 = vmatpush.bf16.msra.mxu1 %v4675_v21  ;;  %1345 = vst [vmem:[#allocation2 + $0x7c8] sm:$0xff] %v1333_v36  ;;  %v7435_v19 = vpop.permute.xlu1 %1503  ;;  %v4579_v48 = vor.u32 %v5864_v15, %v4578_v49  ;;  %v4572_v46 = vld [vmem:[#allocation2 + $0xa0] sm:$0xf0]  ;;  %v5947_v53 = vld [vmem:[#allocation2 + $0x33c] sm:$0xf0]  ;;  %v1509_v21 = vsel %vm198_vm0, %v1505_v23, %v1506_v59 }
 0x218   : > { %3938 = vmatpush.bf16.msra.mxu3 %v4619_v8  ;;  %1339 = vst [vmem:[#allocation2 + $0x444] sm:$0xff] %v1330_v18  ;;  %v4530_v8 = vld [vmem:[#allocation2 + $0x18] sm:$0xf]  ;;  %v5148_v20 = vld [vmem:[#allocation2 + $0x520] sm:$0xf0]  ;;  %v4575_v10 = vor.u32 %v5857_v55, %v4572_v46  ;;  %v7449_v5 = vpop.permute.xlu2 %1473  ;;  %v1510_v26 = vsel %vm389_vm7, %v7407_v38, %v1509_v21  ;;  %v1508_v28 = vrot.slane %v7435_v19, 4 }
 0x219   : > { %3989 = vmatpush.bf16.msrb.mxu2 %v4671_v1  ;;  %3950 = vmatpush.bf16.msra.mxu0 %v5051_v44  ;;  %1340 = vst [vmem:[#allocation2 + $0x44c] sm:$0xf] %v1331_v56  ;;  %v5845_v39 = vld [vmem:[#allocation2 + $0x14] sm:$0xf]  ;;  %v4524_v13 = vld [vmem:[#allocation2 + $0x40] sm:$0xf0]  ;;  %v4531_v3 = vor.u32 %v5852_v17, %v4530_v8 }
 0x21a   : > { %1343 = vst [vmem:[#allocation2 + $0x798] sm:$0xff] %v1330_v18  ;;  %v6001_v29 = vld [vmem:[#allocation2 + $0x4f4] sm:$0xf]  ;;  %v5252_v30 = vld [vmem:[#allocation2 + $0x5e8] sm:$0xf0]  ;;  %v4527_v36 = vor.u32 %v5845_v39, %v4524_v13  ;;  %v1514_v59 = vsel %vm389_vm7, %v7435_v19, %v1508_v28  ;;  %v1478_v46 = vrot.slane %v7449_v5, 4 }
 0x21b   : > { %4042 = vmatpush.bf16.msra.mxu1 %v4627_v52  ;;  %1344 = vst [vmem:[#allocation2 + $0x7a0] sm:$0xf] %v1331_v56  ;;  %v4906_v33 = vld [vmem:[#allocation2 + $0x310] sm:$0xf]  ;;  %v5628_v40 = vld [vmem:[#allocation2 + $0x8e0] sm:$0xf0]  ;;  %v5151_v1 = vor.u32 %v6001_v29, %v5148_v20 }
 0x21c   : > { %3939 = vmatpush.bf16.msra.mxu3 %v4571_v31  ;;  %v7437_v41 = vpop.permute.xlu0 %1501  ;;  %v1297_v31 = vrot.slane %v7368_v37, 4  ;;  %1310 = vst [vmem:[#allocation2 + $0x3ec] sm:$0xf] %v1301_v16  ;;  %v5100_v14 = vld [vmem:[#allocation2 + $0x4c0] sm:$0xf0]  ;;  %v4907_v34 = vor.u32 %v5947_v53, %v4906_v33  ;;  %v1475_v21 = vrot.slane %v7426_v47, 4 }
 0x21d   : > { %3951 = vmatpush.bf16.msra.mxu0 %v5003_v57  ;;  %3990 = vmatpush.bf16.msrb.mxu2 %v4623_v61  ;;  %1314 = vst [vmem:[#allocation2 + $0x740] sm:$0xf] %v1301_v16  ;;  %v6032_v12 = vld [vmem:[#allocation2 + $0x5e4] sm:$0xf0]  ;;  %v6121_v9 = vld [vmem:[#allocation2 + $0x8b4] sm:$0xf]  ;;  %v1304_v61 = vsel %vm200_vm3, %v7413_v4, %v1298_v25 }
 0x21e   : > { %1309 = vst [vmem:[#allocation2 + $0x3e4] sm:$0xff] %v1300_v27  ;;  %v1302_v44 = vsel %vm198_vm0, %v1297_v31, %v1298_v25  ;;  %v5204_v51 = vld [vmem:[#allocation2 + $0x588] sm:$0xf0]  ;;  %v5250_v32 = vld [vmem:[#allocation2 + $0x5b8] sm:$0xf]  ;;  %v1507_v18 = vrot.slane %v7437_v41, 4  ;;  %v5631_v63 = vor.u32 %v6121_v9, %v5628_v40 }
 0x21f   : > { %4043 = vmatpush.bf16.msra.mxu1 %v4579_v48  ;;  %1313 = vst [vmem:[#allocation2 + $0x738] sm:$0xff] %v1300_v27  ;;  %v5251_v52 = vor.u32 %v6032_v12, %v5250_v32  ;;  %v6020_v54 = vld [vmem:[#allocation2 + $0x584] sm:$0xf0]  ;;  %v1303_v15 = vsel %vm200_vm3, %v7368_v37, %v1302_v44  ;;  %v5989_v55 = vld [vmem:[#allocation2 + $0x494] sm:$0xf]  ;;  %v7458_v56 = vpop.permute.xlu1 %1471 }
 0x220   : > { %3940 = vmatpush.bf16.msra.mxu3 %v4523_v45  ;;  %v6026_v45 = vld [vmem:[#allocation2 + $0x5bc] sm:$0xf]  ;;  %1520 = vst [vmem:[#allocation2 + $0x68c] sm:$0xf] %v1511_v35  ;;  %v5580_v60 = vld [vmem:[#allocation2 + $0x880] sm:$0xf0]  ;;  %v5103_v42 = vor.u32 %v5989_v55, %v5100_v14  ;;  %v1512_v17 = vsel %vm198_vm0, %v1507_v18, %v1508_v28 }
 0x221   : > { %3991 = vmatpush.bf16.msrb.mxu2 %v4575_v10  ;;  %3952 = vmatpush.bf16.msra.mxu0 %v4955_v24  ;;  %v5255_v43 = vor.u32 %v6026_v45, %v5252_v30  ;;  %1524 = vst [vmem:[#allocation2 + $0x9e0] sm:$0xf] %v1511_v35  ;;  %v5202_v57 = vld [vmem:[#allocation2 + $0x558] sm:$0xf]  ;;  %v5977_v37 = vld [vmem:[#allocation2 + $0x434] sm:$0xf]  ;;  %v7471_v24 = vpop.permute.xlu2 %1441  ;;  %v1513_v29 = vsel %vm389_vm7, %v7437_v41, %v1512_v17 }
 0x222   : > { %1519 = vst [vmem:[#allocation2 + $0x684] sm:$0xff] %v1510_v26  ;;  %v5052_v49 = vld [vmem:[#allocation2 + $0x460] sm:$0xf0]  ;;  %v6109_v8 = vld [vmem:[#allocation2 + $0x854] sm:$0xf]  ;;  %v5203_v11 = vor.u32 %v6020_v54, %v5202_v57  ;;  %v1477_v16 = vrot.slane %v7458_v56, 4 }
 0x223   : > { %3941 = vmatmul.bf16.vlgmr.msra.gmra.mxu3 %v6780_v7  ;;  %4044 = vmatpush.bf16.msra.mxu1 %v4531_v3  ;;  %1523 = vst [vmem:[#allocation2 + $0x9d8] sm:$0xff] %v1510_v26  ;;  %v5156_v23 = vld [vmem:[#allocation2 + $0x528] sm:$0xf0]  ;;  %v5583_v4 = vor.u32 %v6109_v8, %v5580_v60  ;;  %v5004_v48 = vld [vmem:[#allocation2 + $0x400] sm:$0xf0]  ;;  %v5055_v53 = vor.u32 %v5977_v37, %v5052_v49 }
 0x224   : > { %3998 = vmatpush.bf16.msrb.mxu3 %v5247_v62  ;;  %v7460_v38 = vpop.permute.xlu0 %1469  ;;  %v6014_v62 = vld [vmem:[#allocation2 + $0x55c] sm:$0xf]  ;;  %1311 = vst [vmem:[#allocation2 + $0x414] sm:$0xff] %v1303_v15  ;;  %v6097_v20 = vld [vmem:[#allocation2 + $0x7f4] sm:$0xf]  ;;  %v1482_v22 = vsel %vm198_vm0, %v1477_v16, %v1478_v46 }
 0x225   : > { %3953 = vmatpush.bf16.msra.mxu0 %v4907_v34  ;;  %3992 = vmatpush.bf16.msrb.mxu2 %v4527_v36  ;;  %v5207_v0 = vor.u32 %v6014_v62, %v5204_v51  ;;  %1312 = vst [vmem:[#allocation2 + $0x41c] sm:$0xf] %v1304_v61  ;;  %v5154_v25 = vld [vmem:[#allocation2 + $0x4f8] sm:$0xf]  ;;  %v6008_v10 = vld [vmem:[#allocation2 + $0x524] sm:$0xf0]  ;;  %v1484_v36 = vsel %vm362_vm8, %v7449_v5, %v1478_v46 }
 0x226   : > { %4045 = vmatmul.bf16.vlgmr.msra.gmra.mxu1 %v6780_v7  ;;  %1315 = vst [vmem:[#allocation2 + $0x768] sm:$0xff] %v1303_v15  ;;  %v1476_v39 = vrot.slane %v7460_v38, 4  ;;  %v5532_v13 = vld [vmem:[#allocation2 + $0x820] sm:$0xf0]  ;;  %v5108_v27 = vld [vmem:[#allocation2 + $0x4c8] sm:$0xf0]  ;;  %v5155_v40 = vor.u32 %v6008_v10, %v5154_v25  ;;  %v1483_v26 = vsel %vm362_vm8, %v7458_v56, %v1482_v22 }
 0x227   : > { %4102 = vmatpush.bf16.msrb.mxu1 %v5255_v43  ;;  %1316 = vst [vmem:[#allocation2 + $0x770] sm:$0xf] %v1304_v61  ;;  %v5965_v3 = vld [vmem:[#allocation2 + $0x3d4] sm:$0xf]  ;;  %v5990_v30 = vld [vmem:[#allocation2 + $0x49c] sm:$0xf]  ;;  %v5535_v33 = vor.u32 %v6097_v20, %v5532_v13  ;;  %v1440_v45 = vpop.permute.xlu1 %1439 }
 0x228   : > { %3999 = vmatpush.bf16.msrb.mxu3 %v5199_v6  ;;  %v6002_v6 = vld [vmem:[#allocation2 + $0x4fc] sm:$0xf]  ;;  %3993 = vmatmul.bf16.vlgmr.msrb.gmra.mxu2 %v6780_v7  ;;  %v5996_v31 = vld [vmem:[#allocation2 + $0x4c4] sm:$0xf0]  ;;  %1522 = vst [vmem:[#allocation2 + $0x6bc] sm:$0xf] %v1514_v59  ;;  %v5007_v44 = vor.u32 %v5965_v3, %v5004_v48  ;;  %v1479_v43 = vsel %vm198_vm0, %v1475_v21, %v1476_v39 }
 0x229   : > { %4011 = vmatpush.bf16.msrb.mxu0 %v5631_v63  ;;  %4050 = vmatpush.bf16.msra.mxu2 %v5251_v52  ;;  %v5159_v19 = vor.u32 %v6002_v6, %v5156_v23  ;;  %1526 = vst [vmem:[#allocation2 + $0xa10] sm:$0xf] %v1514_v59  ;;  %v5953_v35 = vld [vmem:[#allocation2 + $0x374] sm:$0xf]  ;;  %v4956_v14 = vld [vmem:[#allocation2 + $0x3a0] sm:$0xf0]  ;;  %v5111_v9 = vor.u32 %v5990_v30, %v5108_v27  ;;  %v1653_v62 = vpop.permute.xlu2 %1652 }
 0x22a   : > { %3954 = vmatmul.bf16.vlgmr.msra.gmra.mxu0 %v6938_v58  ;;  %v5484_v12 = vld [vmem:[#allocation2 + $0x7c0] sm:$0xf0]  ;;  %1521 = vst [vmem:[#allocation2 + $0x6b4] sm:$0xff] %v1513_v29  ;;  %v6085_v51 = vld [vmem:[#allocation2 + $0x794] sm:$0xf]  ;;  %v4959_v5 = vor.u32 %v5953_v35, %v4956_v14  ;;  %v1446_v32 = vrot.slane %v1440_v45, 4  ;;  %v1480_v15 = vsel %vm362_vm8, %v7426_v47, %v1479_v43 }
 0x22b   : > { %4103 = vmatpush.bf16.msrb.mxu1 %v5207_v0  ;;  %1525 = vst [vmem:[#allocation2 + $0xa08] sm:$0xff] %v1513_v29  ;;  %v5060_v34 = vld [vmem:[#allocation2 + $0x468] sm:$0xf0]  ;;  %v5487_v18 = vor.u32 %v6085_v51, %v5484_v12  ;;  %v5978_v52 = vld [vmem:[#allocation2 + $0x43c] sm:$0xf]  ;;  %v1481_v0 = vsel %vm362_vm8, %v7460_v38, %v1476_v39  ;;  %v1659_v48 = vrot.slane %v1653_v62, 4 }
 0x22c   : > { %4000 = vmatpush.bf16.msrb.mxu3 %v5151_v1  ;;  %v7483_v41 = vpop.permute.xlu0 %1437  ;;  %v5106_v1 = vld [vmem:[#allocation2 + $0x498] sm:$0xf]  ;;  %1492 = vst [vmem:[#allocation2 + $0x65c] sm:$0xf] %v1484_v36  ;;  %v5984_v54 = vld [vmem:[#allocation2 + $0x464] sm:$0xf0]  ;;  %v5063_v57 = vor.u32 %v5978_v52, %v5060_v34  ;;  %v1451_v59 = vsel %vm335_vm6, %v1440_v45, %v1446_v32 }
 0x22d   : > { %4012 = vmatpush.bf16.msrb.mxu0 %v5583_v4  ;;  %4051 = vmatpush.bf16.msra.mxu2 %v5203_v11  ;;  %v1445_v28 = vrot.slane %v7483_v41, 4  ;;  %v5107_v63 = vor.u32 %v5996_v31, %v5106_v1  ;;  %1496 = vst [vmem:[#allocation2 + $0x9b0] sm:$0xf] %v1484_v36  ;;  %v5941_v55 = vld [vmem:[#allocation2 + $0x314] sm:$0xf]  ;;  %v1447_v22 = vrot.slane %v7471_v24, 4  ;;  %v1664_v35 = vsel %vm308_vm4, %v1653_v62, %v1659_v48 }
 0x22e   : > { %v6073_v56 = vld [vmem:[#allocation2 + $0x734] sm:$0xf]  ;;  %v5436_v60 = vld [vmem:[#allocation2 + $0x760] sm:$0xf0]  ;;  %v5058_v61 = vld [vmem:[#allocation2 + $0x438] sm:$0xf] }
 0x22f   : > { %4104 = vmatpush.bf16.msrb.mxu1 %v5159_v19  ;;  %1491 = vst [vmem:[#allocation2 + $0x654] sm:$0xff] %v1483_v26  ;;  %v5966_v37 = vld [vmem:[#allocation2 + $0x3dc] sm:$0xf]  ;;  %v4908_v49 = vld [vmem:[#allocation2 + $0x340] sm:$0xf0]  ;;  %v1449_v17 = vsel %vm198_vm0, %v1445_v28, %v1446_v32  ;;  %v5439_v16 = vor.u32 %v6073_v56, %v5436_v60  ;;  %v5059_v38 = vor.u32 %v5984_v54, %v5058_v61  ;;  %v1651_v19 = vpop.permute.xlu1 %1650 }
 0x230   : > { %4001 = vmatpush.bf16.msrb.mxu3 %v5103_v42  ;;  %v5012_v42 = vld [vmem:[#allocation2 + $0x408] sm:$0xf0]  ;;  %1495 = vst [vmem:[#allocation2 + $0x9a8] sm:$0xff] %v1483_v26  ;;  %v5634_v8 = vld [vmem:[#allocation2 + $0x8b8] sm:$0xf]  ;;  %v4911_v10 = vor.u32 %v5941_v55, %v4908_v49  ;;  %v1450_v29 = vsel %vm335_vm6, %v7483_v41, %v1449_v17  ;;  %v1658_v3 = vrot.slane %v1651_v19, 4 }
 0x231   : > { %4013 = vmatpush.bf16.msrb.mxu0 %v5535_v33  ;;  %4052 = vmatpush.bf16.msra.mxu2 %v5155_v40  ;;  %v6128_v11 = vld [vmem:[#allocation2 + $0x8e4] sm:$0xf0]  ;;  %v6061_v47 = vld [vmem:[#allocation2 + $0x6d4] sm:$0xf]  ;;  %v5388_v23 = vld [vmem:[#allocation2 + $0x700] sm:$0xf0]  ;;  %v5015_v46 = vor.u32 %v5966_v37, %v5012_v42  ;;  %v7506_v36 = vpop.permute.xlu2 %1624  ;;  %v7516_v42 = vpop.f32.mrf.mxu3 }
 0x232   : > { %1489 = vst [vmem:[#allocation2 + $0x624] sm:$0xff] %v1480_v15  ;;  %v5010_v4 = vld [vmem:[#allocation2 + $0x3d8] sm:$0xf]  ;;  %v5972_v6 = vld [vmem:[#allocation2 + $0x404] sm:$0xf0]  ;;  %v5391_v13 = vor.u32 %v6061_v47, %v5388_v23  ;;  %v1662_v14 = vsel %vm198_vm0, %v1658_v3, %v1659_v48 }
 0x233   : > { %4105 = vmatpush.bf16.msrb.mxu1 %v5111_v9  ;;  %1490 = vst [vmem:[#allocation2 + $0x62c] sm:$0xf] %v1481_v0  ;;  %v5954_v20 = vld [vmem:[#allocation2 + $0x37c] sm:$0xf]  ;;  %v4964_v25 = vld [vmem:[#allocation2 + $0x3a8] sm:$0xf0]  ;;  %v5011_v31 = vor.u32 %v5972_v6, %v5010_v4  ;;  %v1663_v12 = vsel %vm308_vm4, %v1651_v19, %v1662_v14  ;;  %v3747_v19 = vpop.f32.mrf.mxu1 }
 0x234   : > { %4002 = vmatpush.bf16.msrb.mxu3 %v5055_v53  ;;  %1493 = vst [vmem:[#allocation2 + $0x978] sm:$0xff] %v1480_v15  ;;  %v5635_v53 = vor.u32 %v6128_v11, %v5634_v8  ;;  %v6116_v39 = vld [vmem:[#allocation2 + $0x884] sm:$0xf0]  ;;  %v4962_v27 = vld [vmem:[#allocation2 + $0x378] sm:$0xf]  ;;  %v1444_v30 = vpop.permute.xlu0 %1443  ;;  %v4967_v40 = vor.u32 %v5954_v20, %v4964_v25  ;;  %v3734_v25 = vpop.f32.mrf.mxu0 }
 0x235   : > { %4014 = vmatpush.bf16.msrb.mxu0 %v5487_v18  ;;  %4053 = vmatpush.bf16.msra.mxu2 %v5107_v63  ;;  %1494 = vst [vmem:[#allocation2 + $0x980] sm:$0xf] %v1481_v0  ;;  %v5960_v21 = vld [vmem:[#allocation2 + $0x3a4] sm:$0xf0]  ;;  %v1448_v33 = vrot.slane %v1444_v30, 4 }
 0x236   : > { %1460 = vst [vmem:[#allocation2 + $0x5cc] sm:$0xf] %v1451_v59  ;;  %v5340_v45 = vld [vmem:[#allocation2 + $0x6a0] sm:$0xf0]  ;;  %v5586_v41 = vld [vmem:[#allocation2 + $0x858] sm:$0xf]  ;;  %v4963_v43 = vor.u32 %v5960_v21, %v4962_v27 }
 0x237   : > { %4106 = vmatpush.bf16.msrb.mxu1 %v5063_v57  ;;  %1464 = vst [vmem:[#allocation2 + $0x920] sm:$0xf] %v1451_v59  ;;  %v1452_v1 = vsel %vm198_vm0, %v1447_v22, %v1448_v33  ;;  %v4916_v9 = vld [vmem:[#allocation2 + $0x348] sm:$0xf0]  ;;  %v5587_v51 = vor.u32 %v6116_v39, %v5586_v41  ;;  %v5942_v34 = vld [vmem:[#allocation2 + $0x31c] sm:$0xf]  ;;  %v1454_v18 = vsel %vm335_vm6, %v1444_v30, %v1448_v33  ;;  %v1657_v61 = vpop.permute.xlu1 %1656  ;;  %v3760_v41 = vpop.f32.mrf.mxu2 }
 0x238   : > { %4003 = vmatpush.bf16.msrb.mxu3 %v5007_v44  ;;  %1459 = vst [vmem:[#allocation2 + $0x5c4] sm:$0xff] %v1450_v29  ;;  %v6049_v44 = vld [vmem:[#allocation2 + $0x674] sm:$0xf]  ;;  %v1453_v26 = vsel %vm335_vm6, %v7471_v24, %v1452_v1  ;;  %v5948_v32 = vld [vmem:[#allocation2 + $0x344] sm:$0xf0]  ;;  %v4919_v0 = vor.u32 %v5942_v34, %v4916_v9  ;;  %v1661_v8 = vrot.slane %v1657_v61, 4 }
 0x239   : > { %4015 = vmatpush.bf16.msrb.mxu0 %v5439_v16  ;;  %4054 = vmatpush.bf16.msra.mxu2 %v5059_v38  ;;  %1463 = vst [vmem:[#allocation2 + $0x918] sm:$0xff] %v1450_v29  ;;  %v6104_v28 = vld [vmem:[#allocation2 + $0x824] sm:$0xf0]  ;;  %v5343_v63 = vor.u32 %v6049_v44, %v5340_v45  ;;  %v5642_v52 = vld [vmem:[#allocation2 + $0x8c0] sm:$0xf]  ;;  %v1631_v20 = vpop.permute.xlu2 %1630 }
 0x23a   : > { %1673 = vst [vmem:[#allocation2 + $0x8cc] sm:$0xf] %v1664_v35  ;;  %v6129_v54 = vld [vmem:[#allocation2 + $0x8ec] sm:$0xf0]  ;;  %v5636_v15 = vld [vmem:[#allocation2 + $0x8e8] sm:$0xf0] }
 0x23b   : > { %4107 = vmatpush.bf16.msrb.mxu1 %v5015_v46  ;;  %v6164_v55 = vld [vmem:[#allocation2 + $0xa04] sm:$0xf0]  ;;  %1672 = vst [vmem:[#allocation2 + $0x8c4] sm:$0xff] %v1663_v12  ;;  %v6037_v62 = vld [vmem:[#allocation2 + $0x614] sm:$0xf]  ;;  %v5643_v47 = vor.u32 %v6129_v54, %v5642_v52  ;;  %v1667_v46 = vsel %vm308_vm4, %v1657_v61, %v1661_v8  ;;  %v1635_v39 = vrot.slane %v1631_v20, 4 }
 0x23c   : > { %4004 = vmatpush.bf16.msrb.mxu3 %v4959_v5  ;;  %v5292_v5 = vld [vmem:[#allocation2 + $0x640] sm:$0xf0]  ;;  %v4914_v24 = vld [vmem:[#allocation2 + $0x318] sm:$0xf]  ;;  %v6122_v56 = vld [vmem:[#allocation2 + $0x8bc] sm:$0xf]  ;;  %v1655_v11 = vpop.permute.xlu0 %1654 }
 0x23d   : > { %4016 = vmatpush.bf16.msrb.mxu0 %v5391_v13  ;;  %4055 = vmatpush.bf16.msra.mxu2 %v5011_v31  ;;  %v5538_v60 = vld [vmem:[#allocation2 + $0x7f8] sm:$0xf]  ;;  %1461 = vst [vmem:[#allocation2 + $0x5f4] sm:$0xff] %v1453_v26  ;;  %v6117_v57 = vld [vmem:[#allocation2 + $0x88c] sm:$0xf0]  ;;  %v1660_v38 = vrot.slane %v1655_v11, 4  ;;  %v5295_v4 = vor.u32 %v6037_v62, %v5292_v5  ;;  %v4915_v6 = vor.u32 %v5948_v32, %v4914_v24 }
 0x23e   : > { %v5778_v37 = vld [vmem:[#allocation2 + $0x9d8] sm:$0xf]  ;;  %v5539_v49 = vor.u32 %v6104_v28, %v5538_v60  ;;  %1462 = vst [vmem:[#allocation2 + $0x5fc] sm:$0xf] %v1454_v18  ;;  %v6092_v16 = vld [vmem:[#allocation2 + $0x7c4] sm:$0xf0]  ;;  %v3748_v31 = vadd.f32 %v3747_v19, %v3734_v25  ;;  %v1641_v35 = vsel %vm281_vm5, %v1631_v20, %v1635_v39 }
 0x23f   : > { %4108 = vmatpush.bf16.msrb.mxu1 %v4967_v40  ;;  %v5779_v23 = vor.u32 %v6164_v55, %v5778_v37  ;;  %v5490_v17 = vld [vmem:[#allocation2 + $0x798] sm:$0xf]  ;;  %1465 = vst [vmem:[#allocation2 + $0x948] sm:$0xff] %v1453_v26  ;;  %v6152_v48 = vld [vmem:[#allocation2 + $0x9a4] sm:$0xf0]  ;;  %v1629_v9 = vpop.permute.xlu1 %1628  ;;  %v3775_v26 = vpop.f32.mrf.mxu3  ;;  %v1632_v54 = vrot.slane %v7506_v36, 4 }
 0x240   : > { %4005 = vmatpush.bf16.msrb.mxu3 %v4911_v10  ;;  %v5730_v59 = vld [vmem:[#allocation2 + $0x978] sm:$0xf]  ;;  %1466 = vst [vmem:[#allocation2 + $0x950] sm:$0xf] %v1454_v18  ;;  %v5639_v10 = vor.u32 %v6122_v56, %v5636_v15  ;;  %v5594_v13 = vld [vmem:[#allocation2 + $0x860] sm:$0xf]  ;;  %v5491_v3 = vor.u32 %v6092_v16, %v5490_v17  ;;  %v3749_v16 = vpop.f32.mrf.mxu1 }
 0x241   : > { %4017 = vmatpush.bf16.msrb.mxu0 %v5343_v63  ;;  %4056 = vmatpush.bf16.msra.mxu2 %v4963_v43  ;;  %1675 = vst [vmem:[#allocation2 + $0x8fc] sm:$0xf] %v1667_v46  ;;  %v6110_v27 = vld [vmem:[#allocation2 + $0x85c] sm:$0xf]  ;;  %v5588_v29 = vld [vmem:[#allocation2 + $0x888] sm:$0xf0]  ;;  %v5595_v21 = vor.u32 %v6117_v57, %v5594_v13  ;;  %v5731_v33 = vor.u32 %v6152_v48, %v5730_v59  ;;  %v7540_v37 = vpop.permute.xlu2 %1602 }
 0x242   : > { %v6105_v22 = vld [vmem:[#allocation2 + $0x82c] sm:$0xf0]  ;;  %v6080_v40 = vld [vmem:[#allocation2 + $0x764] sm:$0xf0]  ;;  %v5546_v14 = vld [vmem:[#allocation2 + $0x800] sm:$0xf]  ;;  %v5591_v12 = vor.u32 %v6110_v27, %v5588_v29 }
 0x243   : > { %4006 = vmatmul.bf16.vlgmr.msrb.gmra.mxu3 %v6938_v58  ;;  %4109 = vmatpush.bf16.msrb.mxu1 %v4919_v0  ;;  %v5540_v45 = vld [vmem:[#allocation2 + $0x828] sm:$0xf0]  ;;  %1649 = vst [vmem:[#allocation2 + $0x89c] sm:$0xf] %v1641_v35  ;;  %v5442_v1 = vld [vmem:[#allocation2 + $0x738] sm:$0xf]  ;;  %v5547_v34 = vor.u32 %v6105_v22, %v5546_v14 }
 0x244   : > { %4063 = vmatpush.bf16.msra.mxu3 %v5635_v53  ;;  %v1665_v53 = vsel %vm198_vm0, %v1660_v38, %v1661_v8  ;;  %v5394_v44 = vld [vmem:[#allocation2 + $0x6d8] sm:$0xf]  ;;  %v6068_v43 = vld [vmem:[#allocation2 + $0x704] sm:$0xf0]  ;;  %v5443_v5 = vor.u32 %v6080_v40, %v5442_v1  ;;  %v1634_v18 = vrot.slane %v1629_v9, 4  ;;  %v1627_v63 = vpop.permute.xlu0 %1626 }
 0x245   : > { %4018 = vmatpush.bf16.msrb.mxu0 %v5295_v4  ;;  %4057 = vmatpush.bf16.msra.mxu2 %v4915_v6  ;;  %v1666_v30 = vsel %vm308_vm4, %v1655_v11, %v1665_v53  ;;  %v5682_v32 = vld [vmem:[#allocation2 + $0x918] sm:$0xf]  ;;  %v6098_v52 = vld [vmem:[#allocation2 + $0x7fc] sm:$0xf]  ;;  %v1633_v55 = vrot.slane %v1627_v63, 4  ;;  %v5395_v61 = vor.u32 %v6068_v43, %v5394_v44 }
 0x246   : > { %1674 = vst [vmem:[#allocation2 + $0x8f4] sm:$0xff] %v1666_v30  ;;  %4110 = vmatmul.bf16.vlgmr.msrb.gmra.mxu1 %v6938_v58  ;;  %v6140_v28 = vld [vmem:[#allocation2 + $0x944] sm:$0xf0]  ;;  %v4868_v62 = vld [vmem:[#allocation2 + $0x2e8] sm:$0xf0]  ;;  %v5543_v56 = vor.u32 %v6098_v52, %v5540_v45  ;;  %v1639_v0 = vsel %vm198_vm0, %v1634_v18, %v1635_v39 }
 0x247   : > { %4167 = vmatpush.bf16.msra.mxu1 %v5643_v47  ;;  %v5683_v15 = vor.u32 %v6140_v28, %v5682_v32  ;;  %v5498_v60 = vld [vmem:[#allocation2 + $0x7a0] sm:$0xf]  ;;  %v5930_v57 = vld [vmem:[#allocation2 + $0x2bc] sm:$0xf]  ;;  %v6093_v8 = vld [vmem:[#allocation2 + $0x7cc] sm:$0xf0]  ;;  %v1640_v11 = vsel %vm281_vm5, %v1629_v9, %v1639_v0  ;;  %v1636_v47 = vsel %vm198_vm0, %v1632_v54, %v1633_v55  ;;  %v1601_v13 = vpop.permute.xlu1 %1600 }
 0x248   : > { %4064 = vmatpush.bf16.msra.mxu3 %v5587_v51  ;;  %4058 = vmatmul.bf16.vlgmr.msra.gmra.mxu2 %v6938_v58  ;;  %v3761_v51 = vadd.f32 %v3760_v41, %v3748_v31  ;;  %v4820_v17 = vld [vmem:[#allocation2 + $0x288] sm:$0xf0]  ;;  %v6086_v38 = vld [vmem:[#allocation2 + $0x79c] sm:$0xf]  ;;  %1648 = vst [vmem:[#allocation2 + $0x894] sm:$0xff] %v1640_v11  ;;  %v1637_v6 = vsel %vm281_vm5, %v7506_v36, %v1636_v47 }
 0x249   : > { %4115 = vmatpush.bf16.msrb.mxu2 %v5639_v10  ;;  %4081 = vmatpush.bf16.msra.mxu0 %v5779_v23  ;;  %v1638_v23 = vsel %vm281_vm5, %v1627_v63, %v1633_v55  ;;  %v5492_v4 = vld [vmem:[#allocation2 + $0x7c8] sm:$0xf0]  ;;  %v4871_v59 = vor.u32 %v5930_v57, %v4868_v62  ;;  %v5499_v48 = vor.u32 %v6093_v8, %v5498_v60  ;;  %v5346_v46 = vld [vmem:[#allocation2 + $0x678] sm:$0xf]  ;;  %v6056_v20 = vld [vmem:[#allocation2 + $0x6a4] sm:$0xf0]  ;;  %v3762_v10 = vpop.f32.mrf.mxu2  ;;  %v1575_v44 = vpop.permute.xlu2 %1574 }
 0x24a   : > { %4019 = vmatmul.bf16.vlgmr.msrb.gmra.mxu0 %v7003_v50  ;;  %v3774_v24 = vadd.f32 %v7516_v42, %v3761_v51  ;;  %v5918_v42 = vld [vmem:[#allocation2 + $0x25c] sm:$0xf]  ;;  %1646 = vst [vmem:[#allocation2 + $0x864] sm:$0xff] %v1637_v6  ;;  %v6081_v25 = vld [vmem:[#allocation2 + $0x76c] sm:$0xf0]  ;;  %v5495_v53 = vor.u32 %v6086_v38, %v5492_v4  ;;  %v5347_v30 = vor.u32 %v6056_v20, %v5346_v46  ;;  %v1608_v38 = vrot.slane %v7540_v37, 4 }
 0x24b   : > { %4168 = vmatpush.bf16.msra.mxu1 %v5595_v21  ;;  %1647 = vst [vmem:[#allocation2 + $0x86c] sm:$0xf] %v1638_v23  ;;  %v5450_v39 = vld [vmem:[#allocation2 + $0x740] sm:$0xf]  ;;  %v5444_v19 = vld [vmem:[#allocation2 + $0x768] sm:$0xf0]  ;;  %v4823_v31 = vor.u32 %v5918_v42, %v4820_v17 }
 0x24c   : > { %4065 = vmatpush.bf16.msra.mxu3 %v5539_v49  ;;  %v3736_v49 = vpop.f32.mrf.mxu0  ;;  %4349 = vst [vmem:[%s7534_s27] sm:$0xff] %v3774_v24  ;;  %v5906_v27 = vld [vmem:[#allocation2 + $0x1fc] sm:$0xf]  ;;  %v4772_v29 = vld [vmem:[#allocation2 + $0x228] sm:$0xf0]  ;;  %v5402_v36 = vld [vmem:[#allocation2 + $0x6e0] sm:$0xf]  ;;  %v1599_v22 = vpop.permute.xlu0 %1598 }
 0x24d   : > { %4116 = vmatpush.bf16.msrb.mxu2 %v5591_v12  ;;  %4082 = vmatpush.bf16.msra.mxu0 %v5731_v33  ;;  %v1607_v21 = vrot.slane %v1601_v13, 4  ;;  %v5451_v33 = vor.u32 %v6081_v25, %v5450_v39  ;;  %v6074_v40 = vld [vmem:[#allocation2 + $0x73c] sm:$0xf]  ;;  %v6044_v35 = vld [vmem:[#allocation2 + $0x644] sm:$0xf0]  ;;  %v1606_v14 = vrot.slane %v1599_v22, 4  ;;  %v4775_v18 = vor.u32 %v5906_v27, %v4772_v29 }
 0x24e   : > { %v6062_v45 = vld [vmem:[#allocation2 + $0x6dc] sm:$0xf]  ;;  %v5396_v41 = vld [vmem:[#allocation2 + $0x708] sm:$0xf0]  ;;  %v5447_v43 = vor.u32 %v6074_v40, %v5444_v19  ;;  %v5298_v51 = vld [vmem:[#allocation2 + $0x618] sm:$0xf]  ;;  %v3786_v19 = vpop.f32.mrf.mxu3 }
 0x24f   : > { %4169 = vmatpush.bf16.msra.mxu1 %v5547_v34  ;;  %v5780_v12 = vld [vmem:[#allocation2 + $0xa08] sm:$0xf0]  ;;  %v1612_v1 = vsel %vm254_vm2, %v1601_v13, %v1607_v21  ;;  %v1610_v26 = vsel %vm198_vm0, %v1606_v14, %v1607_v21  ;;  %v1581_v34 = vrot.slane %v1575_v44, 4  ;;  %v6158_v32 = vld [vmem:[#allocation2 + $0x9dc] sm:$0xf]  ;;  %v5399_v63 = vor.u32 %v6062_v45, %v5396_v41 }
 0x250   : > { %4066 = vmatpush.bf16.msra.mxu3 %v5491_v3  ;;  %v6069_v3 = vld [vmem:[#allocation2 + $0x70c] sm:$0xf0]  ;;  %1621 = vst [vmem:[#allocation2 + $0x80c] sm:$0xf] %v1612_v1  ;;  %v1611_v28 = vsel %vm254_vm2, %v1599_v22, %v1610_v26  ;;  %v5354_v52 = vld [vmem:[#allocation2 + $0x680] sm:$0xf]  ;;  %v5783_v54 = vor.u32 %v6158_v32, %v5780_v12 }
 0x251   : > { %4117 = vmatpush.bf16.msrb.mxu2 %v5543_v56  ;;  %4083 = vmatpush.bf16.msra.mxu0 %v5683_v15  ;;  %v5403_v9 = vor.u32 %v6069_v3, %v5402_v36  ;;  %1620 = vst [vmem:[#allocation2 + $0x804] sm:$0xff] %v1611_v28  ;;  %v4724_v15 = vld [vmem:[#allocation2 + $0x1c8] sm:$0xf0]  ;;  %v1586_v55 = vsel %vm227_vm1, %v1575_v44, %v1581_v34  ;;  %v6146_v62 = vld [vmem:[#allocation2 + $0x97c] sm:$0xf] }
 0x252   : > { %v5732_v24 = vld [vmem:[#allocation2 + $0x9a8] sm:$0xf0]  ;;  %1595 = vst [vmem:[#allocation2 + $0x7ac] sm:$0xf] %v1586_v55  ;;  %v6057_v56 = vld [vmem:[#allocation2 + $0x6ac] sm:$0xf0] }
 0x253   : > { %4170 = vmatpush.bf16.msra.mxu1 %v5499_v48  ;;  %v5894_v60 = vld [vmem:[#allocation2 + $0x19c] sm:$0xf]  ;;  %v5348_v57 = vld [vmem:[#allocation2 + $0x6a8] sm:$0xf0]  ;;  %v5355_v11 = vor.u32 %v6057_v56, %v5354_v52  ;;  %v5735_v47 = vor.u32 %v6146_v62, %v5732_v24  ;;  %v6045_v16 = vld [vmem:[#allocation2 + $0x64c] sm:$0xf0]  ;;  %v7557_v48 = vpop.permute.xlu2 %1546  ;;  %v3812_v62 = vpop.f32.mrf.mxu1 }
 0x254   : > { %4067 = vmatpush.bf16.msra.mxu3 %v5443_v5  ;;  %v5299_v5 = vor.u32 %v6044_v35, %v5298_v51  ;;  %v6050_v0 = vld [vmem:[#allocation2 + $0x67c] sm:$0xf]  ;;  %v4727_v49 = vor.u32 %v5894_v60, %v4724_v15  ;;  %v1605_v23 = vpop.permute.xlu0 %1604  ;;  %v4676_v17 = vld [vmem:[#allocation2 + $0x168] sm:$0xf0]  ;;  %v5306_v20 = vld [vmem:[#allocation2 + $0x620] sm:$0xf]  ;;  %v3825_v24 = vpop.f32.mrf.mxu2 }
 0x255   : > { %4089 = vmatpush.bf16.msrb.mxu0 %v4871_v59  ;;  %4118 = vmatpush.bf16.msrb.mxu2 %v5495_v53  ;;  %v5882_v42 = vld [vmem:[#allocation2 + $0x13c] sm:$0xf]  ;;  %v5684_v4 = vld [vmem:[#allocation2 + $0x948] sm:$0xf0]  ;;  %v1609_v59 = vrot.slane %v1605_v23, 4  ;;  %v5351_v46 = vor.u32 %v6050_v0, %v5348_v57  ;;  %v3799_v0 = vpop.f32.mrf.mxu0 }
 0x256   : > { %v5937_v25 = vld [vmem:[#allocation2 + $0x2ec] sm:$0xf0]  ;;  %v5870_v53 = vld [vmem:[#allocation2 + $0xdc] sm:$0xf]  ;;  %v4628_v39 = vld [vmem:[#allocation2 + $0x108] sm:$0xf0]  ;;  %v4679_v3 = vor.u32 %v5882_v42, %v4676_v17 }
 0x257   : > { %4171 = vmatpush.bf16.msra.mxu1 %v5451_v33  ;;  %v5300_v13 = vld [vmem:[#allocation2 + $0x648] sm:$0xf0]  ;;  %v6134_v27 = vld [vmem:[#allocation2 + $0x91c] sm:$0xf]  ;;  %v1613_v29 = vsel %vm198_vm0, %v1608_v38, %v1609_v59  ;;  %v1615_v36 = vsel %vm254_vm2, %v1605_v23, %v1609_v59  ;;  %v4874_v22 = vld [vmem:[#allocation2 + $0x2c0] sm:$0xf]  ;;  %v4631_v44 = vor.u32 %v5870_v53, %v4628_v39 }
 0x258   : > { %4068 = vmatpush.bf16.msra.mxu3 %v5395_v61  ;;  %v1573_v61 = vpop.permute.xlu1 %1572  ;;  %v5687_v21 = vor.u32 %v6134_v27, %v5684_v4  ;;  %v1614_v33 = vsel %vm254_vm2, %v7540_v37, %v1613_v29  ;;  %1623 = vst [vmem:[#allocation2 + $0x83c] sm:$0xf] %v1615_v36  ;;  %v6038_v40 = vld [vmem:[#allocation2 + $0x61c] sm:$0xf]  ;;  %v4875_v35 = vor.u32 %v5937_v25, %v4874_v22  ;;  %v5786_v45 = vld [vmem:[#allocation2 + $0x9e0] sm:$0xf] }
 0x259   : > { %4090 = vmatpush.bf16.msrb.mxu0 %v4823_v31  ;;  %4119 = vmatpush.bf16.msrb.mxu2 %v5447_v43  ;;  %v1580_v8 = vrot.slane %v1573_v61, 4  ;;  %v6165_v31 = vld [vmem:[#allocation2 + $0xa0c] sm:$0xf0]  ;;  %1622 = vst [vmem:[#allocation2 + $0x834] sm:$0xff] %v1614_v33  ;;  %v5303_v14 = vor.u32 %v6038_v40, %v5300_v13  ;;  %v4826_v41 = vld [vmem:[#allocation2 + $0x260] sm:$0xf] }
 0x25a   : > { %5806 = vmatmul.msk.bf16.vlgmr.msra.gmra.mxu0 %vm3721_vm9, %v7073_v2  ;;  %v5787_v1 = vor.u32 %v6165_v31, %v5786_v45  ;;  %v5925_v51 = vld [vmem:[#allocation2 + $0x28c] sm:$0xf0]  ;;  %v4778_v26 = vld [vmem:[#allocation2 + $0x200] sm:$0xf]  ;;  %v4580_v37 = vld [vmem:[#allocation2 + $0xa8] sm:$0xf0] }
 0x25b   : > { %4172 = vmatpush.bf16.msra.mxu1 %v5403_v9  ;;  %v1584_v6 = vsel %vm198_vm0, %v1580_v8, %v1581_v34  ;;  %v5738_v9 = vld [vmem:[#allocation2 + $0x980] sm:$0xf]  ;;  %v6153_v34 = vld [vmem:[#allocation2 + $0x9ac] sm:$0xf0]  ;;  %v1553_v52 = vpop.permute.xlu2 %1552  ;;  %v4532_v15 = vld [vmem:[#allocation2 + $0x48] sm:$0xf0] }
 0x25c   : > { %4069 = vmatpush.bf16.msra.mxu3 %v5347_v30  ;;  %v1585_v10 = vsel %vm227_vm1, %v1573_v61, %v1584_v6  ;;  %v5307_v30 = vor.u32 %v6045_v16, %v5306_v20  ;;  %v1577_v28 = vpop.permute.xlu0 %1576  ;;  %v1557_v55 = vrot.slane %v1553_v52, 4  ;;  %v5739_v56 = vor.u32 %v6153_v34, %v5738_v9  ;;  %v3788_v61 = vpop.f32.mrf.mxu3  ;;  %v6141_v57 = vld [vmem:[#allocation2 + $0x94c] sm:$0xf0]  ;;  %v4876_v23 = vld [vmem:[#allocation2 + $0x2f0] sm:$0xf0] }
 0x25d   : > { %4091 = vmatpush.bf16.msrb.mxu0 %v4775_v18  ;;  %4120 = vmatpush.bf16.msrb.mxu2 %v5399_v63  ;;  %1594 = vst [vmem:[#allocation2 + $0x7a4] sm:$0xff] %v1585_v10  ;;  %v5858_v18 = vld [vmem:[#allocation2 + $0x7c] sm:$0xf]  ;;  %v6033_v38 = vld [vmem:[#allocation2 + $0x5ec] sm:$0xf0] }
 0x25e   : > { %v5846_v63 = vld [vmem:[#allocation2 + $0x1c] sm:$0xf]  ;;  %v4583_v60 = vor.u32 %v5858_v18, %v4580_v37  ;;  %v5690_v4 = vld [vmem:[#allocation2 + $0x920] sm:$0xf]  ;;  %v5901_v6 = vld [vmem:[#allocation2 + $0x1cc] sm:$0xf0] }
 0x25f   : > { %4173 = vmatpush.bf16.msra.mxu1 %v5355_v11  ;;  %v1563_v11 = vsel %vm200_vm3, %v1553_v52, %v1557_v55  ;;  %v4535_v16 = vor.u32 %v5846_v63, %v4532_v15  ;;  %v5691_v20 = vor.u32 %v6141_v57, %v5690_v4  ;;  %v5931_v25 = vld [vmem:[#allocation2 + $0x2c4] sm:$0xf]  ;;  %v5258_v10 = vld [vmem:[#allocation2 + $0x5c0] sm:$0xf]  ;;  %v4828_v29 = vld [vmem:[#allocation2 + $0x290] sm:$0xf0] }
 0x260   : > { %4070 = vmatpush.bf16.msra.mxu3 %v5299_v5  ;;  %v1579_v12 = vpop.permute.xlu1 %1578  ;;  %v4827_v5 = vor.u32 %v5925_v51, %v4826_v41  ;;  %1571 = vst [vmem:[#allocation2 + $0x77c] sm:$0xf] %v1563_v11  ;;  %v4879_v39 = vor.u32 %v5931_v25, %v4876_v23  ;;  %v5259_v13 = vor.u32 %v6033_v38, %v5258_v10  ;;  %v6021_v31 = vld [vmem:[#allocation2 + $0x58c] sm:$0xf0]  ;;  %v5919_v45 = vld [vmem:[#allocation2 + $0x264] sm:$0xf] }
 0x261   : > { %4092 = vmatpush.bf16.msrb.mxu0 %v4727_v49  ;;  %4121 = vmatpush.bf16.msrb.mxu2 %v5351_v46  ;;  %v1583_v43 = vrot.slane %v1579_v12, 4  ;;  %v5913_v49 = vld [vmem:[#allocation2 + $0x22c] sm:$0xf0]  ;;  %v5210_v41 = vld [vmem:[#allocation2 + $0x560] sm:$0xf] }
 0x262   : > { %v4779_v42 = vor.u32 %v5913_v49, %v4778_v26  ;;  %v5889_v22 = vld [vmem:[#allocation2 + $0x16c] sm:$0xf0]  ;;  %v5211_v26 = vor.u32 %v6021_v31, %v5210_v41  ;;  %v4780_v37 = vld [vmem:[#allocation2 + $0x230] sm:$0xf0]  ;;  %v5907_v63 = vld [vmem:[#allocation2 + $0x204] sm:$0xf] }
 0x263   : > { %4071 = vmatmul.bf16.vlgmr.msra.gmra.mxu3 %v7003_v50  ;;  %4174 = vmatpush.bf16.msra.mxu1 %v5307_v30  ;;  %v1589_v32 = vsel %vm227_vm1, %v1579_v12, %v1583_v43  ;;  %v3827_v12 = vpop.f32.mrf.mxu2  ;;  %v5162_v52 = vld [vmem:[#allocation2 + $0x500] sm:$0xf]  ;;  %v4783_v15 = vor.u32 %v5907_v63, %v4780_v37  ;;  %v5997_v11 = vld [vmem:[#allocation2 + $0x4cc] sm:$0xf0]  ;;  %v5871_v31 = vld [vmem:[#allocation2 + $0xe4] sm:$0xf] }
 0x264   : > { %4133 = vmatpush.bf16.msrb.mxu3 %v5783_v54  ;;  %1597 = vst [vmem:[#allocation2 + $0x7dc] sm:$0xf] %v1589_v32  ;;  %v1582_v54 = vrot.slane %v1577_v28, 4  ;;  %v1549_v30 = vpop.permute.xlu0 %1548  ;;  %v6009_v32 = vld [vmem:[#allocation2 + $0x52c] sm:$0xf0] }
 0x265   : > { %4093 = vmatpush.bf16.msrb.mxu0 %v4679_v3  ;;  %4122 = vmatpush.bf16.msrb.mxu2 %v5303_v14  ;;  %v1555_v40 = vrot.slane %v1549_v30, 4  ;;  %v3814_v14 = vpop.f32.mrf.mxu1  ;;  %v5985_v25 = vld [vmem:[#allocation2 + $0x46c] sm:$0xf0] }
 0x266   : > { %4175 = vmatmul.bf16.vlgmr.msra.gmra.mxu1 %v7003_v50  ;;  %v1587_v8 = vsel %vm198_vm0, %v1582_v54, %v1583_v43  ;;  %v4682_v43 = vld [vmem:[#allocation2 + $0x140] sm:$0xf] }
 0x267   : > { %v1588_v17 = vsel %vm227_vm1, %v1577_v28, %v1587_v8  ;;  %v1560_v51 = vsel %vm200_vm3, %v1549_v30, %v1555_v40  ;;  %v4683_v34 = vor.u32 %v5889_v22, %v4682_v43  ;;  %v4634_v28 = vld [vmem:[#allocation2 + $0xe0] sm:$0xf]  ;;  %v5895_v8 = vld [vmem:[#allocation2 + $0x1a4] sm:$0xf] }
 0x268   : > { %4134 = vmatpush.bf16.msrb.mxu3 %v5735_v47  ;;  %4123 = vmatmul.bf16.vlgmr.msrb.gmra.mxu2 %v7003_v50  ;;  %v3800_v47 = vadd.f32 %v3799_v0, %v3786_v19  ;;  %1596 = vst [vmem:[#allocation2 + $0x7d4] sm:$0xff] %v1588_v17  ;;  %v1551_v59 = vpop.permute.xlu1 %1550  ;;  %v4730_v19 = vld [vmem:[#allocation2 + $0x1a0] sm:$0xf]  ;;  %v5865_v0 = vld [vmem:[#allocation2 + $0xac] sm:$0xf0] }
 0x269   : > { %4185 = vmatpush.bf16.msra.mxu2 %v5787_v1  ;;  %4094 = vmatpush.bf16.msrb.mxu0 %v4631_v44  ;;  %v1556_v53 = vrot.slane %v1551_v59, 4  ;;  %v4731_v36 = vor.u32 %v5901_v6, %v4730_v19  ;;  %v3801_v1 = vpop.f32.mrf.mxu0  ;;  %v4831_v44 = vor.u32 %v5919_v45, %v4828_v29  ;;  %1569 = vst [vmem:[#allocation2 + $0x74c] sm:$0xf] %v1560_v51  ;;  %v4538_v17 = vld [vmem:[#allocation2 + $0x20] sm:$0xf] }
 0x26a   : > { %v3813_v46 = vadd.f32 %v3812_v62, %v3800_v47  ;;  %v5163_v62 = vor.u32 %v6009_v32, %v5162_v52  ;;  %v5883_v6 = vld [vmem:[#allocation2 + $0x144] sm:$0xf]  ;;  %v5018_v14 = vld [vmem:[#allocation2 + $0x3e0] sm:$0xf]  ;;  %v5973_v45 = vld [vmem:[#allocation2 + $0x40c] sm:$0xf0] }
 0x26b   : > { %v1561_v3 = vsel %vm198_vm0, %v1556_v53, %v1557_v55  ;;  %v5877_v55 = vld [vmem:[#allocation2 + $0x10c] sm:$0xf0]  ;;  %v5066_v53 = vld [vmem:[#allocation2 + $0x440] sm:$0xf]  ;;  %v3851_v29 = vpop.f32.mrf.mxu2  ;;  %v6027_v22 = vld [vmem:[#allocation2 + $0x5c4] sm:$0xf] }
 0x26c   : > { %4135 = vmatpush.bf16.msrb.mxu3 %v5687_v21  ;;  %v3826_v27 = vadd.f32 %v3825_v24, %v3813_v46  ;;  %v1554_v21 = vrot.slane %v7557_v48, 4  ;;  %v1562_v33 = vsel %vm200_vm3, %v1551_v59, %v1561_v3  ;;  %v4732_v24 = vld [vmem:[#allocation2 + $0x1d0] sm:$0xf0]  ;;  %v1729_v61 = vpop.permute.xlu0 %1728  ;;  %v5067_v30 = vor.u32 %v5985_v25, %v5066_v53  ;;  %v6015_v1 = vld [vmem:[#allocation2 + $0x564] sm:$0xf] }
 0x26d   : > { %4186 = vmatpush.bf16.msra.mxu2 %v5739_v56  ;;  %4095 = vmatpush.bf16.msrb.mxu0 %v4583_v60  ;;  %1570 = vst [vmem:[#allocation2 + $0x774] sm:$0xff] %v1562_v33  ;;  %v4635_v56 = vor.u32 %v5877_v55, %v4634_v28  ;;  %v1736_v57 = vrot.slane %v1729_v61, 4  ;;  %v4735_v23 = vor.u32 %v5895_v8, %v4732_v24  ;;  %v4684_v59 = vld [vmem:[#allocation2 + $0x170] sm:$0xf0]  ;;  %v4970_v51 = vld [vmem:[#allocation2 + $0x380] sm:$0xf] }
 0x26e   : > { %4350 = vst [vmem:[%s7534_s27 + $0x8] sm:$0xff] %v3826_v27  ;;  %v1558_v9 = vsel %vm198_vm0, %v1554_v21, %v1555_v40  ;;  %v4687_v3 = vor.u32 %v5883_v6, %v4684_v59  ;;  %v4636_v21 = vld [vmem:[#allocation2 + $0x110] sm:$0xf0]  ;;  %v5019_v28 = vor.u32 %v5973_v45, %v5018_v14  ;;  %v5266_v25 = vld [vmem:[#allocation2 + $0x5c8] sm:$0xf] }
 0x26f   : > { %v4540_v24 = vld [vmem:[#allocation2 + $0x50] sm:$0xf0]  ;;  %v6022_v53 = vld [vmem:[#allocation2 + $0x594] sm:$0xf0] }
 0x270   : > { %4141 = vmatpush.bf16.msra.mxu3 %v4875_v35  ;;  %v7576_v35 = vpop.permute.xlu2 %1732  ;;  %v1731_v18 = vpop.permute.xlu1 %1730  ;;  %v5644_v6 = vld [vmem:[#allocation2 + $0x8f0] sm:$0xf0] }
 0x271   : > { %4187 = vmatpush.bf16.msra.mxu2 %v5691_v20  ;;  %4096 = vmatpush.bf16.msrb.mxu0 %v4535_v16  ;;  %v1737_v54 = vrot.slane %v1731_v18, 4  ;;  %v5853_v16 = vld [vmem:[#allocation2 + $0x4c] sm:$0xf0]  ;;  %v1738_v12 = vrot.slane %v7576_v35, 4  ;;  %v5116_v59 = vld [vmem:[#allocation2 + $0x4d0] sm:$0xf0] }
 0x272   : > { %v4539_v19 = vor.u32 %v5853_v16, %v4538_v17  ;;  %v6034_v17 = vld [vmem:[#allocation2 + $0x5f4] sm:$0xf0]  ;;  %v5596_v14 = vld [vmem:[#allocation2 + $0x890] sm:$0xf0] }
 0x273   : > { %5807 = vmatmul.msk.bf16.vlgmr.msrb.gmra.mxu3 %vm3721_vm9, %v7073_v2  ;;  %v1742_v60 = vsel %vm389_vm7, %v1731_v18, %v1737_v54  ;;  %v1740_v38 = vsel %vm198_vm0, %v1736_v57, %v1737_v54  ;;  %v4588_v18 = vld [vmem:[#allocation2 + $0xb0] sm:$0xf0]  ;;  %v5859_v54 = vld [vmem:[#allocation2 + $0x84] sm:$0xf]  ;;  %v3864_v57 = vpop.f32.mrf.mxu0 }
 0x274   : > { %4142 = vmatpush.bf16.msra.mxu3 %v4827_v5  ;;  %4097 = vmatmul.bf16.vlgmr.msrb.gmra.mxu0 %v6780_v7  ;;  %v1559_v5 = vsel %vm200_vm3, %v7557_v48, %v1558_v9  ;;  %v5114_v48 = vld [vmem:[#allocation2 + $0x4a0] sm:$0xf]  ;;  %1751 = vst [vmem:[#allocation2 + $0x9ec] sm:$0xf] %v1742_v60  ;;  %v1741_v20 = vsel %vm389_vm7, %v1729_v61, %v1740_v38  ;;  %v1735_v40 = vpop.permute.xlu0 %1734  ;;  %v3877_v61 = vpop.f32.mrf.mxu1 }
 0x275   : > { %4193 = vmatpush.bf16.msrb.mxu2 %v4879_v39  ;;  %4154 = vmatpush.bf16.msra.mxu0 %v5259_v13  ;;  %1568 = vst [vmem:[#allocation2 + $0x744] sm:$0xff] %v1559_v5  ;;  %v5115_v4 = vor.u32 %v5997_v11, %v5114_v48  ;;  %v5260_v13 = vld [vmem:[#allocation2 + $0x5f0] sm:$0xf0]  ;;  %v1739_v9 = vrot.slane %v1735_v40, 4  ;;  %v4591_v48 = vor.u32 %v5859_v54, %v4588_v18  ;;  %v5949_v11 = vld [vmem:[#allocation2 + $0x34c] sm:$0xf0] }
 0x276   : > { %1750 = vst [vmem:[#allocation2 + $0x9e4] sm:$0xff] %v1741_v20  ;;  %v5263_v41 = vor.u32 %v6027_v22, %v5260_v13  ;;  %v6010_v18 = vld [vmem:[#allocation2 + $0x534] sm:$0xf0] }
 0x277   : > { %v1743_v5 = vsel %vm198_vm0, %v1738_v12, %v1739_v9  ;;  %v1745_v32 = vsel %vm389_vm7, %v1735_v40, %v1739_v9  ;;  %v6111_v40 = vld [vmem:[#allocation2 + $0x864] sm:$0xf]  ;;  %v5068_v12 = vld [vmem:[#allocation2 + $0x470] sm:$0xf0] }
 0x278   : > { %4143 = vmatpush.bf16.msra.mxu3 %v4779_v42  ;;  %v1705_v49 = vpop.permute.xlu2 %1704  ;;  %5808 = vmatmul.msk.bf16.vlgmr.msra.gmra.mxu2 %vm3721_vm9, %v7073_v2  ;;  %v4586_v42 = vld [vmem:[#allocation2 + $0x80] sm:$0xf]  ;;  %v1703_v39 = vpop.permute.xlu1 %1702  ;;  %v1744_v63 = vsel %vm389_vm7, %v7576_v35, %v1743_v5  ;;  %1753 = vst [vmem:[#allocation2 + $0xa1c] sm:$0xf] %v1745_v32  ;;  %v5599_v5 = vor.u32 %v6111_v40, %v5596_v14 }
 0x279   : > { %4194 = vmatpush.bf16.msrb.mxu2 %v4831_v44  ;;  %4155 = vmatpush.bf16.msra.mxu0 %v5211_v26  ;;  %v1711_v47 = vrot.slane %v1705_v49, 4  ;;  %v4587_v46 = vor.u32 %v5865_v0, %v4586_v42  ;;  %v1710_v27 = vrot.slane %v1703_v39, 4  ;;  %v5212_v44 = vld [vmem:[#allocation2 + $0x590] sm:$0xf0]  ;;  %v5961_v26 = vld [vmem:[#allocation2 + $0x3ac] sm:$0xf0]  ;;  %v3853_v35 = vpop.f32.mrf.mxu2 }
 0x27a   : > { %1752 = vst [vmem:[#allocation2 + $0xa14] sm:$0xff] %v1744_v63  ;;  %v4971_v55 = vor.u32 %v5961_v26, %v4970_v51 }
 0x27b   : > { %v1716_v10 = vsel %vm362_vm8, %v1705_v49, %v1711_v47  ;;  %v1714_v33 = vsel %vm198_vm0, %v1710_v27, %v1711_v47  ;;  %v6003_v49 = vld [vmem:[#allocation2 + $0x504] sm:$0xf]  ;;  %v3866_v51 = vpop.f32.mrf.mxu0 }
 0x27c   : > { %4144 = vmatpush.bf16.msra.mxu3 %v4731_v36  ;;  %1725 = vst [vmem:[#allocation2 + $0x98c] sm:$0xf] %v1716_v10  ;;  %v3838_v36 = vpop.f32.mrf.mxu3  ;;  %v1715_v43 = vsel %vm362_vm8, %v1703_v39, %v1714_v33  ;;  %v1707_v8 = vpop.permute.xlu0 %1706  ;;  %v5218_v10 = vld [vmem:[#allocation2 + $0x568] sm:$0xf]  ;;  %v5991_v39 = vld [vmem:[#allocation2 + $0x4a4] sm:$0xf] }
 0x27d   : > { %4195 = vmatpush.bf16.msrb.mxu2 %v4783_v15  ;;  %4156 = vmatpush.bf16.msra.mxu0 %v5163_v62  ;;  %1724 = vst [vmem:[#allocation2 + $0x984] sm:$0xff] %v1715_v43  ;;  %v3852_v52 = vadd.f32 %v3851_v29, %v3838_v36  ;;  %v5215_v15 = vor.u32 %v6015_v1, %v5212_v44  ;;  %v5847_v62 = vld [vmem:[#allocation2 + $0x24] sm:$0xf]  ;;  %v3879_v43 = vpop.f32.mrf.mxu1 }
 0x27e   : > { %v4543_v42 = vor.u32 %v5847_v62, %v4540_v24  ;;  %v6123_v27 = vld [vmem:[#allocation2 + $0x8c4] sm:$0xf]  ;;  %v5267_v36 = vor.u32 %v6034_v17, %v5266_v25  ;;  %v5119_v33 = vor.u32 %v5991_v39, %v5116_v59  ;;  %v5020_v24 = vld [vmem:[#allocation2 + $0x410] sm:$0xf0] }
 0x27f   : > { %v3865_v47 = vadd.f32 %v3864_v57, %v3852_v52  ;;  %v5967_v62 = vld [vmem:[#allocation2 + $0x3e4] sm:$0xf]  ;;  %v4924_v39 = vld [vmem:[#allocation2 + $0x350] sm:$0xf0] }
 0x280   : > { %4145 = vmatpush.bf16.msra.mxu3 %v4683_v34  ;;  %v7592_v37 = vpop.permute.xlu2 %1676  ;;  %v4639_v34 = vor.u32 %v5871_v31, %v4636_v21  ;;  %v1709_v60 = vpop.permute.xlu1 %1708  ;;  %v6159_v21 = vld [vmem:[#allocation2 + $0x9e4] sm:$0xf]  ;;  %v5023_v17 = vor.u32 %v5967_v62, %v5020_v24  ;;  %v5356_v24 = vld [vmem:[#allocation2 + $0x6b0] sm:$0xf0] }
 0x281   : > { %4196 = vmatpush.bf16.msrb.mxu2 %v4735_v23  ;;  %4157 = vmatpush.bf16.msra.mxu0 %v5115_v4  ;;  %v1713_v0 = vrot.slane %v1709_v60, 4  ;;  %v1712_v4 = vrot.slane %v1707_v8, 4  ;;  %v3878_v20 = vadd.f32 %v3877_v61, %v3865_v47  ;;  %v5788_v22 = vld [vmem:[#allocation2 + $0xa10] sm:$0xf0]  ;;  %v3916_v26 = vpop.f32.mrf.mxu2  ;;  %v1684_v52 = vrot.slane %v7592_v37, 4 }
 0x282   : > { %v5791_v45 = vor.u32 %v6159_v21, %v5788_v22  ;;  %v5955_v61 = vld [vmem:[#allocation2 + $0x384] sm:$0xf]  ;;  %v6130_v21 = vld [vmem:[#allocation2 + $0x8f4] sm:$0xf0] }
 0x283   : > { %v1719_v38 = vsel %vm362_vm8, %v1709_v60, %v1713_v0  ;;  %4351 = vst [vmem:[%s7534_s27 + $0x10] sm:$0xff] %v3878_v20  ;;  %v6099_v60 = vld [vmem:[#allocation2 + $0x804] sm:$0xf] }
 0x284   : > { %4146 = vmatpush.bf16.msra.mxu3 %v4635_v56  ;;  %v5164_v56 = vld [vmem:[#allocation2 + $0x530] sm:$0xf0]  ;;  %v3840_v23 = vpop.f32.mrf.mxu3  ;;  %1727 = vst [vmem:[#allocation2 + $0x9bc] sm:$0xf] %v1719_v38  ;;  %4237 = vmatpush.bf16.msrb.mxu1 %v5791_v45  ;;  %v1679_v32 = vpop.permute.xlu0 %1678  ;;  %v6147_v47 = vld [vmem:[#allocation2 + $0x984] sm:$0xf] }
 0x285   : > { %4197 = vmatpush.bf16.msrb.mxu2 %v4687_v3  ;;  %4158 = vmatpush.bf16.msra.mxu0 %v5067_v30  ;;  %v5167_v16 = vor.u32 %v6003_v49, %v5164_v56  ;;  %v5647_v30 = vor.u32 %v6123_v27, %v5644_v6  ;;  %v5122_v6 = vld [vmem:[#allocation2 + $0x4a8] sm:$0xf]  ;;  %v6075_v27 = vld [vmem:[#allocation2 + $0x744] sm:$0xf] }
 0x286   : > { %v6063_v22 = vld [vmem:[#allocation2 + $0x6e4] sm:$0xf] }
 0x288   : > { %4147 = vmatpush.bf16.msra.mxu3 %v4587_v46  ;;  %v4922_v46 = vld [vmem:[#allocation2 + $0x320] sm:$0xf]  ;;  %v1683_v29 = vpop.permute.xlu2 %1682  ;;  %v1681_v44 = vpop.permute.xlu1 %1680 }
 0x289   : > { %4198 = vmatpush.bf16.msrb.mxu2 %v4639_v34  ;;  %4159 = vmatpush.bf16.msra.mxu0 %v5019_v28  ;;  %v4923_v13 = vor.u32 %v5949_v11, %v4922_v46  ;;  %v1687_v31 = vrot.slane %v1683_v29, 4  ;;  %v1686_v9 = vrot.slane %v1681_v44, 4  ;;  %v5219_v34 = vor.u32 %v6022_v53, %v5218_v10  ;;  %v5170_v28 = vld [vmem:[#allocation2 + $0x508] sm:$0xf]  ;;  %v6087_v46 = vld [vmem:[#allocation2 + $0x7a4] sm:$0xf]  ;;  %v3918_v25 = vpop.f32.mrf.mxu2 }
 0x28a   : > { %v5171_v49 = vor.u32 %v6010_v18, %v5170_v28  ;;  %v5074_v53 = vld [vmem:[#allocation2 + $0x448] sm:$0xf]  ;;  %v5926_v18 = vld [vmem:[#allocation2 + $0x294] sm:$0xf0] }
 0x28b   : > { %v1693_v1 = vsel %vm335_vm6, %v1683_v29, %v1687_v31  ;;  %v1691_v54 = vsel %vm198_vm0, %v1686_v9, %v1687_v31  ;;  %v5452_v29 = vld [vmem:[#allocation2 + $0x770] sm:$0xf0]  ;;  %v5938_v31 = vld [vmem:[#allocation2 + $0x2f4] sm:$0xf0]  ;;  %v5650_v9 = vld [vmem:[#allocation2 + $0x8c8] sm:$0xf] }
 0x28c   : > { %4148 = vmatpush.bf16.msra.mxu3 %v4539_v19  ;;  %v1717_v19 = vsel %vm198_vm0, %v1712_v4, %v1713_v0  ;;  %1701 = vst [vmem:[#allocation2 + $0x95c] sm:$0xf] %v1693_v1  ;;  %v1692_v56 = vsel %vm335_vm6, %v1681_v44, %v1691_v54  ;;  %v3890_v35 = vpop.f32.mrf.mxu3  ;;  %v3903_v4 = vpop.f32.mrf.mxu1  ;;  %v4882_v1 = vld [vmem:[#allocation2 + $0x2c8] sm:$0xf]  ;;  %v5974_v44 = vld [vmem:[#allocation2 + $0x414] sm:$0xf0] }
 0x28d   : > { %4199 = vmatpush.bf16.msrb.mxu2 %v4591_v48  ;;  %4160 = vmatpush.bf16.msra.mxu0 %v4971_v55  ;;  %v1718_v3 = vsel %vm362_vm8, %v1707_v8, %v1717_v19  ;;  %v5548_v55 = vld [vmem:[#allocation2 + $0x830] sm:$0xf0]  ;;  %1700 = vst [vmem:[#allocation2 + $0x954] sm:$0xff] %v1692_v56  ;;  %v3904_v20 = vadd.f32 %v3903_v4, %v3890_v35  ;;  %v5962_v54 = vld [vmem:[#allocation2 + $0x3b4] sm:$0xf0] }
 0x28e   : > { %1726 = vst [vmem:[#allocation2 + $0x9b4] sm:$0xff] %v1718_v3  ;;  %v4972_v48 = vld [vmem:[#allocation2 + $0x3b0] sm:$0xf0]  ;;  %v5551_v11 = vor.u32 %v6099_v60, %v5548_v55  ;;  %v5943_v3 = vld [vmem:[#allocation2 + $0x324] sm:$0xf]  ;;  %v4883_v28 = vor.u32 %v5938_v31, %v4882_v1 }
 0x28f   : > { %4149 = vmatmul.bf16.vlgmr.msra.gmra.mxu3 %v6780_v7  ;;  %v4975_v59 = vor.u32 %v5955_v61, %v4972_v48  ;;  %v4927_v43 = vor.u32 %v5943_v3, %v4924_v39  ;;  %v4834_v56 = vld [vmem:[#allocation2 + $0x268] sm:$0xf]  ;;  %v5914_v35 = vld [vmem:[#allocation2 + $0x234] sm:$0xf0]  ;;  %v6112_v3 = vld [vmem:[#allocation2 + $0x86c] sm:$0xf] }
 0x290   : > { %4206 = vmatpush.bf16.msrb.mxu3 %v5263_v41  ;;  %v5979_v41 = vld [vmem:[#allocation2 + $0x444] sm:$0xf]  ;;  %v4835_v48 = vor.u32 %v5926_v18, %v4834_v56  ;;  %v6166_v4 = vld [vmem:[#allocation2 + $0xa14] sm:$0xf0]  ;;  %v5794_v39 = vld [vmem:[#allocation2 + $0x9e8] sm:$0xf] }
 0x291   : > { %4200 = vmatpush.bf16.msrb.mxu2 %v4543_v42  ;;  %4161 = vmatpush.bf16.msra.mxu0 %v4923_v13  ;;  %v5071_v63 = vor.u32 %v5979_v41, %v5068_v12  ;;  %v5998_v42 = vld [vmem:[#allocation2 + $0x4d4] sm:$0xf0]  ;;  %v5455_v41 = vor.u32 %v6075_v27, %v5452_v29  ;;  %v7617_v25 = vpop.f32.mrf.mxu2  ;;  %v5795_v27 = vor.u32 %v6166_v4, %v5794_v39  ;;  %v4738_v29 = vld [vmem:[#allocation2 + $0x1a8] sm:$0xf]  ;;  %v5932_v56 = vld [vmem:[#allocation2 + $0x2cc] sm:$0xf] }
 0x292   : > { %v5123_v10 = vor.u32 %v5998_v42, %v5122_v6  ;;  %v5986_v13 = vld [vmem:[#allocation2 + $0x474] sm:$0xf0]  ;;  %v6039_v42 = vld [vmem:[#allocation2 + $0x624] sm:$0xf]  ;;  %v5410_v1 = vld [vmem:[#allocation2 + $0x6e8] sm:$0xf] }
 0x293   : > { %v5075_v45 = vor.u32 %v5986_v13, %v5074_v53  ;;  %v5506_v13 = vld [vmem:[#allocation2 + $0x7a8] sm:$0xf]  ;;  %v4788_v4 = vld [vmem:[#allocation2 + $0x238] sm:$0xf0]  ;;  %v6046_v39 = vld [vmem:[#allocation2 + $0x654] sm:$0xf0] }
 0x294   : > { %4207 = vmatpush.bf16.msrb.mxu3 %v5215_v15  ;;  %4201 = vmatmul.bf16.vlgmr.msrb.gmra.mxu2 %v6780_v7  ;;  %v1685_v15 = vrot.slane %v1679_v32, 4  ;;  %v3892_v14 = vpop.f32.mrf.mxu3 }
 0x295   : > { %4258 = vmatpush.bf16.msra.mxu2 %v5267_v36  ;;  %4219 = vmatpush.bf16.msrb.mxu0 %v5647_v30  ;;  %v5740_v23 = vld [vmem:[#allocation2 + $0x9b0] sm:$0xf0]  ;;  %v3917_v36 = vadd.f32 %v3916_v26, %v3904_v20  ;;  %v5026_v26 = vld [vmem:[#allocation2 + $0x3e8] sm:$0xf]  ;;  %v6154_v31 = vld [vmem:[#allocation2 + $0x9b4] sm:$0xf0] }
 0x296   : > { %4162 = vmatmul.bf16.vlgmr.msra.gmra.mxu0 %v6938_v58  ;;  %v1688_v0 = vsel %vm198_vm0, %v1684_v52, %v1685_v15  ;;  %v1690_v57 = vsel %vm335_vm6, %v1679_v32, %v1685_v15  ;;  %v5743_v38 = vor.u32 %v6147_v47, %v5740_v23  ;;  %v5692_v30 = vld [vmem:[#allocation2 + $0x950] sm:$0xf0]  ;;  %v4978_v52 = vld [vmem:[#allocation2 + $0x388] sm:$0xf]  ;;  %v6118_v15 = vld [vmem:[#allocation2 + $0x894] sm:$0xf0]  ;;  %v5027_v62 = vor.u32 %v5974_v44, %v5026_v26 }
 0x297   : > { %v1689_v8 = vsel %vm335_vm6, %v7592_v37, %v1688_v0  ;;  %1699 = vst [vmem:[#allocation2 + $0x92c] sm:$0xf] %v1690_v57  ;;  %v3929_v37 = vpop.f32.mrf.mxu0  ;;  %v4979_v60 = vor.u32 %v5962_v54, %v4978_v52  ;;  %v6106_v0 = vld [vmem:[#allocation2 + $0x834] sm:$0xf0]  ;;  %v6051_v57 = vld [vmem:[#allocation2 + $0x684] sm:$0xf] }
 0x298   : > { %4208 = vmatpush.bf16.msrb.mxu3 %v5167_v16  ;;  %1698 = vst [vmem:[#allocation2 + $0x924] sm:$0xff] %v1689_v8  ;;  %v5500_v16 = vld [vmem:[#allocation2 + $0x7d0] sm:$0xf0]  ;;  %4238 = vmatpush.bf16.msrb.mxu1 %v5743_v38  ;;  %v3930_v40 = vadd.f32 %v3929_v37, %v3917_v36  ;;  %v5950_v8 = vld [vmem:[#allocation2 + $0x354] sm:$0xf0] }
 0x299   : > { %4259 = vmatpush.bf16.msra.mxu2 %v5219_v34  ;;  %4220 = vmatpush.bf16.msrb.mxu0 %v5599_v5  ;;  %v5503_v19 = vor.u32 %v6087_v46, %v5500_v16  ;;  %v5651_v34 = vor.u32 %v6130_v21, %v5650_v9  ;;  %v5602_v5 = vld [vmem:[#allocation2 + $0x868] sm:$0xf]  ;;  %v5652_v16 = vld [vmem:[#allocation2 + $0x8f8] sm:$0xf0]  ;;  %v5902_v46 = vld [vmem:[#allocation2 + $0x1d4] sm:$0xf0]  ;;  %v3983_v52 = vpop.f32.mrf.mxu2 }
 0x29a   : > { %5812 = vst [vmem:[%s7534_s27 + $0x18] sm:$0xff] %v3930_v40  ;;  %v5603_v61 = vor.u32 %v6118_v15, %v5602_v5  ;;  %v4786_v47 = vld [vmem:[#allocation2 + $0x208] sm:$0xf]  ;;  %v4739_v21 = vor.u32 %v5902_v46, %v4738_v29  ;;  %v6082_v40 = vld [vmem:[#allocation2 + $0x774] sm:$0xf0] }
 0x29b   : > { %v5554_v23 = vld [vmem:[#allocation2 + $0x808] sm:$0xf]  ;;  %v4787_v6 = vor.u32 %v5914_v35, %v4786_v47  ;;  %v6070_v44 = vld [vmem:[#allocation2 + $0x714] sm:$0xf0]  ;;  %v5556_v9 = vld [vmem:[#allocation2 + $0x838] sm:$0xf0] }
 0x29c   : > { %4209 = vmatpush.bf16.msrb.mxu3 %v5119_v33  ;;  %v5404_v33 = vld [vmem:[#allocation2 + $0x710] sm:$0xf0]  ;;  %v5555_v38 = vor.u32 %v6106_v0, %v5554_v23  ;;  %v4690_v14 = vld [vmem:[#allocation2 + $0x148] sm:$0xf]  ;;  %v6100_v54 = vld [vmem:[#allocation2 + $0x80c] sm:$0xf]  ;;  %v5411_v15 = vor.u32 %v6070_v44, %v5410_v1 }
 0x29d   : > { %4260 = vmatpush.bf16.msra.mxu2 %v5171_v49  ;;  %4221 = vmatpush.bf16.msrb.mxu0 %v5551_v11  ;;  %v5407_v32 = vor.u32 %v6063_v22, %v5404_v33  ;;  %v4930_v49 = vld [vmem:[#allocation2 + $0x328] sm:$0xf]  ;;  %v5359_v11 = vor.u32 %v6051_v57, %v5356_v24  ;;  %v5890_v22 = vld [vmem:[#allocation2 + $0x174] sm:$0xf0]  ;;  %v6088_v47 = vld [vmem:[#allocation2 + $0x7ac] sm:$0xf] }
 0x29e   : > { %v4931_v37 = vor.u32 %v5950_v8, %v4930_v49  ;;  %v5458_v33 = vld [vmem:[#allocation2 + $0x748] sm:$0xf]  ;;  %v4691_v5 = vor.u32 %v5890_v22, %v4690_v14  ;;  %v6058_v35 = vld [vmem:[#allocation2 + $0x6b4] sm:$0xf0]  ;;  %v4836_v8 = vld [vmem:[#allocation2 + $0x298] sm:$0xf0] }
 0x29f   : > { %v6135_v12 = vld [vmem:[#allocation2 + $0x924] sm:$0xf]  ;;  %v3931_v55 = vpop.f32.mrf.mxu0  ;;  %v5698_v26 = vld [vmem:[#allocation2 + $0x928] sm:$0xf]  ;;  %v6064_v29 = vld [vmem:[#allocation2 + $0x6ec] sm:$0xf] }
 0x2a0   : > { %4210 = vmatpush.bf16.msrb.mxu3 %v5071_v63  ;;  %v5695_v51 = vor.u32 %v6135_v12, %v5692_v30  ;;  %v3905_v63 = vpop.f32.mrf.mxu1  ;;  %v5878_v55 = vld [vmem:[#allocation2 + $0x114] sm:$0xf0]  ;;  %v4642_v57 = vld [vmem:[#allocation2 + $0xe8] sm:$0xf]  ;;  %v5268_v22 = vld [vmem:[#allocation2 + $0x5f8] sm:$0xf0] }
 0x2a1   : > { %4261 = vmatpush.bf16.msra.mxu2 %v5123_v10  ;;  %4222 = vmatpush.bf16.msrb.mxu0 %v5503_v19  ;;  %v6124_v10 = vld [vmem:[#allocation2 + $0x8cc] sm:$0xf]  ;;  %v4643_v49 = vor.u32 %v5878_v55, %v4642_v57  ;;  %v4594_v23 = vld [vmem:[#allocation2 + $0x88] sm:$0xf]  ;;  %v5748_v44 = vld [vmem:[#allocation2 + $0x9b8] sm:$0xf0] }
 0x2a2   : > { %4239 = vmatpush.bf16.msrb.mxu1 %v5695_v51  ;;  %v5655_v19 = vor.u32 %v6124_v10, %v5652_v16  ;;  %v5459_v51 = vor.u32 %v6082_v40, %v5458_v33  ;;  %v5362_v16 = vld [vmem:[#allocation2 + $0x688] sm:$0xf]  ;;  %v6160_v40 = vld [vmem:[#allocation2 + $0x9ec] sm:$0xf]  ;;  %v4644_v57 = vld [vmem:[#allocation2 + $0x118] sm:$0xf0] }
 0x2a3   : > { %v6028_v1 = vld [vmem:[#allocation2 + $0x5cc] sm:$0xf] }
 0x2a4   : > { %4211 = vmatpush.bf16.msrb.mxu3 %v5023_v17  ;;  %v5308_v17 = vld [vmem:[#allocation2 + $0x650] sm:$0xf0] }
 0x2a5   : > { %4262 = vmatpush.bf16.msra.mxu2 %v5075_v45  ;;  %4223 = vmatpush.bf16.msrb.mxu0 %v5455_v41  ;;  %v5311_v53 = vor.u32 %v6039_v42, %v5308_v17  ;;  %v5604_v45 = vld [vmem:[#allocation2 + $0x898] sm:$0xf0]  ;;  %v5746_v41 = vld [vmem:[#allocation2 + $0x988] sm:$0xf]  ;;  %v5866_v42 = vld [vmem:[#allocation2 + $0xb4] sm:$0xf0] }
 0x2a6   : > { %4245 = vmatpush.bf16.msra.mxu1 %v4883_v28  ;;  %v3942_v36 = vpop.f32.mrf.mxu3  ;;  %v5607_v12 = vor.u32 %v6112_v3, %v5604_v45  ;;  %v4884_v28 = vld [vmem:[#allocation2 + $0x2f8] sm:$0xf0] }
 0x2a7   : > { %5809 = vmatmul.msk.bf16.vlgmr.msrb.gmra.mxu1 %vm3721_vm9, %v7073_v2  ;;  %v4887_v0 = vor.u32 %v5932_v56, %v4884_v28  ;;  %v5796_v3 = vld [vmem:[#allocation2 + $0xa18] sm:$0xf0]  ;;  %v5884_v28 = vld [vmem:[#allocation2 + $0x14c] sm:$0xf] }
 0x2a8   : > { %4212 = vmatpush.bf16.msrb.mxu3 %v4975_v59  ;;  %v6094_v59 = vld [vmem:[#allocation2 + $0x7d4] sm:$0xf0]  ;;  %v3968_v20 = vpop.f32.mrf.mxu1  ;;  %v5172_v56 = vld [vmem:[#allocation2 + $0x538] sm:$0xf0] }
 0x2a9   : > { %4263 = vmatpush.bf16.msra.mxu2 %v5027_v62  ;;  %4224 = vmatpush.bf16.msrb.mxu0 %v5407_v32  ;;  %v5507_v30 = vor.u32 %v6094_v59, %v5506_v13  ;;  %v3955_v32 = vpop.f32.mrf.mxu0  ;;  %v5559_v62 = vor.u32 %v6100_v54, %v5556_v9  ;;  %v5363_v59 = vor.u32 %v6058_v35, %v5362_v16  ;;  %v5896_v9 = vld [vmem:[#allocation2 + $0x1ac] sm:$0xf]  ;;  %v4596_v16 = vld [vmem:[#allocation2 + $0xb8] sm:$0xf0] }
 0x2aa   : > { %4246 = vmatpush.bf16.msra.mxu1 %v4835_v48  ;;  %v3956_v18 = vadd.f32 %v3955_v32, %v3942_v36  ;;  %v5508_v48 = vld [vmem:[#allocation2 + $0x7d8] sm:$0xf0]  ;;  %v6052_v54 = vld [vmem:[#allocation2 + $0x68c] sm:$0xf] }
 0x2ab   : > { %v5511_v17 = vor.u32 %v6088_v47, %v5508_v48  ;;  %v7623_v13 = vpop.f32.mrf.mxu2  ;;  %v5412_v36 = vld [vmem:[#allocation2 + $0x718] sm:$0xf0]  ;;  %v6004_v35 = vld [vmem:[#allocation2 + $0x50c] sm:$0xf] }
 0x2ac   : > { %4213 = vmatpush.bf16.msrb.mxu3 %v4927_v43  ;;  %v5747_v43 = vor.u32 %v6154_v31, %v5746_v41  ;;  %v5908_v31 = vld [vmem:[#allocation2 + $0x20c] sm:$0xf]  ;;  %v5415_v45 = vor.u32 %v6064_v29, %v5412_v36  ;;  %v5799_v41 = vor.u32 %v6160_v40, %v5796_v3  ;;  %v5028_v3 = vld [vmem:[#allocation2 + $0x418] sm:$0xf0] }
 0x2ad   : > { %4264 = vmatpush.bf16.msra.mxu2 %v4979_v60  ;;  %4225 = vmatpush.bf16.msrb.mxu0 %v5359_v11  ;;  %v3969_v60 = vadd.f32 %v3968_v20, %v3956_v18  ;;  %v4546_v20 = vld [vmem:[#allocation2 + $0x28] sm:$0xf]  ;;  %v4791_v14 = vor.u32 %v5908_v31, %v4788_v4  ;;  %v5220_v18 = vld [vmem:[#allocation2 + $0x598] sm:$0xf0]  ;;  %v5872_v47 = vld [vmem:[#allocation2 + $0xec] sm:$0xf] }
 0x2ae   : > { %4247 = vmatpush.bf16.msra.mxu1 %v4787_v6  ;;  %v6076_v6 = vld [vmem:[#allocation2 + $0x74c] sm:$0xf] }
 0x2af   : > { %4214 = vmatmul.bf16.vlgmr.msrb.gmra.mxu3 %v6938_v58  ;;  %v3982_v11 = vadd.f32 %v7617_v25, %v3969_v60  ;;  %v5314_v25 = vld [vmem:[#allocation2 + $0x628] sm:$0xf]  ;;  %v6040_v60 = vld [vmem:[#allocation2 + $0x62c] sm:$0xf] }
 0x2b0   : > { %4271 = vmatpush.bf16.msra.mxu3 %v5651_v34  ;;  %v6142_v34 = vld [vmem:[#allocation2 + $0x954] sm:$0xf0]  ;;  %v3970_v63 = vpop.f32.mrf.mxu1  ;;  %v5315_v33 = vor.u32 %v6046_v39, %v5314_v25  ;;  %v5076_v25 = vld [vmem:[#allocation2 + $0x478] sm:$0xf0] }
 0x2b1   : > { %4265 = vmatpush.bf16.msra.mxu2 %v4931_v37  ;;  %4226 = vmatpush.bf16.msrb.mxu0 %v5311_v53  ;;  %v5699_v24 = vor.u32 %v6142_v34, %v5698_v26  ;;  %5813 = vst [vmem:[%s7534_s27 + $0x20] sm:$0xff] %v3982_v11  ;;  %v5854_v37 = vld [vmem:[#allocation2 + $0x54] sm:$0xf0]  ;;  %v3957_v10 = vpop.f32.mrf.mxu0  ;;  %v5460_v53 = vld [vmem:[#allocation2 + $0x778] sm:$0xf0] }
 0x2b2   : > { %4248 = vmatpush.bf16.msra.mxu1 %v4739_v21  ;;  %v4547_v21 = vor.u32 %v5854_v37, %v4546_v20  ;;  %v5364_v26 = vld [vmem:[#allocation2 + $0x6b8] sm:$0xf0]  ;;  %v6148_v34 = vld [vmem:[#allocation2 + $0x98c] sm:$0xf] }
 0x2b3   : > { %v5751_v32 = vor.u32 %v6148_v34, %v5748_v44  ;;  %v3996_v63 = vpop.f32.mrf.mxu2  ;;  %v5980_v20 = vld [vmem:[#allocation2 + $0x44c] sm:$0xf]  ;;  %v4548_v10 = vld [vmem:[#allocation2 + $0x58] sm:$0xf0] }
 0x2b4   : > { %4272 = vmatpush.bf16.msra.mxu3 %v5603_v61  ;;  %4227 = vmatmul.bf16.vlgmr.msrb.gmra.mxu0 %v7003_v50  ;;  %v3944_v61 = vpop.f32.mrf.mxu3  ;;  %v5848_v37 = vld [vmem:[#allocation2 + $0x2c] sm:$0xf] }
 0x2b5   : > { %4323 = vmatpush.bf16.msrb.mxu2 %v5655_v19  ;;  %4289 = vmatpush.bf16.msra.mxu0 %v5795_v27  ;;  %v4595_v19 = vor.u32 %v5866_v42, %v4594_v23  ;;  %v5700_v61 = vld [vmem:[#allocation2 + $0x958] sm:$0xf0]  ;;  %v4647_v42 = vor.u32 %v5872_v47, %v4644_v57  ;;  %v4551_v29 = vor.u32 %v5848_v37, %v4548_v10 }
 0x2b6   : > { %4266 = vmatmul.bf16.vlgmr.msra.gmra.mxu2 %v6938_v58  ;;  %4249 = vmatpush.bf16.msra.mxu1 %v4691_v5  ;;  %v5124_v23 = vld [vmem:[#allocation2 + $0x4d8] sm:$0xf0] }
 0x2b8   : > { %4273 = vmatpush.bf16.msra.mxu3 %v5555_v38  ;;  %v5920_v38 = vld [vmem:[#allocation2 + $0x26c] sm:$0xf]  ;;  %v7625_v27 = vpop.f32.mrf.mxu1 }
 0x2b9   : > { %4324 = vmatpush.bf16.msrb.mxu2 %v5607_v12  ;;  %4290 = vmatpush.bf16.msra.mxu0 %v5747_v43  ;;  %v4839_v46 = vor.u32 %v5920_v38, %v4836_v8  ;;  %v4740_v12 = vld [vmem:[#allocation2 + $0x1d8] sm:$0xf0]  ;;  %v5271_v43 = vor.u32 %v6028_v1, %v5268_v22  ;;  %v5175_v8 = vor.u32 %v6004_v35, %v5172_v56  ;;  %v5992_v38 = vld [vmem:[#allocation2 + $0x4ac] sm:$0xf] }
 0x2ba   : > { %4250 = vmatpush.bf16.msra.mxu1 %v4643_v49  ;;  %v4743_v5 = vor.u32 %v5896_v9, %v4740_v12  ;;  %v5316_v49 = vld [vmem:[#allocation2 + $0x658] sm:$0xf0] }
 0x2bb   : > { %v5319_v11 = vor.u32 %v6040_v60, %v5316_v49  ;;  %v4980_v22 = vld [vmem:[#allocation2 + $0x3b8] sm:$0xf0] }
 0x2bc   : > { %4274 = vmatpush.bf16.msra.mxu3 %v5507_v30  ;;  %v5463_v30 = vor.u32 %v6076_v6, %v5460_v53  ;;  %v5860_v6 = vld [vmem:[#allocation2 + $0x8c] sm:$0xf] }
 0x2bd   : > { %4325 = vmatpush.bf16.msrb.mxu2 %v5559_v62  ;;  %4291 = vmatpush.bf16.msra.mxu0 %v5699_v24  ;;  %v5367_v62 = vor.u32 %v6052_v54, %v5364_v26  ;;  %v4692_v24 = vld [vmem:[#allocation2 + $0x178] sm:$0xf0]  ;;  %v4599_v53 = vor.u32 %v5860_v6, %v4596_v16 }
 0x2be   : > { %4251 = vmatpush.bf16.msra.mxu1 %v4595_v19  ;;  %v4695_v48 = vor.u32 %v5884_v28, %v4692_v24  ;;  %v5079_v19 = vor.u32 %v5980_v20, %v5076_v25 }
 0x2c0   : > { %4275 = vmatpush.bf16.msra.mxu3 %v5459_v51  ;;  %v6016_v51 = vld [vmem:[#allocation2 + $0x56c] sm:$0xf]  ;;  %v4035_v52 = vpop.f32.mrf.mxu1 }
 0x2c1   : > { %4297 = vmatpush.bf16.msrb.mxu0 %v4887_v0  ;;  %4326 = vmatpush.bf16.msrb.mxu2 %v5511_v17  ;;  %v5223_v55 = vor.u32 %v6016_v51, %v5220_v18 }
 0x2c2   : > { %4252 = vmatpush.bf16.msra.mxu1 %v4547_v21  ;;  %v5956_v21 = vld [vmem:[#allocation2 + $0x38c] sm:$0xf] }
 0x2c4   : > { %4276 = vmatpush.bf16.msra.mxu3 %v5411_v15  ;;  %5810 = vmatmul.msk.bf16.vlgmr.msra.gmra.mxu0 %vm3721_vm9, %v7073_v2  ;;  %v6136_v15 = vld [vmem:[#allocation2 + $0x92c] sm:$0xf] }
 0x2c5   : > { %4298 = vmatpush.bf16.msrb.mxu0 %v4839_v46  ;;  %4327 = vmatpush.bf16.msrb.mxu2 %v5463_v30  ;;  %v5703_v0 = vor.u32 %v6136_v15, %v5700_v61 }
 0x2c6   : > { %4310 = vmatpush.bf16.msrb.mxu1 %v5271_v43  ;;  %v4007_v17 = vpop.f32.mrf.mxu3 }
 0x2c7   : > { %4253 = vmatmul.bf16.vlgmr.msra.gmra.mxu1 %v6780_v7  ;;  %v4008_v46 = vadd.f32 %v4007_v17, %v7623_v13  ;;  %v4020_v39 = vpop.f32.mrf.mxu0  ;;  %v5968_v13 = vld [vmem:[#allocation2 + $0x3ec] sm:$0xf] }
 0x2c8   : > { %4277 = vmatpush.bf16.msra.mxu3 %v5363_v59  ;;  %v4046_v4 = vpop.f32.mrf.mxu1  ;;  %v5127_v59 = vor.u32 %v5992_v38, %v5124_v23 }
 0x2c9   : > { %4299 = vmatpush.bf16.msrb.mxu0 %v4791_v14  ;;  %4328 = vmatpush.bf16.msrb.mxu2 %v5415_v45  ;;  %v4021_v36 = vadd.f32 %v4020_v39, %v4008_v46  ;;  %v4983_v14 = vor.u32 %v5956_v21, %v4980_v22 }
 0x2ca   : > { %4311 = vmatpush.bf16.msrb.mxu1 %v5223_v55 }
 0x2cb   : > { %v4034_v30 = vadd.f32 %v7625_v27, %v4021_v36  ;;  %v4059_v40 = vpop.f32.mrf.mxu2  ;;  %v4932_v27 = vld [vmem:[#allocation2 + $0x358] sm:$0xf0] }
 0x2cc   : > { %4278 = vmatpush.bf16.msra.mxu3 %v5315_v33  ;;  %v4060_v43 = vadd.f32 %v4059_v40, %v4046_v4 }
 0x2cd   : > { %4300 = vmatpush.bf16.msrb.mxu0 %v4743_v5  ;;  %4329 = vmatpush.bf16.msrb.mxu2 %v5367_v62  ;;  %5814 = vst [vmem:[%s7534_s27 + $0x28] sm:$0xff] %v4034_v30 }
 0x2ce   : > { %4312 = vmatpush.bf16.msrb.mxu1 %v5175_v8  ;;  %v4009_v31 = vpop.f32.mrf.mxu3 }
 0x2cf   : > { %4279 = vmatmul.bf16.vlgmr.msra.gmra.mxu3 %v7003_v50  ;;  %v4022_v45 = vpop.f32.mrf.mxu0 }
 0x2d0   : > { %4341 = vmatpush.bf16.msrb.mxu3 %v5799_v41  ;;  %v4048_v33 = vpop.f32.mrf.mxu1  ;;  %v5944_v41 = vld [vmem:[#allocation2 + $0x32c] sm:$0xf] }
 0x2d1   : > { %4301 = vmatpush.bf16.msrb.mxu0 %v4695_v48  ;;  %4330 = vmatpush.bf16.msrb.mxu2 %v5319_v11  ;;  %v4935_v1 = vor.u32 %v5944_v41, %v4932_v27 }
 0x2d2   : > { %4313 = vmatpush.bf16.msrb.mxu1 %v5127_v59 }
 0x2d4   : > { %4342 = vmatpush.bf16.msrb.mxu3 %v5751_v32  ;;  %4331 = vmatmul.bf16.vlgmr.msrb.gmra.mxu2 %v7003_v50  ;;  %v5031_v50 = vor.u32 %v5968_v13, %v5028_v3 }
 0x2d5   : > { %4302 = vmatpush.bf16.msrb.mxu0 %v4647_v42 }
 0x2d6   : > { %4314 = vmatpush.bf16.msrb.mxu1 %v5079_v19 }
 0x2d7   : > { %v4085_v44 = vpop.f32.mrf.mxu0 }
 0x2d8   : > { %4343 = vmatpush.bf16.msrb.mxu3 %v5703_v0  ;;  %v4111_v12 = vpop.f32.mrf.mxu1 }
 0x2d9   : > { %4303 = vmatpush.bf16.msrb.mxu0 %v4599_v53 }
 0x2da   : > { %4315 = vmatpush.bf16.msrb.mxu1 %v5031_v50 }
 0x2dd   : > { %4304 = vmatpush.bf16.msrb.mxu0 %v4551_v29 }
 0x2de   : > { %4316 = vmatpush.bf16.msrb.mxu1 %v4983_v14 }
 0x2df   : > { %5811 = vmatmul.msk.bf16.vlgmr.msrb.gmra.mxu3 %vm3721_vm9, %v7073_v2  ;;  %v4061_v2 = vpop.f32.mrf.mxu2  ;;  %v4087_v34 = vpop.f32.mrf.mxu0 }
 0x2e0   : > { %4305 = vmatmul.bf16.vlgmr.msrb.gmra.mxu0 %v6780_v7  ;;  %v4113_v9 = vpop.f32.mrf.mxu1 }
 0x2e2   : > { %4317 = vmatpush.bf16.msrb.mxu1 %v4935_v1 }
 0x2e5   : > { %4318 = vmatmul.bf16.vlgmr.msrb.gmra.mxu1 %v6938_v58 }
 0x2e6   : > { %v4072_v51 = vpop.f32.mrf.mxu3 }
 0x2e7   : > { %v4073_v26 = vadd.f32 %v4072_v51, %v4060_v43 }
 0x2e8   : > { %v4176_v7 = vpop.f32.mrf.mxu1 }
 0x2e9   : > { %v4086_v5 = vadd.f32 %v4085_v44, %v4073_v26 }
 0x2eb   : > { %5815 = vst [vmem:[%s7534_s27 + $0x30] sm:$0xff] %v4086_v5  ;;  %v4124_v28 = vpop.f32.mrf.mxu2 }
 0x2ee   : > { %v4074_v32 = vpop.f32.mrf.mxu3 }
 0x2f0   : > { %v4178_v18 = vpop.f32.mrf.mxu1 }
 0x2f1   : > { %v4098_v63 = vpop.f32.mrf.mxu0 }
 0x2f2   : > { %v4112_v52 = vadd.f32 %v4111_v12, %v4098_v63 }
 0x2f3   : > { %v4126_v55 = vpop.f32.mrf.mxu2 }
 0x2f4   : > { %v4125_v15 = vadd.f32 %v4124_v28, %v4112_v52 }
 0x2f6   : > { %v4137_v54 = vpop.f32.mrf.mxu3 }
 0x2f7   : > { %v4138_v62 = vadd.f32 %v4137_v54, %v4125_v15 }
 0x2f9   : > { %5816 = vst [vmem:[%s7534_s27 + $0x38] sm:$0xff] %v4138_v62  ;;  %v4100_v58 = vpop.f32.mrf.mxu0 }
 0x2fb   : > { %v4189_v56 = vpop.f32.mrf.mxu2 }
 0x2fe   : > { %v4139_v24 = vpop.f32.mrf.mxu3 }
 0x303   : > { %v4191_v60 = vpop.f32.mrf.mxu2 }
 0x312   : > { %v4150_v61 = vpop.f32.mrf.mxu3 }
 0x313   : > { %v4163_v48 = vpop.f32.mrf.mxu0 }
 0x314   : > { %v4164_v0 = vadd.f32 %v4163_v48, %v4150_v61 }
 0x316   : > { %v4177_v57 = vadd.f32 %v4176_v7, %v4164_v0 }
 0x317   : > { %v4202_v8 = vpop.f32.mrf.mxu2 }
 0x318   : > { %v4190_v49 = vadd.f32 %v4189_v56, %v4177_v57 }
 0x31a   : > { %v4152_v35 = vpop.f32.mrf.mxu3  ;;  %5817 = vst [vmem:[%s7534_s27 + $0x40] sm:$0xff] %v4190_v49 }
 0x31b   : > { %v4165_v11 = vpop.f32.mrf.mxu0 }
 0x31f   : > { %v4204_v47 = vpop.f32.mrf.mxu2 }
 0x324   : > { %v4241_v23 = vpop.f32.mrf.mxu1 }
 0x32c   : > { %v4243_v16 = vpop.f32.mrf.mxu1 }
 0x331   : > { %v4228_v38 = vpop.f32.mrf.mxu0 }
 0x332   : > { %v4215_v42 = vpop.f32.mrf.mxu3 }
 0x333   : > { %v4216_v17 = vadd.f32 %v4215_v42, %v4202_v8 }
 0x335   : > { %v4229_v4 = vadd.f32 %v4228_v38, %v4216_v17 }
 0x337   : > { %v4242_v6 = vadd.f32 %v4241_v23, %v4229_v4 }
 0x339   : > { %5818 = vst [vmem:[%s7534_s27 + $0x48] sm:$0xff] %v4242_v6  ;;  %v4267_v46 = vpop.f32.mrf.mxu2  ;;  %v4230_v20 = vpop.f32.mrf.mxu0 }
 0x33a   : > { %v4217_v59 = vpop.f32.mrf.mxu3 }
 0x341   : > { %v4269_v37 = vpop.f32.mrf.mxu2  ;;  %v4293_v10 = vpop.f32.mrf.mxu0 }
 0x344   : > { %v4254_v53 = vpop.f32.mrf.mxu1 }
 0x345   : > { %v4268_v25 = vadd.f32 %v4267_v46, %v4254_v53 }
 0x349   : > { %v4295_v29 = vpop.f32.mrf.mxu0 }
 0x34c   : > { %v4256_v3 = vpop.f32.mrf.mxu1 }
 0x352   : > { %v4280_v39 = vpop.f32.mrf.mxu3 }
 0x353   : > { %v4281_v19 = vadd.f32 %v4280_v39, %v4268_v25 }
 0x355   : > { %v4294_v36 = vadd.f32 %v4293_v10, %v4281_v19 }
 0x357   : > { %5819 = vst [vmem:[%s7534_s27 + $0x50] sm:$0xff] %v4294_v36  ;;  %v4332_v31 = vpop.f32.mrf.mxu2 }
 0x35a   : > { %v4282_v30 = vpop.f32.mrf.mxu3 }
 0x35d   : > { %v4306_v13 = vpop.f32.mrf.mxu0 }
 0x35f   : > { %v4334_v22 = vpop.f32.mrf.mxu2 }
 0x362   : > { %v4345_v21 = vpop.f32.mrf.mxu3  ;;  %v4319_v50 = vpop.f32.mrf.mxu1 }
 0x363   : > { %v4320_v14 = vadd.f32 %v4319_v50, %v4306_v13 }
 0x365   : > { %v4308_v33 = vpop.f32.mrf.mxu0  ;;  %v4333_v45 = vadd.f32 %v4332_v31, %v4320_v14 }
 0x367   : > { %v4346_v41 = vadd.f32 %v4345_v21, %v4333_v45 }
 0x369   : > { %5820 = vst [vmem:[%s7534_s27 + $0x58] sm:$0xff] %v4346_v41 }
 0x36a   : > { %v4347_v40 = vpop.f32.mrf.mxu3  ;;  %v4321_v27 = vpop.f32.mrf.mxu1 }
 0x36b PF: > { %s12_s13 = sadd.s32 1, %s6261_s13   ;;  %s7663_s9 = smov %s6253_s11 }
 0x36c   : > { %p9_p7 = scmp.ge.s32.totalorder %s12_s13, 10   ;;  %s7664_s10 = smov %s6257_s12 }
 0x36d   : > { %s7665_s11 = smov %s7668_s14  ;;  %s7666_s12 = smov %s7672_s15 }
 0x36e   :  { %11 = sbr.rel (!%p9_p7) target bundleno = 3 (0x3), region = 67 }

</bundles_post_ra>
